<compile_context>
chip_gen: v7x
topology: tpu7x:2x2x1
jax: 0.10.0
libtpu: 0.0.40
codegen_flags: <defaults>
</compile_context>

<pallas_src>
import functools
import math

import jax
import jax.numpy as jnp
from jax.experimental import pallas as pl
from jax.experimental.pallas import tpu as pltpu


# ----------------------------- config ---------------------------------------
class Config:
    vocab_size = 100
    embedding_size = 32
    hidden_size = 64
    num_attention_heads = 4
    intermediate_size = 128
    max_position_embeddings = 32
    type_vocab_size = 2
    num_hidden_layers = 2
    num_hidden_groups = 1          # ALBERT: all layers share one parameter group
    layer_norm_eps = 1e-12
    initializer_range = 0.02
    hidden_dropout_prob = 0.0      # eval mode -> identity
    attention_probs_dropout_prob = 0.0


CFG = Config()


# ----------------------------- Pallas kernel --------------------------------
def _gelu(x):
    # tanh approximation of GELU (f32 math).
    # TODO(synk): if the reference config uses exact erf GELU ("gelu"), outputs
    # differ at ~1e-3 level.
    return 0.5 * x * (1.0 + jnp.tanh(0.7978845608028654 * (x + 0.044715 * x * x * x)))


def _encoder_kernel(
        emb_ref, mask_ref,
        emb_g_ref, emb_b_ref, map_w_ref, map_b_ref,
        wq_ref, wk_ref, wv_ref, bq_ref, bk_ref, bv_ref, wo_ref, ob_ref,
        aln_g_ref, aln_b_ref,
        ffn_w_ref, ffn_b_ref, fo_w_ref, fo_b_ref, fln_g_ref, fln_b_ref,
        seq_ref,
        *, num_layers, num_heads, eps, scale):
    f32 = jnp.float32

    def ln(x, g, b):
        mu = jnp.mean(x, axis=-1, keepdims=True)
        var = jnp.mean(jnp.square(x - mu), axis=-1, keepdims=True)
        return (x - mu) * jax.lax.rsqrt(var + eps) * g + b

    def mm(x, w):
        # bf16 MXU inputs, f32 accumulation.
        return jnp.dot(x.astype(jnp.bfloat16), w.astype(jnp.bfloat16),
                       preferred_element_type=f32)

    mask = mask_ref[...]                                      # (M, M) additive mask

    # ---- embeddings: LayerNorm then embedding_hidden_mapping_in ------------
    x = ln(emb_ref[...], emb_g_ref[...], emb_b_ref[...])
    h = mm(x, map_w_ref[...]) + map_b_ref[...]                # (M, H)

    # ---- shared ALBERT layer applied num_layers times (weights stay in VMEM)
    def layer(_, h):
        # multi-head attention with per-head stacked weights; the output
        # projection is accumulated head-by-head (no concat, no transposes).
        attn = None
        for hh in range(num_heads):
            qh = mm(h, wq_ref[hh]) + bq_ref[hh]               # (M, Dh)
            kh = mm(h, wk_ref[hh]) + bk_ref[hh]
            vh = mm(h, wv_ref[hh]) + bv_ref[hh]
            s = jax.lax.dot_general(
                qh.astype(jnp.bfloat16), kh.astype(jnp.bfloat16),
                (((1,), (1,)), ((), ())), preferred_element_type=f32)
            s = s * scale + mask                              # (M, M)
            s = s - jnp.max(s, axis=-1, keepdims=True)
            p = jnp.exp(s)
            p = p * pl.reciprocal(jnp.sum(p, axis=-1, keepdims=True), approx=True)
            ctx_h = mm(p, vh)                                 # (M, Dh)
            part = mm(ctx_h, wo_ref[hh])                      # (M, H)
            attn = part if attn is None else attn + part
        attn = attn + ob_ref[...]
        h1 = ln(attn + h, aln_g_ref[...], aln_b_ref[...])

        # FFN — the (M, I) intermediate never leaves VMEM / vregs.
        ff = _gelu(mm(h1, ffn_w_ref[...]) + ffn_b_ref[...])
        ff_out = mm(ff, fo_w_ref[...]) + fo_b_ref[...]
        return ln(ff_out + h1, fln_g_ref[...], fln_b_ref[...])

    h = jax.lax.fori_loop(0, num_layers, layer, h, unroll=True)
    seq_ref[...] = h.astype(seq_ref.dtype)


def albert_encoder(emb, mask2d, params, cfg):
    """emb: (M, E) summed embeddings; mask2d: (M, M) additive attention mask."""
    M, _ = emb.shape
    H = cfg.hidden_size
    Hn = cfg.num_attention_heads
    Dh = H // Hn
    lp = params["layer"]
    bf16 = jnp.bfloat16

    def row(v):
        return v.reshape(1, -1).astype(jnp.float32)

    # head-stacked projection weights: leading-axis ref indexing in the kernel.
    wq = lp["q_w"].reshape(H, Hn, Dh).transpose(1, 0, 2).astype(bf16)   # (Hn, H, Dh)
    wk = lp["k_w"].reshape(H, Hn, Dh).transpose(1, 0, 2).astype(bf16)
    wv = lp["v_w"].reshape(H, Hn, Dh).transpose(1, 0, 2).astype(bf16)
    wo = lp["o_w"].reshape(Hn, Dh, H).astype(bf16)                      # (Hn, Dh, H)
    bq = lp["q_b"].reshape(Hn, 1, Dh).astype(jnp.float32)
    bk = lp["k_b"].reshape(Hn, 1, Dh).astype(jnp.float32)
    bv = lp["v_b"].reshape(Hn, 1, Dh).astype(jnp.float32)

    inputs = (
        emb.astype(jnp.float32), mask2d.astype(jnp.float32),
        row(params["emb_ln_g"]), row(params["emb_ln_b"]),
        params["map_w"].astype(bf16), row(params["map_b"]),
        wq, wk, wv, bq, bk, bv, wo, row(lp["o_b"]),
        row(lp["attn_ln_g"]), row(lp["attn_ln_b"]),
        lp["ffn_w"].astype(bf16), row(lp["ffn_b"]),
        lp["ffn_out_w"].astype(bf16), row(lp["ffn_out_b"]),
        row(lp["ffn_ln_g"]), row(lp["ffn_ln_b"]),
    )

    def full_spec(a):
        zeros = (0,) * a.ndim
        return pl.BlockSpec(a.shape, lambda i, _z=zeros: _z)

    kernel = functools.partial(
        _encoder_kernel,
        num_layers=cfg.num_hidden_layers,
        num_heads=Hn,
        eps=cfg.layer_norm_eps,
        scale=1.0 / math.sqrt(Dh),
    )
    return pl.pallas_call(
        kernel,
        out_shape=jax.ShapeDtypeStruct((M, H), jnp.float32),
        grid=(1,),
        in_specs=[full_spec(a) for a in inputs],
        out_specs=pl.BlockSpec((M, H), lambda i: (0, 0)),
        compiler_params=pltpu.CompilerParams(
            dimension_semantics=("arbitrary",)),
    )(*inputs)


# ----------------------------- parameters -----------------------------------
def init_params(cfg, key):
    std = cfg.initializer_range
    ks = iter(jax.random.split(key, 32))

    def nrm(shape):
        return jax.random.normal(next(ks), shape, jnp.float32) * std

    E, H, I = cfg.embedding_size, cfg.hidden_size, cfg.intermediate_size
    p = {
        # embeddings
        "word_emb": nrm((cfg.vocab_size, E)),
        "pos_emb": nrm((cfg.max_position_embeddings, E)),
        "type_emb": nrm((cfg.type_vocab_size, E)),
        "emb_ln_g": jnp.ones((E,), jnp.float32),
        "emb_ln_b": jnp.zeros((E,), jnp.float32),
        # embedding -> hidden mapping
        "map_w": nrm((E, H)), "map_b": jnp.zeros((H,), jnp.float32),
        # shared ALBERT layer (num_hidden_groups == 1), weights stored (in, out)
        "layer": {
            "q_w": nrm((H, H)), "q_b": jnp.zeros((H,), jnp.float32),
            "k_w": nrm((H, H)), "k_b": jnp.zeros((H,), jnp.float32),
            "v_w": nrm((H, H)), "v_b": jnp.zeros((H,), jnp.float32),
            "o_w": nrm((H, H)), "o_b": jnp.zeros((H,), jnp.float32),
            "attn_ln_g": jnp.ones((H,), jnp.float32),
            "attn_ln_b": jnp.zeros((H,), jnp.float32),
            "ffn_w": nrm((H, I)), "ffn_b": jnp.zeros((I,), jnp.float32),
            "ffn_out_w": nrm((I, H)), "ffn_out_b": jnp.zeros((H,), jnp.float32),
            "ffn_ln_g": jnp.ones((H,), jnp.float32),
            "ffn_ln_b": jnp.zeros((H,), jnp.float32),
        },
        # pooler
        "pool_w": nrm((H, H)), "pool_b": jnp.zeros((H,), jnp.float32),
    }
    return p


# ----------------------------- forward --------------------------------------
def albert_forward(params, input_ids, attention_mask=None, token_type_ids=None,
                   position_ids=None, cfg=CFG):
    B, S = input_ids.shape
    H = cfg.hidden_size
    M = B * S

    if attention_mask is None:
        attention_mask = jnp.ones_like(input_ids)
    if token_type_ids is None:
        token_type_ids = jnp.zeros_like(input_ids)
    if position_ids is None:
        position_ids = jnp.arange(S, dtype=jnp.int32)[None, :]
    # TODO(synk): head_mask scaling path not implemented (reference default is None).

    # extended attention mask (1 - mask) * -10000 per key position, combined
    # with a block-diagonal batch mask so attention for all (batch, head)
    # pairs runs as one (M, M) score matrix inside the fused kernel.
    key_mask = ((1.0 - attention_mask.astype(jnp.float32)) * -10000.0).reshape(M)
    batch_idx = jnp.repeat(jnp.arange(B, dtype=jnp.int32), S)
    same_batch = batch_idx[:, None] == batch_idx[None, :]
    mask2d = jnp.where(same_batch, key_mask[None, :], -1e9).astype(jnp.float32)

    # embedding gathers are glue ops in plain JAX
    we = jnp.take(params["word_emb"], input_ids, axis=0)          # (B, S, E)
    pe = jnp.take(params["pos_emb"], position_ids, axis=0)        # (1, S, E)
    te = jnp.take(params["type_emb"], token_type_ids, axis=0)     # (B, S, E)
    emb = (we + pe + te).reshape(M, cfg.embedding_size)
    # TODO(synk): dropout layers are identity (eval mode).

    seq = albert_encoder(emb, mask2d, params, cfg)                # (M, H)
    sequence_output = seq.reshape(B, S, H)

    # pooler: first token -> linear -> tanh (plain JAX: a dedicated 2-row
    # kernel would be 100% launch overhead)
    pooled_output = jnp.tanh(sequence_output[:, 0, :] @ params["pool_w"]
                             + params["pool_b"])
    return sequence_output, pooled_output


# ----------------------------- main ------------------------------------------
if __name__ == "__main__":
    key = jax.random.PRNGKey(0)
    pkey, dkey = jax.random.split(key)

    params = init_params(CFG, pkey)

    B, S = 2, 8
    input_ids = jax.random.randint(dkey, (B, S), 0, CFG.vocab_size, dtype=jnp.int32)
    attention_mask = jnp.ones((B, S), jnp.int32)
    token_type_ids = jnp.zeros((B, S), jnp.int32)

    fwd = jax.jit(albert_forward)
    seq_out, pooled = fwd(params, input_ids, attention_mask, token_type_ids)
    jax.block_until_ready(seq_out)
    jax.block_until_ready(pooled)

    assert seq_out.shape == (B, S, CFG.hidden_size)
    assert pooled.shape == (B, CFG.hidden_size)
    assert jnp.all(jnp.isfinite(seq_out)) and jnp.all(jnp.isfinite(pooled))
    print("KERNEL_OK")
</pallas_src>

<mosaic_0001>
module attributes {stable_mosaic.version = 11 : i64} {
  func.func @_encoder_kernel(%arg0: i32, %arg1: memref<16x32xf32, #tpu.memory_space<vmem>>, %arg2: memref<16x16xf32, #tpu.memory_space<vmem>>, %arg3: memref<1x32xf32, #tpu.memory_space<vmem>>, %arg4: memref<1x32xf32, #tpu.memory_space<vmem>>, %arg5: memref<32x64xbf16, #tpu.memory_space<vmem>>, %arg6: memref<1x64xf32, #tpu.memory_space<vmem>>, %arg7: memref<4x64x16xbf16, #tpu.memory_space<vmem>>, %arg8: memref<4x64x16xbf16, #tpu.memory_space<vmem>>, %arg9: memref<4x64x16xbf16, #tpu.memory_space<vmem>>, %arg10: memref<4x1x16xf32, #tpu.memory_space<vmem>>, %arg11: memref<4x1x16xf32, #tpu.memory_space<vmem>>, %arg12: memref<4x1x16xf32, #tpu.memory_space<vmem>>, %arg13: memref<4x16x64xbf16, #tpu.memory_space<vmem>>, %arg14: memref<1x64xf32, #tpu.memory_space<vmem>>, %arg15: memref<1x64xf32, #tpu.memory_space<vmem>>, %arg16: memref<1x64xf32, #tpu.memory_space<vmem>>, %arg17: memref<64x128xbf16, #tpu.memory_space<vmem>>, %arg18: memref<1x128xf32, #tpu.memory_space<vmem>>, %arg19: memref<128x64xbf16, #tpu.memory_space<vmem>>, %arg20: memref<1x64xf32, #tpu.memory_space<vmem>>, %arg21: memref<1x64xf32, #tpu.memory_space<vmem>>, %arg22: memref<1x64xf32, #tpu.memory_space<vmem>>, %arg23: memref<16x64xf32, #tpu.memory_space<vmem>>) attributes {dimension_semantics = [#tpu.dimension_semantics<arbitrary>], iteration_bounds = array<i64: 1>, scalar_prefetch = 0 : i64, scratch_operands = 0 : i64, tpu.core_type = #tpu.core_type<tc>, window_params = [{pipeline_mode = #tpu.pipeline_mode<synchronous>, transform_indices = @transform_0, window_bounds = array<i64: 16, 32>}, {pipeline_mode = #tpu.pipeline_mode<synchronous>, transform_indices = @transform_1, window_bounds = array<i64: 16, 16>}, {pipeline_mode = #tpu.pipeline_mode<synchronous>, transform_indices = @transform_2, window_bounds = array<i64: 1, 32>}, {pipeline_mode = #tpu.pipeline_mode<synchronous>, transform_indices = @transform_3, window_bounds = array<i64: 1, 32>}, {pipeline_mode = #tpu.pipeline_mode<synchronous>, transform_indices = @transform_4, window_bounds = array<i64: 32, 64>}, {pipeline_mode = #tpu.pipeline_mode<synchronous>, transform_indices = @transform_5, window_bounds = array<i64: 1, 64>}, {pipeline_mode = #tpu.pipeline_mode<synchronous>, transform_indices = @transform_6, window_bounds = array<i64: 4, 64, 16>}, {pipeline_mode = #tpu.pipeline_mode<synchronous>, transform_indices = @transform_7, window_bounds = array<i64: 4, 64, 16>}, {pipeline_mode = #tpu.pipeline_mode<synchronous>, transform_indices = @transform_8, window_bounds = array<i64: 4, 64, 16>}, {pipeline_mode = #tpu.pipeline_mode<synchronous>, transform_indices = @transform_9, window_bounds = array<i64: 4, 1, 16>}, {pipeline_mode = #tpu.pipeline_mode<synchronous>, transform_indices = @transform_10, window_bounds = array<i64: 4, 1, 16>}, {pipeline_mode = #tpu.pipeline_mode<synchronous>, transform_indices = @transform_11, window_bounds = array<i64: 4, 1, 16>}, {pipeline_mode = #tpu.pipeline_mode<synchronous>, transform_indices = @transform_12, window_bounds = array<i64: 4, 16, 64>}, {pipeline_mode = #tpu.pipeline_mode<synchronous>, transform_indices = @transform_13, window_bounds = array<i64: 1, 64>}, {pipeline_mode = #tpu.pipeline_mode<synchronous>, transform_indices = @transform_14, window_bounds = array<i64: 1, 64>}, {pipeline_mode = #tpu.pipeline_mode<synchronous>, transform_indices = @transform_15, window_bounds = array<i64: 1, 64>}, {pipeline_mode = #tpu.pipeline_mode<synchronous>, transform_indices = @transform_16, window_bounds = array<i64: 64, 128>}, {pipeline_mode = #tpu.pipeline_mode<synchronous>, transform_indices = @transform_17, window_bounds = array<i64: 1, 128>}, {pipeline_mode = #tpu.pipeline_mode<synchronous>, transform_indices = @transform_18, window_bounds = array<i64: 128, 64>}, {pipeline_mode = #tpu.pipeline_mode<synchronous>, transform_indices = @transform_19, window_bounds = array<i64: 1, 64>}, {pipeline_mode = #tpu.pipeline_mode<synchronous>, transform_indices = @transform_20, window_bounds = array<i64: 1, 64>}, {pipeline_mode = #tpu.pipeline_mode<synchronous>, transform_indices = @transform_21, window_bounds = array<i64: 1, 64>}, {pipeline_mode = #tpu.pipeline_mode<synchronous>, transform_indices = @transform_22, window_bounds = array<i64: 16, 64>}]} {
    %c0 = arith.constant 0 : index
    %c0_0 = arith.constant 0 : index
    %0 = vector.load %arg2[%c0, %c0_0] : memref<16x16xf32, #tpu.memory_space<vmem>>, vector<16x16xf32>
    %c0_1 = arith.constant 0 : index
    %c0_2 = arith.constant 0 : index
    %1 = vector.load %arg1[%c0_1, %c0_2] : memref<16x32xf32, #tpu.memory_space<vmem>>, vector<16x32xf32>
    %c0_3 = arith.constant 0 : index
    %c0_4 = arith.constant 0 : index
    %2 = vector.load %arg3[%c0_3, %c0_4] : memref<1x32xf32, #tpu.memory_space<vmem>>, vector<1x32xf32>
    %c0_5 = arith.constant 0 : index
    %c0_6 = arith.constant 0 : index
    %3 = vector.load %arg4[%c0_5, %c0_6] : memref<1x32xf32, #tpu.memory_space<vmem>>, vector<1x32xf32>
    %cst = arith.constant dense<0.000000e+00> : vector<16xf32>
    %4 = vector.multi_reduction <add>, %1, %cst [1] : vector<16x32xf32> to vector<16xf32>
    %5 = vector.shape_cast %4 : vector<16xf32> to vector<16x1xf32>
    %cst_7 = arith.constant 3.200000e+01 : f32
    %6 = vector.broadcast %cst_7 : f32 to vector<16x1xf32>
    %7 = arith.divf %5, %6 : vector<16x1xf32>
    %8 = vector.broadcast %7 : vector<16x1xf32> to vector<16x32xf32>
    %9 = arith.subf %1, %8 : vector<16x32xf32>
    %10 = arith.mulf %9, %9 : vector<16x32xf32>
    %cst_8 = arith.constant dense<0.000000e+00> : vector<16xf32>
    %11 = vector.multi_reduction <add>, %10, %cst_8 [1] : vector<16x32xf32> to vector<16xf32>
    %12 = vector.shape_cast %11 : vector<16xf32> to vector<16x1xf32>
    %cst_9 = arith.constant 3.200000e+01 : f32
    %13 = vector.broadcast %cst_9 : f32 to vector<16x1xf32>
    %14 = arith.divf %12, %13 : vector<16x1xf32>
    %15 = vector.broadcast %7 : vector<16x1xf32> to vector<16x32xf32>
    %16 = arith.subf %1, %15 : vector<16x32xf32>
    %cst_10 = arith.constant 9.99999996E-13 : f32
    %17 = vector.broadcast %cst_10 : f32 to vector<16x1xf32>
    %18 = arith.addf %14, %17 : vector<16x1xf32>
    %19 = math.rsqrt %18 : vector<16x1xf32>
    %20 = vector.broadcast %19 : vector<16x1xf32> to vector<16x32xf32>
    %21 = arith.mulf %16, %20 : vector<16x32xf32>
    %22 = vector.broadcast %2 : vector<1x32xf32> to vector<16x32xf32>
    %23 = arith.mulf %21, %22 : vector<16x32xf32>
    %24 = vector.broadcast %3 : vector<1x32xf32> to vector<16x32xf32>
    %25 = arith.addf %23, %24 : vector<16x32xf32>
    %c0_11 = arith.constant 0 : index
    %c0_12 = arith.constant 0 : index
    %26 = vector.load %arg5[%c0_11, %c0_12] : memref<32x64xbf16, #tpu.memory_space<vmem>>, vector<32x64xbf16>
    %27 = arith.truncf %25 : vector<16x32xf32> to vector<16x32xbf16>
    %cst_13 = arith.constant dense<0.000000e+00> : vector<16x64xf32>
    %28 = tpu.matmul %27, %26, %cst_13 {dimension_numbers = #tpu.dot_dimension_numbers<[1], [0], [0], [1], [0, 0, 1, 1], [], []>} : vector<16x32xbf16>, vector<32x64xbf16>, vector<16x64xf32> -> vector<16x64xf32>
    %c0_14 = arith.constant 0 : index
    %c0_15 = arith.constant 0 : index
    %29 = vector.load %arg6[%c0_14, %c0_15] : memref<1x64xf32, #tpu.memory_space<vmem>>, vector<1x64xf32>
    %30 = vector.broadcast %29 : vector<1x64xf32> to vector<16x64xf32>
    %31 = arith.addf %28, %30 : vector<16x64xf32>
    %c0_i32 = arith.constant 0 : i32
    %c0_16 = arith.constant 0 : index
    %c0_17 = arith.constant 0 : index
    %c0_18 = arith.constant 0 : index
    %32 = vector.load %arg7[%c0_16, %c0_17, %c0_18] : memref<4x64x16xbf16, #tpu.memory_space<vmem>>, vector<1x64x16xbf16>
    %33 = vector.shape_cast %32 : vector<1x64x16xbf16> to vector<64x16xbf16>
    %34 = arith.truncf %31 : vector<16x64xf32> to vector<16x64xbf16>
    %cst_19 = arith.constant dense<0.000000e+00> : vector<16x16xf32>
    %35 = tpu.matmul %34, %33, %cst_19 {dimension_numbers = #tpu.dot_dimension_numbers<[1], [0], [0], [1], [0, 0, 1, 1], [], []>} : vector<16x64xbf16>, vector<64x16xbf16>, vector<16x16xf32> -> vector<16x16xf32>
    %c0_20 = arith.constant 0 : index
    %c0_21 = arith.constant 0 : index
    %c0_22 = arith.constant 0 : index
    %36 = vector.load %arg10[%c0_20, %c0_21, %c0_22] : memref<4x1x16xf32, #tpu.memory_space<vmem>>, vector<1x1x16xf32>
    %37 = vector.shape_cast %36 : vector<1x1x16xf32> to vector<1x16xf32>
    %38 = vector.broadcast %37 : vector<1x16xf32> to vector<16x16xf32>
    %39 = arith.addf %35, %38 : vector<16x16xf32>
    %c0_23 = arith.constant 0 : index
    %c0_24 = arith.constant 0 : index
    %c0_25 = arith.constant 0 : index
    %40 = vector.load %arg8[%c0_23, %c0_24, %c0_25] : memref<4x64x16xbf16, #tpu.memory_space<vmem>>, vector<1x64x16xbf16>
    %41 = vector.shape_cast %40 : vector<1x64x16xbf16> to vector<64x16xbf16>
    %42 = arith.truncf %31 : vector<16x64xf32> to vector<16x64xbf16>
    %cst_26 = arith.constant dense<0.000000e+00> : vector<16x16xf32>
    %43 = tpu.matmul %42, %41, %cst_26 {dimension_numbers = #tpu.dot_dimension_numbers<[1], [0], [0], [1], [0, 0, 1, 1], [], []>} : vector<16x64xbf16>, vector<64x16xbf16>, vector<16x16xf32> -> vector<16x16xf32>
    %c0_27 = arith.constant 0 : index
    %c0_28 = arith.constant 0 : index
    %c0_29 = arith.constant 0 : index
    %44 = vector.load %arg11[%c0_27, %c0_28, %c0_29] : memref<4x1x16xf32, #tpu.memory_space<vmem>>, vector<1x1x16xf32>
    %45 = vector.shape_cast %44 : vector<1x1x16xf32> to vector<1x16xf32>
    %46 = vector.broadcast %45 : vector<1x16xf32> to vector<16x16xf32>
    %47 = arith.addf %43, %46 : vector<16x16xf32>
    %c0_30 = arith.constant 0 : index
    %c0_31 = arith.constant 0 : index
    %c0_32 = arith.constant 0 : index
    %48 = vector.load %arg9[%c0_30, %c0_31, %c0_32] : memref<4x64x16xbf16, #tpu.memory_space<vmem>>, vector<1x64x16xbf16>
    %49 = vector.shape_cast %48 : vector<1x64x16xbf16> to vector<64x16xbf16>
    %50 = arith.truncf %31 : vector<16x64xf32> to vector<16x64xbf16>
    %cst_33 = arith.constant dense<0.000000e+00> : vector<16x16xf32>
    %51 = tpu.matmul %50, %49, %cst_33 {dimension_numbers = #tpu.dot_dimension_numbers<[1], [0], [0], [1], [0, 0, 1, 1], [], []>} : vector<16x64xbf16>, vector<64x16xbf16>, vector<16x16xf32> -> vector<16x16xf32>
    %c0_34 = arith.constant 0 : index
    %c0_35 = arith.constant 0 : index
    %c0_36 = arith.constant 0 : index
    %52 = vector.load %arg12[%c0_34, %c0_35, %c0_36] : memref<4x1x16xf32, #tpu.memory_space<vmem>>, vector<1x1x16xf32>
    %53 = vector.shape_cast %52 : vector<1x1x16xf32> to vector<1x16xf32>
    %54 = vector.broadcast %53 : vector<1x16xf32> to vector<16x16xf32>
    %55 = arith.addf %51, %54 : vector<16x16xf32>
    %56 = arith.truncf %39 : vector<16x16xf32> to vector<16x16xbf16>
    %57 = arith.truncf %47 : vector<16x16xf32> to vector<16x16xbf16>
    %cst_37 = arith.constant dense<0.000000e+00> : vector<16x16xf32>
    %58 = tpu.matmul %56, %57, %cst_37 {dimension_numbers = #tpu.dot_dimension_numbers<[1], [1], [0], [0], [0, 0, 1, 0], [], []>} : vector<16x16xbf16>, vector<16x16xbf16>, vector<16x16xf32> -> vector<16x16xf32>
    %cst_38 = arith.constant 2.500000e-01 : f32
    %59 = vector.broadcast %cst_38 : f32 to vector<16x16xf32>
    %60 = arith.mulf %58, %59 : vector<16x16xf32>
    %61 = arith.addf %60, %0 : vector<16x16xf32>
    %cst_39 = arith.constant dense<0xFF800000> : vector<16xf32>
    %62 = vector.multi_reduction <maximumf>, %61, %cst_39 [1] : vector<16x16xf32> to vector<16xf32>
    %63 = vector.shape_cast %62 : vector<16xf32> to vector<16x1xf32>
    %64 = vector.broadcast %63 : vector<16x1xf32> to vector<16x16xf32>
    %65 = arith.subf %61, %64 : vector<16x16xf32>
    %66 = math.exp %65 : vector<16x16xf32>
    %cst_40 = arith.constant dense<0.000000e+00> : vector<16xf32>
    %67 = vector.multi_reduction <add>, %66, %cst_40 [1] : vector<16x16xf32> to vector<16xf32>
    %68 = vector.shape_cast %67 : vector<16xf32> to vector<16x1xf32>
    %69 = tpu.reciprocal %68 {approx = true} : vector<16x1xf32> -> vector<16x1xf32>
    %70 = vector.broadcast %69 : vector<16x1xf32> to vector<16x16xf32>
    %71 = arith.mulf %66, %70 : vector<16x16xf32>
    %72 = arith.truncf %71 : vector<16x16xf32> to vector<16x16xbf16>
    %73 = arith.truncf %55 : vector<16x16xf32> to vector<16x16xbf16>
    %cst_41 = arith.constant dense<0.000000e+00> : vector<16x16xf32>
    %74 = tpu.matmul %72, %73, %cst_41 {dimension_numbers = #tpu.dot_dimension_numbers<[1], [0], [0], [1], [0, 0, 1, 1], [], []>} : vector<16x16xbf16>, vector<16x16xbf16>, vector<16x16xf32> -> vector<16x16xf32>
    %c0_42 = arith.constant 0 : index
    %c0_43 = arith.constant 0 : index
    %c0_44 = arith.constant 0 : index
    %75 = vector.load %arg13[%c0_42, %c0_43, %c0_44] : memref<4x16x64xbf16, #tpu.memory_space<vmem>>, vector<1x16x64xbf16>
    %76 = vector.shape_cast %75 : vector<1x16x64xbf16> to vector<16x64xbf16>
    %77 = arith.truncf %74 : vector<16x16xf32> to vector<16x16xbf16>
    %cst_45 = arith.constant dense<0.000000e+00> : vector<16x64xf32>
    %78 = tpu.matmul %77, %76, %cst_45 {dimension_numbers = #tpu.dot_dimension_numbers<[1], [0], [0], [1], [0, 0, 1, 1], [], []>} : vector<16x16xbf16>, vector<16x64xbf16>, vector<16x64xf32> -> vector<16x64xf32>
    %c1 = arith.constant 1 : index
    %c0_46 = arith.constant 0 : index
    %c0_47 = arith.constant 0 : index
    %79 = vector.load %arg7[%c1, %c0_46, %c0_47] : memref<4x64x16xbf16, #tpu.memory_space<vmem>>, vector<1x64x16xbf16>
    %80 = vector.shape_cast %79 : vector<1x64x16xbf16> to vector<64x16xbf16>
    %81 = arith.truncf %31 : vector<16x64xf32> to vector<16x64xbf16>
    %cst_48 = arith.constant dense<0.000000e+00> : vector<16x16xf32>
    %82 = tpu.matmul %81, %80, %cst_48 {dimension_numbers = #tpu.dot_dimension_numbers<[1], [0], [0], [1], [0, 0, 1, 1], [], []>} : vector<16x64xbf16>, vector<64x16xbf16>, vector<16x16xf32> -> vector<16x16xf32>
    %c1_49 = arith.constant 1 : index
    %c0_50 = arith.constant 0 : index
    %c0_51 = arith.constant 0 : index
    %83 = vector.load %arg10[%c1_49, %c0_50, %c0_51] : memref<4x1x16xf32, #tpu.memory_space<vmem>>, vector<1x1x16xf32>
    %84 = vector.shape_cast %83 : vector<1x1x16xf32> to vector<1x16xf32>
    %85 = vector.broadcast %84 : vector<1x16xf32> to vector<16x16xf32>
    %86 = arith.addf %82, %85 : vector<16x16xf32>
    %c1_52 = arith.constant 1 : index
    %c0_53 = arith.constant 0 : index
    %c0_54 = arith.constant 0 : index
    %87 = vector.load %arg8[%c1_52, %c0_53, %c0_54] : memref<4x64x16xbf16, #tpu.memory_space<vmem>>, vector<1x64x16xbf16>
    %88 = vector.shape_cast %87 : vector<1x64x16xbf16> to vector<64x16xbf16>
    %89 = arith.truncf %31 : vector<16x64xf32> to vector<16x64xbf16>
    %cst_55 = arith.constant dense<0.000000e+00> : vector<16x16xf32>
    %90 = tpu.matmul %89, %88, %cst_55 {dimension_numbers = #tpu.dot_dimension_numbers<[1], [0], [0], [1], [0, 0, 1, 1], [], []>} : vector<16x64xbf16>, vector<64x16xbf16>, vector<16x16xf32> -> vector<16x16xf32>
    %c1_56 = arith.constant 1 : index
    %c0_57 = arith.constant 0 : index
    %c0_58 = arith.constant 0 : index
    %91 = vector.load %arg11[%c1_56, %c0_57, %c0_58] : memref<4x1x16xf32, #tpu.memory_space<vmem>>, vector<1x1x16xf32>
    %92 = vector.shape_cast %91 : vector<1x1x16xf32> to vector<1x16xf32>
    %93 = vector.broadcast %92 : vector<1x16xf32> to vector<16x16xf32>
    %94 = arith.addf %90, %93 : vector<16x16xf32>
    %c1_59 = arith.constant 1 : index
    %c0_60 = arith.constant 0 : index
    %c0_61 = arith.constant 0 : index
    %95 = vector.load %arg9[%c1_59, %c0_60, %c0_61] : memref<4x64x16xbf16, #tpu.memory_space<vmem>>, vector<1x64x16xbf16>
    %96 = vector.shape_cast %95 : vector<1x64x16xbf16> to vector<64x16xbf16>
    %97 = arith.truncf %31 : vector<16x64xf32> to vector<16x64xbf16>
    %cst_62 = arith.constant dense<0.000000e+00> : vector<16x16xf32>
    %98 = tpu.matmul %97, %96, %cst_62 {dimension_numbers = #tpu.dot_dimension_numbers<[1], [0], [0], [1], [0, 0, 1, 1], [], []>} : vector<16x64xbf16>, vector<64x16xbf16>, vector<16x16xf32> -> vector<16x16xf32>
    %c1_63 = arith.constant 1 : index
    %c0_64 = arith.constant 0 : index
    %c0_65 = arith.constant 0 : index
    %99 = vector.load %arg12[%c1_63, %c0_64, %c0_65] : memref<4x1x16xf32, #tpu.memory_space<vmem>>, vector<1x1x16xf32>
    %100 = vector.shape_cast %99 : vector<1x1x16xf32> to vector<1x16xf32>
    %101 = vector.broadcast %100 : vector<1x16xf32> to vector<16x16xf32>
    %102 = arith.addf %98, %101 : vector<16x16xf32>
    %103 = arith.truncf %86 : vector<16x16xf32> to vector<16x16xbf16>
    %104 = arith.truncf %94 : vector<16x16xf32> to vector<16x16xbf16>
    %cst_66 = arith.constant dense<0.000000e+00> : vector<16x16xf32>
    %105 = tpu.matmul %103, %104, %cst_66 {dimension_numbers = #tpu.dot_dimension_numbers<[1], [1], [0], [0], [0, 0, 1, 0], [], []>} : vector<16x16xbf16>, vector<16x16xbf16>, vector<16x16xf32> -> vector<16x16xf32>
    %cst_67 = arith.constant 2.500000e-01 : f32
    %106 = vector.broadcast %cst_67 : f32 to vector<16x16xf32>
    %107 = arith.mulf %105, %106 : vector<16x16xf32>
    %108 = arith.addf %107, %0 : vector<16x16xf32>
    %cst_68 = arith.constant dense<0xFF800000> : vector<16xf32>
    %109 = vector.multi_reduction <maximumf>, %108, %cst_68 [1] : vector<16x16xf32> to vector<16xf32>
    %110 = vector.shape_cast %109 : vector<16xf32> to vector<16x1xf32>
    %111 = vector.broadcast %110 : vector<16x1xf32> to vector<16x16xf32>
    %112 = arith.subf %108, %111 : vector<16x16xf32>
    %113 = math.exp %112 : vector<16x16xf32>
    %cst_69 = arith.constant dense<0.000000e+00> : vector<16xf32>
    %114 = vector.multi_reduction <add>, %113, %cst_69 [1] : vector<16x16xf32> to vector<16xf32>
    %115 = vector.shape_cast %114 : vector<16xf32> to vector<16x1xf32>
    %116 = tpu.reciprocal %115 {approx = true} : vector<16x1xf32> -> vector<16x1xf32>
    %117 = vector.broadcast %116 : vector<16x1xf32> to vector<16x16xf32>
    %118 = arith.mulf %113, %117 : vector<16x16xf32>
    %119 = arith.truncf %118 : vector<16x16xf32> to vector<16x16xbf16>
    %120 = arith.truncf %102 : vector<16x16xf32> to vector<16x16xbf16>
    %cst_70 = arith.constant dense<0.000000e+00> : vector<16x16xf32>
    %121 = tpu.matmul %119, %120, %cst_70 {dimension_numbers = #tpu.dot_dimension_numbers<[1], [0], [0], [1], [0, 0, 1, 1], [], []>} : vector<16x16xbf16>, vector<16x16xbf16>, vector<16x16xf32> -> vector<16x16xf32>
    %c1_71 = arith.constant 1 : index
    %c0_72 = arith.constant 0 : index
    %c0_73 = arith.constant 0 : index
    %122 = vector.load %arg13[%c1_71, %c0_72, %c0_73] : memref<4x16x64xbf16, #tpu.memory_space<vmem>>, vector<1x16x64xbf16>
    %123 = vector.shape_cast %122 : vector<1x16x64xbf16> to vector<16x64xbf16>
    %124 = arith.truncf %121 : vector<16x16xf32> to vector<16x16xbf16>
    %cst_74 = arith.constant dense<0.000000e+00> : vector<16x64xf32>
    %125 = tpu.matmul %124, %123, %cst_74 {dimension_numbers = #tpu.dot_dimension_numbers<[1], [0], [0], [1], [0, 0, 1, 1], [], []>} : vector<16x16xbf16>, vector<16x64xbf16>, vector<16x64xf32> -> vector<16x64xf32>
    %126 = arith.addf %78, %125 : vector<16x64xf32>
    %c2 = arith.constant 2 : index
    %c0_75 = arith.constant 0 : index
    %c0_76 = arith.constant 0 : index
    %127 = vector.load %arg7[%c2, %c0_75, %c0_76] : memref<4x64x16xbf16, #tpu.memory_space<vmem>>, vector<1x64x16xbf16>
    %128 = vector.shape_cast %127 : vector<1x64x16xbf16> to vector<64x16xbf16>
    %129 = arith.truncf %31 : vector<16x64xf32> to vector<16x64xbf16>
    %cst_77 = arith.constant dense<0.000000e+00> : vector<16x16xf32>
    %130 = tpu.matmul %129, %128, %cst_77 {dimension_numbers = #tpu.dot_dimension_numbers<[1], [0], [0], [1], [0, 0, 1, 1], [], []>} : vector<16x64xbf16>, vector<64x16xbf16>, vector<16x16xf32> -> vector<16x16xf32>
    %c2_78 = arith.constant 2 : index
    %c0_79 = arith.constant 0 : index
    %c0_80 = arith.constant 0 : index
    %131 = vector.load %arg10[%c2_78, %c0_79, %c0_80] : memref<4x1x16xf32, #tpu.memory_space<vmem>>, vector<1x1x16xf32>
    %132 = vector.shape_cast %131 : vector<1x1x16xf32> to vector<1x16xf32>
    %133 = vector.broadcast %132 : vector<1x16xf32> to vector<16x16xf32>
    %134 = arith.addf %130, %133 : vector<16x16xf32>
    %c2_81 = arith.constant 2 : index
    %c0_82 = arith.constant 0 : index
    %c0_83 = arith.constant 0 : index
    %135 = vector.load %arg8[%c2_81, %c0_82, %c0_83] : memref<4x64x16xbf16, #tpu.memory_space<vmem>>, vector<1x64x16xbf16>
    %136 = vector.shape_cast %135 : vector<1x64x16xbf16> to vector<64x16xbf16>
    %137 = arith.truncf %31 : vector<16x64xf32> to vector<16x64xbf16>
    %cst_84 = arith.constant dense<0.000000e+00> : vector<16x16xf32>
    %138 = tpu.matmul %137, %136, %cst_84 {dimension_numbers = #tpu.dot_dimension_numbers<[1], [0], [0], [1], [0, 0, 1, 1], [], []>} : vector<16x64xbf16>, vector<64x16xbf16>, vector<16x16xf32> -> vector<16x16xf32>
    %c2_85 = arith.constant 2 : index
    %c0_86 = arith.constant 0 : index
    %c0_87 = arith.constant 0 : index
    %139 = vector.load %arg11[%c2_85, %c0_86, %c0_87] : memref<4x1x16xf32, #tpu.memory_space<vmem>>, vector<1x1x16xf32>
    %140 = vector.shape_cast %139 : vector<1x1x16xf32> to vector<1x16xf32>
    %141 = vector.broadcast %140 : vector<1x16xf32> to vector<16x16xf32>
    %142 = arith.addf %138, %141 : vector<16x16xf32>
    %c2_88 = arith.constant 2 : index
    %c0_89 = arith.constant 0 : index
    %c0_90 = arith.constant 0 : index
    %143 = vector.load %arg9[%c2_88, %c0_89, %c0_90] : memref<4x64x16xbf16, #tpu.memory_space<vmem>>, vector<1x64x16xbf16>
    %144 = vector.shape_cast %143 : vector<1x64x16xbf16> to vector<64x16xbf16>
    %145 = arith.truncf %31 : vector<16x64xf32> to vector<16x64xbf16>
    %cst_91 = arith.constant dense<0.000000e+00> : vector<16x16xf32>
    %146 = tpu.matmul %145, %144, %cst_91 {dimension_numbers = #tpu.dot_dimension_numbers<[1], [0], [0], [1], [0, 0, 1, 1], [], []>} : vector<16x64xbf16>, vector<64x16xbf16>, vector<16x16xf32> -> vector<16x16xf32>
    %c2_92 = arith.constant 2 : index
    %c0_93 = arith.constant 0 : index
    %c0_94 = arith.constant 0 : index
    %147 = vector.load %arg12[%c2_92, %c0_93, %c0_94] : memref<4x1x16xf32, #tpu.memory_space<vmem>>, vector<1x1x16xf32>
    %148 = vector.shape_cast %147 : vector<1x1x16xf32> to vector<1x16xf32>
    %149 = vector.broadcast %148 : vector<1x16xf32> to vector<16x16xf32>
    %150 = arith.addf %146, %149 : vector<16x16xf32>
    %151 = arith.truncf %134 : vector<16x16xf32> to vector<16x16xbf16>
    %152 = arith.truncf %142 : vector<16x16xf32> to vector<16x16xbf16>
    %cst_95 = arith.constant dense<0.000000e+00> : vector<16x16xf32>
    %153 = tpu.matmul %151, %152, %cst_95 {dimension_numbers = #tpu.dot_dimension_numbers<[1], [1], [0], [0], [0, 0, 1, 0], [], []>} : vector<16x16xbf16>, vector<16x16xbf16>, vector<16x16xf32> -> vector<16x16xf32>
    %cst_96 = arith.constant 2.500000e-01 : f32
    %154 = vector.broadcast %cst_96 : f32 to vector<16x16xf32>
    %155 = arith.mulf %153, %154 : vector<16x16xf32>
    %156 = arith.addf %155, %0 : vector<16x16xf32>
    %cst_97 = arith.constant dense<0xFF800000> : vector<16xf32>
    %157 = vector.multi_reduction <maximumf>, %156, %cst_97 [1] : vector<16x16xf32> to vector<16xf32>
    %158 = vector.shape_cast %157 : vector<16xf32> to vector<16x1xf32>
    %159 = vector.broadcast %158 : vector<16x1xf32> to vector<16x16xf32>
    %160 = arith.subf %156, %159 : vector<16x16xf32>
    %161 = math.exp %160 : vector<16x16xf32>
    %cst_98 = arith.constant dense<0.000000e+00> : vector<16xf32>
    %162 = vector.multi_reduction <add>, %161, %cst_98 [1] : vector<16x16xf32> to vector<16xf32>
    %163 = vector.shape_cast %162 : vector<16xf32> to vector<16x1xf32>
    %164 = tpu.reciprocal %163 {approx = true} : vector<16x1xf32> -> vector<16x1xf32>
    %165 = vector.broadcast %164 : vector<16x1xf32> to vector<16x16xf32>
    %166 = arith.mulf %161, %165 : vector<16x16xf32>
    %167 = arith.truncf %166 : vector<16x16xf32> to vector<16x16xbf16>
    %168 = arith.truncf %150 : vector<16x16xf32> to vector<16x16xbf16>
    %cst_99 = arith.constant dense<0.000000e+00> : vector<16x16xf32>
    %169 = tpu.matmul %167, %168, %cst_99 {dimension_numbers = #tpu.dot_dimension_numbers<[1], [0], [0], [1], [0, 0, 1, 1], [], []>} : vector<16x16xbf16>, vector<16x16xbf16>, vector<16x16xf32> -> vector<16x16xf32>
    %c2_100 = arith.constant 2 : index
    %c0_101 = arith.constant 0 : index
    %c0_102 = arith.constant 0 : index
    %170 = vector.load %arg13[%c2_100, %c0_101, %c0_102] : memref<4x16x64xbf16, #tpu.memory_space<vmem>>, vector<1x16x64xbf16>
    %171 = vector.shape_cast %170 : vector<1x16x64xbf16> to vector<16x64xbf16>
    %172 = arith.truncf %169 : vector<16x16xf32> to vector<16x16xbf16>
    %cst_103 = arith.constant dense<0.000000e+00> : vector<16x64xf32>
    %173 = tpu.matmul %172, %171, %cst_103 {dimension_numbers = #tpu.dot_dimension_numbers<[1], [0], [0], [1], [0, 0, 1, 1], [], []>} : vector<16x16xbf16>, vector<16x64xbf16>, vector<16x64xf32> -> vector<16x64xf32>
    %174 = arith.addf %126, %173 : vector<16x64xf32>
    %c3 = arith.constant 3 : index
    %c0_104 = arith.constant 0 : index
    %c0_105 = arith.constant 0 : index
    %175 = vector.load %arg7[%c3, %c0_104, %c0_105] : memref<4x64x16xbf16, #tpu.memory_space<vmem>>, vector<1x64x16xbf16>
    %176 = vector.shape_cast %175 : vector<1x64x16xbf16> to vector<64x16xbf16>
    %177 = arith.truncf %31 : vector<16x64xf32> to vector<16x64xbf16>
    %cst_106 = arith.constant dense<0.000000e+00> : vector<16x16xf32>
    %178 = tpu.matmul %177, %176, %cst_106 {dimension_numbers = #tpu.dot_dimension_numbers<[1], [0], [0], [1], [0, 0, 1, 1], [], []>} : vector<16x64xbf16>, vector<64x16xbf16>, vector<16x16xf32> -> vector<16x16xf32>
    %c3_107 = arith.constant 3 : index
    %c0_108 = arith.constant 0 : index
    %c0_109 = arith.constant 0 : index
    %179 = vector.load %arg10[%c3_107, %c0_108, %c0_109] : memref<4x1x16xf32, #tpu.memory_space<vmem>>, vector<1x1x16xf32>
    %180 = vector.shape_cast %179 : vector<1x1x16xf32> to vector<1x16xf32>
    %181 = vector.broadcast %180 : vector<1x16xf32> to vector<16x16xf32>
    %182 = arith.addf %178, %181 : vector<16x16xf32>
    %c3_110 = arith.constant 3 : index
    %c0_111 = arith.constant 0 : index
    %c0_112 = arith.constant 0 : index
    %183 = vector.load %arg8[%c3_110, %c0_111, %c0_112] : memref<4x64x16xbf16, #tpu.memory_space<vmem>>, vector<1x64x16xbf16>
    %184 = vector.shape_cast %183 : vector<1x64x16xbf16> to vector<64x16xbf16>
    %185 = arith.truncf %31 : vector<16x64xf32> to vector<16x64xbf16>
    %cst_113 = arith.constant dense<0.000000e+00> : vector<16x16xf32>
    %186 = tpu.matmul %185, %184, %cst_113 {dimension_numbers = #tpu.dot_dimension_numbers<[1], [0], [0], [1], [0, 0, 1, 1], [], []>} : vector<16x64xbf16>, vector<64x16xbf16>, vector<16x16xf32> -> vector<16x16xf32>
    %c3_114 = arith.constant 3 : index
    %c0_115 = arith.constant 0 : index
    %c0_116 = arith.constant 0 : index
    %187 = vector.load %arg11[%c3_114, %c0_115, %c0_116] : memref<4x1x16xf32, #tpu.memory_space<vmem>>, vector<1x1x16xf32>
    %188 = vector.shape_cast %187 : vector<1x1x16xf32> to vector<1x16xf32>
    %189 = vector.broadcast %188 : vector<1x16xf32> to vector<16x16xf32>
    %190 = arith.addf %186, %189 : vector<16x16xf32>
    %c3_117 = arith.constant 3 : index
    %c0_118 = arith.constant 0 : index
    %c0_119 = arith.constant 0 : index
    %191 = vector.load %arg9[%c3_117, %c0_118, %c0_119] : memref<4x64x16xbf16, #tpu.memory_space<vmem>>, vector<1x64x16xbf16>
    %192 = vector.shape_cast %191 : vector<1x64x16xbf16> to vector<64x16xbf16>
    %193 = arith.truncf %31 : vector<16x64xf32> to vector<16x64xbf16>
    %cst_120 = arith.constant dense<0.000000e+00> : vector<16x16xf32>
    %194 = tpu.matmul %193, %192, %cst_120 {dimension_numbers = #tpu.dot_dimension_numbers<[1], [0], [0], [1], [0, 0, 1, 1], [], []>} : vector<16x64xbf16>, vector<64x16xbf16>, vector<16x16xf32> -> vector<16x16xf32>
    %c3_121 = arith.constant 3 : index
    %c0_122 = arith.constant 0 : index
    %c0_123 = arith.constant 0 : index
    %195 = vector.load %arg12[%c3_121, %c0_122, %c0_123] : memref<4x1x16xf32, #tpu.memory_space<vmem>>, vector<1x1x16xf32>
    %196 = vector.shape_cast %195 : vector<1x1x16xf32> to vector<1x16xf32>
    %197 = vector.broadcast %196 : vector<1x16xf32> to vector<16x16xf32>
    %198 = arith.addf %194, %197 : vector<16x16xf32>
    %199 = arith.truncf %182 : vector<16x16xf32> to vector<16x16xbf16>
    %200 = arith.truncf %190 : vector<16x16xf32> to vector<16x16xbf16>
    %cst_124 = arith.constant dense<0.000000e+00> : vector<16x16xf32>
    %201 = tpu.matmul %199, %200, %cst_124 {dimension_numbers = #tpu.dot_dimension_numbers<[1], [1], [0], [0], [0, 0, 1, 0], [], []>} : vector<16x16xbf16>, vector<16x16xbf16>, vector<16x16xf32> -> vector<16x16xf32>
    %cst_125 = arith.constant 2.500000e-01 : f32
    %202 = vector.broadcast %cst_125 : f32 to vector<16x16xf32>
    %203 = arith.mulf %201, %202 : vector<16x16xf32>
    %204 = arith.addf %203, %0 : vector<16x16xf32>
    %cst_126 = arith.constant dense<0xFF800000> : vector<16xf32>
    %205 = vector.multi_reduction <maximumf>, %204, %cst_126 [1] : vector<16x16xf32> to vector<16xf32>
    %206 = vector.shape_cast %205 : vector<16xf32> to vector<16x1xf32>
    %207 = vector.broadcast %206 : vector<16x1xf32> to vector<16x16xf32>
    %208 = arith.subf %204, %207 : vector<16x16xf32>
    %209 = math.exp %208 : vector<16x16xf32>
    %cst_127 = arith.constant dense<0.000000e+00> : vector<16xf32>
    %210 = vector.multi_reduction <add>, %209, %cst_127 [1] : vector<16x16xf32> to vector<16xf32>
    %211 = vector.shape_cast %210 : vector<16xf32> to vector<16x1xf32>
    %212 = tpu.reciprocal %211 {approx = true} : vector<16x1xf32> -> vector<16x1xf32>
    %213 = vector.broadcast %212 : vector<16x1xf32> to vector<16x16xf32>
    %214 = arith.mulf %209, %213 : vector<16x16xf32>
    %215 = arith.truncf %214 : vector<16x16xf32> to vector<16x16xbf16>
    %216 = arith.truncf %198 : vector<16x16xf32> to vector<16x16xbf16>
    %cst_128 = arith.constant dense<0.000000e+00> : vector<16x16xf32>
    %217 = tpu.matmul %215, %216, %cst_128 {dimension_numbers = #tpu.dot_dimension_numbers<[1], [0], [0], [1], [0, 0, 1, 1], [], []>} : vector<16x16xbf16>, vector<16x16xbf16>, vector<16x16xf32> -> vector<16x16xf32>
    %c3_129 = arith.constant 3 : index
    %c0_130 = arith.constant 0 : index
    %c0_131 = arith.constant 0 : index
    %218 = vector.load %arg13[%c3_129, %c0_130, %c0_131] : memref<4x16x64xbf16, #tpu.memory_space<vmem>>, vector<1x16x64xbf16>
    %219 = vector.shape_cast %218 : vector<1x16x64xbf16> to vector<16x64xbf16>
    %220 = arith.truncf %217 : vector<16x16xf32> to vector<16x16xbf16>
    %cst_132 = arith.constant dense<0.000000e+00> : vector<16x64xf32>
    %221 = tpu.matmul %220, %219, %cst_132 {dimension_numbers = #tpu.dot_dimension_numbers<[1], [0], [0], [1], [0, 0, 1, 1], [], []>} : vector<16x16xbf16>, vector<16x64xbf16>, vector<16x64xf32> -> vector<16x64xf32>
    %222 = arith.addf %174, %221 : vector<16x64xf32>
    %c0_133 = arith.constant 0 : index
    %c0_134 = arith.constant 0 : index
    %223 = vector.load %arg14[%c0_133, %c0_134] : memref<1x64xf32, #tpu.memory_space<vmem>>, vector<1x64xf32>
    %224 = vector.broadcast %223 : vector<1x64xf32> to vector<16x64xf32>
    %225 = arith.addf %222, %224 : vector<16x64xf32>
    %226 = arith.addf %225, %31 : vector<16x64xf32>
    %c0_135 = arith.constant 0 : index
    %c0_136 = arith.constant 0 : index
    %227 = vector.load %arg15[%c0_135, %c0_136] : memref<1x64xf32, #tpu.memory_space<vmem>>, vector<1x64xf32>
    %c0_137 = arith.constant 0 : index
    %c0_138 = arith.constant 0 : index
    %228 = vector.load %arg16[%c0_137, %c0_138] : memref<1x64xf32, #tpu.memory_space<vmem>>, vector<1x64xf32>
    %cst_139 = arith.constant dense<0.000000e+00> : vector<16xf32>
    %229 = vector.multi_reduction <add>, %226, %cst_139 [1] : vector<16x64xf32> to vector<16xf32>
    %230 = vector.shape_cast %229 : vector<16xf32> to vector<16x1xf32>
    %cst_140 = arith.constant 6.400000e+01 : f32
    %231 = vector.broadcast %cst_140 : f32 to vector<16x1xf32>
    %232 = arith.divf %230, %231 : vector<16x1xf32>
    %233 = vector.broadcast %232 : vector<16x1xf32> to vector<16x64xf32>
    %234 = arith.subf %226, %233 : vector<16x64xf32>
    %235 = arith.mulf %234, %234 : vector<16x64xf32>
    %cst_141 = arith.constant dense<0.000000e+00> : vector<16xf32>
    %236 = vector.multi_reduction <add>, %235, %cst_141 [1] : vector<16x64xf32> to vector<16xf32>
    %237 = vector.shape_cast %236 : vector<16xf32> to vector<16x1xf32>
    %cst_142 = arith.constant 6.400000e+01 : f32
    %238 = vector.broadcast %cst_142 : f32 to vector<16x1xf32>
    %239 = arith.divf %237, %238 : vector<16x1xf32>
    %240 = vector.broadcast %232 : vector<16x1xf32> to vector<16x64xf32>
    %241 = arith.subf %226, %240 : vector<16x64xf32>
    %cst_143 = arith.constant 9.99999996E-13 : f32
    %242 = vector.broadcast %cst_143 : f32 to vector<16x1xf32>
    %243 = arith.addf %239, %242 : vector<16x1xf32>
    %244 = math.rsqrt %243 : vector<16x1xf32>
    %245 = vector.broadcast %244 : vector<16x1xf32> to vector<16x64xf32>
    %246 = arith.mulf %241, %245 : vector<16x64xf32>
    %247 = vector.broadcast %227 : vector<1x64xf32> to vector<16x64xf32>
    %248 = arith.mulf %246, %247 : vector<16x64xf32>
    %249 = vector.broadcast %228 : vector<1x64xf32> to vector<16x64xf32>
    %250 = arith.addf %248, %249 : vector<16x64xf32>
    %c0_144 = arith.constant 0 : index
    %c0_145 = arith.constant 0 : index
    %251 = vector.load %arg17[%c0_144, %c0_145] : memref<64x128xbf16, #tpu.memory_space<vmem>>, vector<64x128xbf16>
    %252 = arith.truncf %250 : vector<16x64xf32> to vector<16x64xbf16>
    %cst_146 = arith.constant dense<0.000000e+00> : vector<16x128xf32>
    %253 = tpu.matmul %252, %251, %cst_146 {dimension_numbers = #tpu.dot_dimension_numbers<[1], [0], [0], [1], [0, 0, 1, 1], [], []>} : vector<16x64xbf16>, vector<64x128xbf16>, vector<16x128xf32> -> vector<16x128xf32>
    %c0_147 = arith.constant 0 : index
    %c0_148 = arith.constant 0 : index
    %254 = vector.load %arg18[%c0_147, %c0_148] : memref<1x128xf32, #tpu.memory_space<vmem>>, vector<1x128xf32>
    %255 = vector.broadcast %254 : vector<1x128xf32> to vector<16x128xf32>
    %256 = arith.addf %253, %255 : vector<16x128xf32>
    %cst_149 = arith.constant 5.000000e-01 : f32
    %257 = vector.broadcast %cst_149 : f32 to vector<16x128xf32>
    %258 = arith.mulf %257, %256 : vector<16x128xf32>
    %cst_150 = arith.constant 4.471500e-02 : f32
    %259 = vector.broadcast %cst_150 : f32 to vector<16x128xf32>
    %260 = arith.mulf %259, %256 : vector<16x128xf32>
    %261 = arith.mulf %260, %256 : vector<16x128xf32>
    %262 = arith.mulf %261, %256 : vector<16x128xf32>
    %263 = arith.addf %256, %262 : vector<16x128xf32>
    %cst_151 = arith.constant 0.797884583 : f32
    %264 = vector.broadcast %cst_151 : f32 to vector<16x128xf32>
    %265 = arith.mulf %264, %263 : vector<16x128xf32>
    %266 = math.tanh %265 : vector<16x128xf32>
    %cst_152 = arith.constant 1.000000e+00 : f32
    %267 = vector.broadcast %cst_152 : f32 to vector<16x128xf32>
    %268 = arith.addf %267, %266 : vector<16x128xf32>
    %269 = arith.mulf %258, %268 : vector<16x128xf32>
    %c0_153 = arith.constant 0 : index
    %c0_154 = arith.constant 0 : index
    %270 = vector.load %arg19[%c0_153, %c0_154] : memref<128x64xbf16, #tpu.memory_space<vmem>>, vector<128x64xbf16>
    %271 = arith.truncf %269 : vector<16x128xf32> to vector<16x128xbf16>
    %cst_155 = arith.constant dense<0.000000e+00> : vector<16x64xf32>
    %272 = tpu.matmul %271, %270, %cst_155 {dimension_numbers = #tpu.dot_dimension_numbers<[1], [0], [0], [1], [0, 0, 1, 1], [], []>} : vector<16x128xbf16>, vector<128x64xbf16>, vector<16x64xf32> -> vector<16x64xf32>
    %c0_156 = arith.constant 0 : index
    %c0_157 = arith.constant 0 : index
    %273 = vector.load %arg20[%c0_156, %c0_157] : memref<1x64xf32, #tpu.memory_space<vmem>>, vector<1x64xf32>
    %274 = vector.broadcast %273 : vector<1x64xf32> to vector<16x64xf32>
    %275 = arith.addf %272, %274 : vector<16x64xf32>
    %276 = arith.addf %275, %250 : vector<16x64xf32>
    %c0_158 = arith.constant 0 : index
    %c0_159 = arith.constant 0 : index
    %277 = vector.load %arg21[%c0_158, %c0_159] : memref<1x64xf32, #tpu.memory_space<vmem>>, vector<1x64xf32>
    %c0_160 = arith.constant 0 : index
    %c0_161 = arith.constant 0 : index
    %278 = vector.load %arg22[%c0_160, %c0_161] : memref<1x64xf32, #tpu.memory_space<vmem>>, vector<1x64xf32>
    %cst_162 = arith.constant dense<0.000000e+00> : vector<16xf32>
    %279 = vector.multi_reduction <add>, %276, %cst_162 [1] : vector<16x64xf32> to vector<16xf32>
    %280 = vector.shape_cast %279 : vector<16xf32> to vector<16x1xf32>
    %cst_163 = arith.constant 6.400000e+01 : f32
    %281 = vector.broadcast %cst_163 : f32 to vector<16x1xf32>
    %282 = arith.divf %280, %281 : vector<16x1xf32>
    %283 = vector.broadcast %282 : vector<16x1xf32> to vector<16x64xf32>
    %284 = arith.subf %276, %283 : vector<16x64xf32>
    %285 = arith.mulf %284, %284 : vector<16x64xf32>
    %cst_164 = arith.constant dense<0.000000e+00> : vector<16xf32>
    %286 = vector.multi_reduction <add>, %285, %cst_164 [1] : vector<16x64xf32> to vector<16xf32>
    %287 = vector.shape_cast %286 : vector<16xf32> to vector<16x1xf32>
    %cst_165 = arith.constant 6.400000e+01 : f32
    %288 = vector.broadcast %cst_165 : f32 to vector<16x1xf32>
    %289 = arith.divf %287, %288 : vector<16x1xf32>
    %290 = vector.broadcast %282 : vector<16x1xf32> to vector<16x64xf32>
    %291 = arith.subf %276, %290 : vector<16x64xf32>
    %cst_166 = arith.constant 9.99999996E-13 : f32
    %292 = vector.broadcast %cst_166 : f32 to vector<16x1xf32>
    %293 = arith.addf %289, %292 : vector<16x1xf32>
    %294 = math.rsqrt %293 : vector<16x1xf32>
    %295 = vector.broadcast %294 : vector<16x1xf32> to vector<16x64xf32>
    %296 = arith.mulf %291, %295 : vector<16x64xf32>
    %297 = vector.broadcast %277 : vector<1x64xf32> to vector<16x64xf32>
    %298 = arith.mulf %296, %297 : vector<16x64xf32>
    %299 = vector.broadcast %278 : vector<1x64xf32> to vector<16x64xf32>
    %300 = arith.addf %298, %299 : vector<16x64xf32>
    %c1_i32 = arith.constant 1 : i32
    %c0_167 = arith.constant 0 : index
    %c0_168 = arith.constant 0 : index
    %c0_169 = arith.constant 0 : index
    %301 = vector.load %arg7[%c0_167, %c0_168, %c0_169] : memref<4x64x16xbf16, #tpu.memory_space<vmem>>, vector<1x64x16xbf16>
    %302 = vector.shape_cast %301 : vector<1x64x16xbf16> to vector<64x16xbf16>
    %303 = arith.truncf %300 : vector<16x64xf32> to vector<16x64xbf16>
    %cst_170 = arith.constant dense<0.000000e+00> : vector<16x16xf32>
    %304 = tpu.matmul %303, %302, %cst_170 {dimension_numbers = #tpu.dot_dimension_numbers<[1], [0], [0], [1], [0, 0, 1, 1], [], []>} : vector<16x64xbf16>, vector<64x16xbf16>, vector<16x16xf32> -> vector<16x16xf32>
    %c0_171 = arith.constant 0 : index
    %c0_172 = arith.constant 0 : index
    %c0_173 = arith.constant 0 : index
    %305 = vector.load %arg10[%c0_171, %c0_172, %c0_173] : memref<4x1x16xf32, #tpu.memory_space<vmem>>, vector<1x1x16xf32>
    %306 = vector.shape_cast %305 : vector<1x1x16xf32> to vector<1x16xf32>
    %307 = vector.broadcast %306 : vector<1x16xf32> to vector<16x16xf32>
    %308 = arith.addf %304, %307 : vector<16x16xf32>
    %c0_174 = arith.constant 0 : index
    %c0_175 = arith.constant 0 : index
    %c0_176 = arith.constant 0 : index
    %309 = vector.load %arg8[%c0_174, %c0_175, %c0_176] : memref<4x64x16xbf16, #tpu.memory_space<vmem>>, vector<1x64x16xbf16>
    %310 = vector.shape_cast %309 : vector<1x64x16xbf16> to vector<64x16xbf16>
    %311 = arith.truncf %300 : vector<16x64xf32> to vector<16x64xbf16>
    %cst_177 = arith.constant dense<0.000000e+00> : vector<16x16xf32>
    %312 = tpu.matmul %311, %310, %cst_177 {dimension_numbers = #tpu.dot_dimension_numbers<[1], [0], [0], [1], [0, 0, 1, 1], [], []>} : vector<16x64xbf16>, vector<64x16xbf16>, vector<16x16xf32> -> vector<16x16xf32>
    %c0_178 = arith.constant 0 : index
    %c0_179 = arith.constant 0 : index
    %c0_180 = arith.constant 0 : index
    %313 = vector.load %arg11[%c0_178, %c0_179, %c0_180] : memref<4x1x16xf32, #tpu.memory_space<vmem>>, vector<1x1x16xf32>
    %314 = vector.shape_cast %313 : vector<1x1x16xf32> to vector<1x16xf32>
    %315 = vector.broadcast %314 : vector<1x16xf32> to vector<16x16xf32>
    %316 = arith.addf %312, %315 : vector<16x16xf32>
    %c0_181 = arith.constant 0 : index
    %c0_182 = arith.constant 0 : index
    %c0_183 = arith.constant 0 : index
    %317 = vector.load %arg9[%c0_181, %c0_182, %c0_183] : memref<4x64x16xbf16, #tpu.memory_space<vmem>>, vector<1x64x16xbf16>
    %318 = vector.shape_cast %317 : vector<1x64x16xbf16> to vector<64x16xbf16>
    %319 = arith.truncf %300 : vector<16x64xf32> to vector<16x64xbf16>
    %cst_184 = arith.constant dense<0.000000e+00> : vector<16x16xf32>
    %320 = tpu.matmul %319, %318, %cst_184 {dimension_numbers = #tpu.dot_dimension_numbers<[1], [0], [0], [1], [0, 0, 1, 1], [], []>} : vector<16x64xbf16>, vector<64x16xbf16>, vector<16x16xf32> -> vector<16x16xf32>
    %c0_185 = arith.constant 0 : index
    %c0_186 = arith.constant 0 : index
    %c0_187 = arith.constant 0 : index
    %321 = vector.load %arg12[%c0_185, %c0_186, %c0_187] : memref<4x1x16xf32, #tpu.memory_space<vmem>>, vector<1x1x16xf32>
    %322 = vector.shape_cast %321 : vector<1x1x16xf32> to vector<1x16xf32>
    %323 = vector.broadcast %322 : vector<1x16xf32> to vector<16x16xf32>
    %324 = arith.addf %320, %323 : vector<16x16xf32>
    %325 = arith.truncf %308 : vector<16x16xf32> to vector<16x16xbf16>
    %326 = arith.truncf %316 : vector<16x16xf32> to vector<16x16xbf16>
    %cst_188 = arith.constant dense<0.000000e+00> : vector<16x16xf32>
    %327 = tpu.matmul %325, %326, %cst_188 {dimension_numbers = #tpu.dot_dimension_numbers<[1], [1], [0], [0], [0, 0, 1, 0], [], []>} : vector<16x16xbf16>, vector<16x16xbf16>, vector<16x16xf32> -> vector<16x16xf32>
    %cst_189 = arith.constant 2.500000e-01 : f32
    %328 = vector.broadcast %cst_189 : f32 to vector<16x16xf32>
    %329 = arith.mulf %327, %328 : vector<16x16xf32>
    %330 = arith.addf %329, %0 : vector<16x16xf32>
    %cst_190 = arith.constant dense<0xFF800000> : vector<16xf32>
    %331 = vector.multi_reduction <maximumf>, %330, %cst_190 [1] : vector<16x16xf32> to vector<16xf32>
    %332 = vector.shape_cast %331 : vector<16xf32> to vector<16x1xf32>
    %333 = vector.broadcast %332 : vector<16x1xf32> to vector<16x16xf32>
    %334 = arith.subf %330, %333 : vector<16x16xf32>
    %335 = math.exp %334 : vector<16x16xf32>
    %cst_191 = arith.constant dense<0.000000e+00> : vector<16xf32>
    %336 = vector.multi_reduction <add>, %335, %cst_191 [1] : vector<16x16xf32> to vector<16xf32>
    %337 = vector.shape_cast %336 : vector<16xf32> to vector<16x1xf32>
    %338 = tpu.reciprocal %337 {approx = true} : vector<16x1xf32> -> vector<16x1xf32>
    %339 = vector.broadcast %338 : vector<16x1xf32> to vector<16x16xf32>
    %340 = arith.mulf %335, %339 : vector<16x16xf32>
    %341 = arith.truncf %340 : vector<16x16xf32> to vector<16x16xbf16>
    %342 = arith.truncf %324 : vector<16x16xf32> to vector<16x16xbf16>
    %cst_192 = arith.constant dense<0.000000e+00> : vector<16x16xf32>
    %343 = tpu.matmul %341, %342, %cst_192 {dimension_numbers = #tpu.dot_dimension_numbers<[1], [0], [0], [1], [0, 0, 1, 1], [], []>} : vector<16x16xbf16>, vector<16x16xbf16>, vector<16x16xf32> -> vector<16x16xf32>
    %c0_193 = arith.constant 0 : index
    %c0_194 = arith.constant 0 : index
    %c0_195 = arith.constant 0 : index
    %344 = vector.load %arg13[%c0_193, %c0_194, %c0_195] : memref<4x16x64xbf16, #tpu.memory_space<vmem>>, vector<1x16x64xbf16>
    %345 = vector.shape_cast %344 : vector<1x16x64xbf16> to vector<16x64xbf16>
    %346 = arith.truncf %343 : vector<16x16xf32> to vector<16x16xbf16>
    %cst_196 = arith.constant dense<0.000000e+00> : vector<16x64xf32>
    %347 = tpu.matmul %346, %345, %cst_196 {dimension_numbers = #tpu.dot_dimension_numbers<[1], [0], [0], [1], [0, 0, 1, 1], [], []>} : vector<16x16xbf16>, vector<16x64xbf16>, vector<16x64xf32> -> vector<16x64xf32>
    %c1_197 = arith.constant 1 : index
    %c0_198 = arith.constant 0 : index
    %c0_199 = arith.constant 0 : index
    %348 = vector.load %arg7[%c1_197, %c0_198, %c0_199] : memref<4x64x16xbf16, #tpu.memory_space<vmem>>, vector<1x64x16xbf16>
    %349 = vector.shape_cast %348 : vector<1x64x16xbf16> to vector<64x16xbf16>
    %350 = arith.truncf %300 : vector<16x64xf32> to vector<16x64xbf16>
    %cst_200 = arith.constant dense<0.000000e+00> : vector<16x16xf32>
    %351 = tpu.matmul %350, %349, %cst_200 {dimension_numbers = #tpu.dot_dimension_numbers<[1], [0], [0], [1], [0, 0, 1, 1], [], []>} : vector<16x64xbf16>, vector<64x16xbf16>, vector<16x16xf32> -> vector<16x16xf32>
    %c1_201 = arith.constant 1 : index
    %c0_202 = arith.constant 0 : index
    %c0_203 = arith.constant 0 : index
    %352 = vector.load %arg10[%c1_201, %c0_202, %c0_203] : memref<4x1x16xf32, #tpu.memory_space<vmem>>, vector<1x1x16xf32>
    %353 = vector.shape_cast %352 : vector<1x1x16xf32> to vector<1x16xf32>
    %354 = vector.broadcast %353 : vector<1x16xf32> to vector<16x16xf32>
    %355 = arith.addf %351, %354 : vector<16x16xf32>
    %c1_204 = arith.constant 1 : index
    %c0_205 = arith.constant 0 : index
    %c0_206 = arith.constant 0 : index
    %356 = vector.load %arg8[%c1_204, %c0_205, %c0_206] : memref<4x64x16xbf16, #tpu.memory_space<vmem>>, vector<1x64x16xbf16>
    %357 = vector.shape_cast %356 : vector<1x64x16xbf16> to vector<64x16xbf16>
    %358 = arith.truncf %300 : vector<16x64xf32> to vector<16x64xbf16>
    %cst_207 = arith.constant dense<0.000000e+00> : vector<16x16xf32>
    %359 = tpu.matmul %358, %357, %cst_207 {dimension_numbers = #tpu.dot_dimension_numbers<[1], [0], [0], [1], [0, 0, 1, 1], [], []>} : vector<16x64xbf16>, vector<64x16xbf16>, vector<16x16xf32> -> vector<16x16xf32>
    %c1_208 = arith.constant 1 : index
    %c0_209 = arith.constant 0 : index
    %c0_210 = arith.constant 0 : index
    %360 = vector.load %arg11[%c1_208, %c0_209, %c0_210] : memref<4x1x16xf32, #tpu.memory_space<vmem>>, vector<1x1x16xf32>
    %361 = vector.shape_cast %360 : vector<1x1x16xf32> to vector<1x16xf32>
    %362 = vector.broadcast %361 : vector<1x16xf32> to vector<16x16xf32>
    %363 = arith.addf %359, %362 : vector<16x16xf32>
    %c1_211 = arith.constant 1 : index
    %c0_212 = arith.constant 0 : index
    %c0_213 = arith.constant 0 : index
    %364 = vector.load %arg9[%c1_211, %c0_212, %c0_213] : memref<4x64x16xbf16, #tpu.memory_space<vmem>>, vector<1x64x16xbf16>
    %365 = vector.shape_cast %364 : vector<1x64x16xbf16> to vector<64x16xbf16>
    %366 = arith.truncf %300 : vector<16x64xf32> to vector<16x64xbf16>
    %cst_214 = arith.constant dense<0.000000e+00> : vector<16x16xf32>
    %367 = tpu.matmul %366, %365, %cst_214 {dimension_numbers = #tpu.dot_dimension_numbers<[1], [0], [0], [1], [0, 0, 1, 1], [], []>} : vector<16x64xbf16>, vector<64x16xbf16>, vector<16x16xf32> -> vector<16x16xf32>
    %c1_215 = arith.constant 1 : index
    %c0_216 = arith.constant 0 : index
    %c0_217 = arith.constant 0 : index
    %368 = vector.load %arg12[%c1_215, %c0_216, %c0_217] : memref<4x1x16xf32, #tpu.memory_space<vmem>>, vector<1x1x16xf32>
    %369 = vector.shape_cast %368 : vector<1x1x16xf32> to vector<1x16xf32>
    %370 = vector.broadcast %369 : vector<1x16xf32> to vector<16x16xf32>
    %371 = arith.addf %367, %370 : vector<16x16xf32>
    %372 = arith.truncf %355 : vector<16x16xf32> to vector<16x16xbf16>
    %373 = arith.truncf %363 : vector<16x16xf32> to vector<16x16xbf16>
    %cst_218 = arith.constant dense<0.000000e+00> : vector<16x16xf32>
    %374 = tpu.matmul %372, %373, %cst_218 {dimension_numbers = #tpu.dot_dimension_numbers<[1], [1], [0], [0], [0, 0, 1, 0], [], []>} : vector<16x16xbf16>, vector<16x16xbf16>, vector<16x16xf32> -> vector<16x16xf32>
    %cst_219 = arith.constant 2.500000e-01 : f32
    %375 = vector.broadcast %cst_219 : f32 to vector<16x16xf32>
    %376 = arith.mulf %374, %375 : vector<16x16xf32>
    %377 = arith.addf %376, %0 : vector<16x16xf32>
    %cst_220 = arith.constant dense<0xFF800000> : vector<16xf32>
    %378 = vector.multi_reduction <maximumf>, %377, %cst_220 [1] : vector<16x16xf32> to vector<16xf32>
    %379 = vector.shape_cast %378 : vector<16xf32> to vector<16x1xf32>
    %380 = vector.broadcast %379 : vector<16x1xf32> to vector<16x16xf32>
    %381 = arith.subf %377, %380 : vector<16x16xf32>
    %382 = math.exp %381 : vector<16x16xf32>
    %cst_221 = arith.constant dense<0.000000e+00> : vector<16xf32>
    %383 = vector.multi_reduction <add>, %382, %cst_221 [1] : vector<16x16xf32> to vector<16xf32>
    %384 = vector.shape_cast %383 : vector<16xf32> to vector<16x1xf32>
    %385 = tpu.reciprocal %384 {approx = true} : vector<16x1xf32> -> vector<16x1xf32>
    %386 = vector.broadcast %385 : vector<16x1xf32> to vector<16x16xf32>
    %387 = arith.mulf %382, %386 : vector<16x16xf32>
    %388 = arith.truncf %387 : vector<16x16xf32> to vector<16x16xbf16>
    %389 = arith.truncf %371 : vector<16x16xf32> to vector<16x16xbf16>
    %cst_222 = arith.constant dense<0.000000e+00> : vector<16x16xf32>
    %390 = tpu.matmul %388, %389, %cst_222 {dimension_numbers = #tpu.dot_dimension_numbers<[1], [0], [0], [1], [0, 0, 1, 1], [], []>} : vector<16x16xbf16>, vector<16x16xbf16>, vector<16x16xf32> -> vector<16x16xf32>
    %c1_223 = arith.constant 1 : index
    %c0_224 = arith.constant 0 : index
    %c0_225 = arith.constant 0 : index
    %391 = vector.load %arg13[%c1_223, %c0_224, %c0_225] : memref<4x16x64xbf16, #tpu.memory_space<vmem>>, vector<1x16x64xbf16>
    %392 = vector.shape_cast %391 : vector<1x16x64xbf16> to vector<16x64xbf16>
    %393 = arith.truncf %390 : vector<16x16xf32> to vector<16x16xbf16>
    %cst_226 = arith.constant dense<0.000000e+00> : vector<16x64xf32>
    %394 = tpu.matmul %393, %392, %cst_226 {dimension_numbers = #tpu.dot_dimension_numbers<[1], [0], [0], [1], [0, 0, 1, 1], [], []>} : vector<16x16xbf16>, vector<16x64xbf16>, vector<16x64xf32> -> vector<16x64xf32>
    %395 = arith.addf %347, %394 : vector<16x64xf32>
    %c2_227 = arith.constant 2 : index
    %c0_228 = arith.constant 0 : index
    %c0_229 = arith.constant 0 : index
    %396 = vector.load %arg7[%c2_227, %c0_228, %c0_229] : memref<4x64x16xbf16, #tpu.memory_space<vmem>>, vector<1x64x16xbf16>
    %397 = vector.shape_cast %396 : vector<1x64x16xbf16> to vector<64x16xbf16>
    %398 = arith.truncf %300 : vector<16x64xf32> to vector<16x64xbf16>
    %cst_230 = arith.constant dense<0.000000e+00> : vector<16x16xf32>
    %399 = tpu.matmul %398, %397, %cst_230 {dimension_numbers = #tpu.dot_dimension_numbers<[1], [0], [0], [1], [0, 0, 1, 1], [], []>} : vector<16x64xbf16>, vector<64x16xbf16>, vector<16x16xf32> -> vector<16x16xf32>
    %c2_231 = arith.constant 2 : index
    %c0_232 = arith.constant 0 : index
    %c0_233 = arith.constant 0 : index
    %400 = vector.load %arg10[%c2_231, %c0_232, %c0_233] : memref<4x1x16xf32, #tpu.memory_space<vmem>>, vector<1x1x16xf32>
    %401 = vector.shape_cast %400 : vector<1x1x16xf32> to vector<1x16xf32>
    %402 = vector.broadcast %401 : vector<1x16xf32> to vector<16x16xf32>
    %403 = arith.addf %399, %402 : vector<16x16xf32>
    %c2_234 = arith.constant 2 : index
    %c0_235 = arith.constant 0 : index
    %c0_236 = arith.constant 0 : index
    %404 = vector.load %arg8[%c2_234, %c0_235, %c0_236] : memref<4x64x16xbf16, #tpu.memory_space<vmem>>, vector<1x64x16xbf16>
    %405 = vector.shape_cast %404 : vector<1x64x16xbf16> to vector<64x16xbf16>
    %406 = arith.truncf %300 : vector<16x64xf32> to vector<16x64xbf16>
    %cst_237 = arith.constant dense<0.000000e+00> : vector<16x16xf32>
    %407 = tpu.matmul %406, %405, %cst_237 {dimension_numbers = #tpu.dot_dimension_numbers<[1], [0], [0], [1], [0, 0, 1, 1], [], []>} : vector<16x64xbf16>, vector<64x16xbf16>, vector<16x16xf32> -> vector<16x16xf32>
    %c2_238 = arith.constant 2 : index
    %c0_239 = arith.constant 0 : index
    %c0_240 = arith.constant 0 : index
    %408 = vector.load %arg11[%c2_238, %c0_239, %c0_240] : memref<4x1x16xf32, #tpu.memory_space<vmem>>, vector<1x1x16xf32>
    %409 = vector.shape_cast %408 : vector<1x1x16xf32> to vector<1x16xf32>
    %410 = vector.broadcast %409 : vector<1x16xf32> to vector<16x16xf32>
    %411 = arith.addf %407, %410 : vector<16x16xf32>
    %c2_241 = arith.constant 2 : index
    %c0_242 = arith.constant 0 : index
    %c0_243 = arith.constant 0 : index
    %412 = vector.load %arg9[%c2_241, %c0_242, %c0_243] : memref<4x64x16xbf16, #tpu.memory_space<vmem>>, vector<1x64x16xbf16>
    %413 = vector.shape_cast %412 : vector<1x64x16xbf16> to vector<64x16xbf16>
    %414 = arith.truncf %300 : vector<16x64xf32> to vector<16x64xbf16>
    %cst_244 = arith.constant dense<0.000000e+00> : vector<16x16xf32>
    %415 = tpu.matmul %414, %413, %cst_244 {dimension_numbers = #tpu.dot_dimension_numbers<[1], [0], [0], [1], [0, 0, 1, 1], [], []>} : vector<16x64xbf16>, vector<64x16xbf16>, vector<16x16xf32> -> vector<16x16xf32>
    %c2_245 = arith.constant 2 : index
    %c0_246 = arith.constant 0 : index
    %c0_247 = arith.constant 0 : index
    %416 = vector.load %arg12[%c2_245, %c0_246, %c0_247] : memref<4x1x16xf32, #tpu.memory_space<vmem>>, vector<1x1x16xf32>
    %417 = vector.shape_cast %416 : vector<1x1x16xf32> to vector<1x16xf32>
    %418 = vector.broadcast %417 : vector<1x16xf32> to vector<16x16xf32>
    %419 = arith.addf %415, %418 : vector<16x16xf32>
    %420 = arith.truncf %403 : vector<16x16xf32> to vector<16x16xbf16>
    %421 = arith.truncf %411 : vector<16x16xf32> to vector<16x16xbf16>
    %cst_248 = arith.constant dense<0.000000e+00> : vector<16x16xf32>
    %422 = tpu.matmul %420, %421, %cst_248 {dimension_numbers = #tpu.dot_dimension_numbers<[1], [1], [0], [0], [0, 0, 1, 0], [], []>} : vector<16x16xbf16>, vector<16x16xbf16>, vector<16x16xf32> -> vector<16x16xf32>
    %cst_249 = arith.constant 2.500000e-01 : f32
    %423 = vector.broadcast %cst_249 : f32 to vector<16x16xf32>
    %424 = arith.mulf %422, %423 : vector<16x16xf32>
    %425 = arith.addf %424, %0 : vector<16x16xf32>
    %cst_250 = arith.constant dense<0xFF800000> : vector<16xf32>
    %426 = vector.multi_reduction <maximumf>, %425, %cst_250 [1] : vector<16x16xf32> to vector<16xf32>
    %427 = vector.shape_cast %426 : vector<16xf32> to vector<16x1xf32>
    %428 = vector.broadcast %427 : vector<16x1xf32> to vector<16x16xf32>
    %429 = arith.subf %425, %428 : vector<16x16xf32>
    %430 = math.exp %429 : vector<16x16xf32>
    %cst_251 = arith.constant dense<0.000000e+00> : vector<16xf32>
    %431 = vector.multi_reduction <add>, %430, %cst_251 [1] : vector<16x16xf32> to vector<16xf32>
    %432 = vector.shape_cast %431 : vector<16xf32> to vector<16x1xf32>
    %433 = tpu.reciprocal %432 {approx = true} : vector<16x1xf32> -> vector<16x1xf32>
    %434 = vector.broadcast %433 : vector<16x1xf32> to vector<16x16xf32>
    %435 = arith.mulf %430, %434 : vector<16x16xf32>
    %436 = arith.truncf %435 : vector<16x16xf32> to vector<16x16xbf16>
    %437 = arith.truncf %419 : vector<16x16xf32> to vector<16x16xbf16>
    %cst_252 = arith.constant dense<0.000000e+00> : vector<16x16xf32>
    %438 = tpu.matmul %436, %437, %cst_252 {dimension_numbers = #tpu.dot_dimension_numbers<[1], [0], [0], [1], [0, 0, 1, 1], [], []>} : vector<16x16xbf16>, vector<16x16xbf16>, vector<16x16xf32> -> vector<16x16xf32>
    %c2_253 = arith.constant 2 : index
    %c0_254 = arith.constant 0 : index
    %c0_255 = arith.constant 0 : index
    %439 = vector.load %arg13[%c2_253, %c0_254, %c0_255] : memref<4x16x64xbf16, #tpu.memory_space<vmem>>, vector<1x16x64xbf16>
    %440 = vector.shape_cast %439 : vector<1x16x64xbf16> to vector<16x64xbf16>
    %441 = arith.truncf %438 : vector<16x16xf32> to vector<16x16xbf16>
    %cst_256 = arith.constant dense<0.000000e+00> : vector<16x64xf32>
    %442 = tpu.matmul %441, %440, %cst_256 {dimension_numbers = #tpu.dot_dimension_numbers<[1], [0], [0], [1], [0, 0, 1, 1], [], []>} : vector<16x16xbf16>, vector<16x64xbf16>, vector<16x64xf32> -> vector<16x64xf32>
    %443 = arith.addf %395, %442 : vector<16x64xf32>
    %c3_257 = arith.constant 3 : index
    %c0_258 = arith.constant 0 : index
    %c0_259 = arith.constant 0 : index
    %444 = vector.load %arg7[%c3_257, %c0_258, %c0_259] : memref<4x64x16xbf16, #tpu.memory_space<vmem>>, vector<1x64x16xbf16>
    %445 = vector.shape_cast %444 : vector<1x64x16xbf16> to vector<64x16xbf16>
    %446 = arith.truncf %300 : vector<16x64xf32> to vector<16x64xbf16>
    %cst_260 = arith.constant dense<0.000000e+00> : vector<16x16xf32>
    %447 = tpu.matmul %446, %445, %cst_260 {dimension_numbers = #tpu.dot_dimension_numbers<[1], [0], [0], [1], [0, 0, 1, 1], [], []>} : vector<16x64xbf16>, vector<64x16xbf16>, vector<16x16xf32> -> vector<16x16xf32>
    %c3_261 = arith.constant 3 : index
    %c0_262 = arith.constant 0 : index
    %c0_263 = arith.constant 0 : index
    %448 = vector.load %arg10[%c3_261, %c0_262, %c0_263] : memref<4x1x16xf32, #tpu.memory_space<vmem>>, vector<1x1x16xf32>
    %449 = vector.shape_cast %448 : vector<1x1x16xf32> to vector<1x16xf32>
    %450 = vector.broadcast %449 : vector<1x16xf32> to vector<16x16xf32>
    %451 = arith.addf %447, %450 : vector<16x16xf32>
    %c3_264 = arith.constant 3 : index
    %c0_265 = arith.constant 0 : index
    %c0_266 = arith.constant 0 : index
    %452 = vector.load %arg8[%c3_264, %c0_265, %c0_266] : memref<4x64x16xbf16, #tpu.memory_space<vmem>>, vector<1x64x16xbf16>
    %453 = vector.shape_cast %452 : vector<1x64x16xbf16> to vector<64x16xbf16>
    %454 = arith.truncf %300 : vector<16x64xf32> to vector<16x64xbf16>
    %cst_267 = arith.constant dense<0.000000e+00> : vector<16x16xf32>
    %455 = tpu.matmul %454, %453, %cst_267 {dimension_numbers = #tpu.dot_dimension_numbers<[1], [0], [0], [1], [0, 0, 1, 1], [], []>} : vector<16x64xbf16>, vector<64x16xbf16>, vector<16x16xf32> -> vector<16x16xf32>
    %c3_268 = arith.constant 3 : index
    %c0_269 = arith.constant 0 : index
    %c0_270 = arith.constant 0 : index
    %456 = vector.load %arg11[%c3_268, %c0_269, %c0_270] : memref<4x1x16xf32, #tpu.memory_space<vmem>>, vector<1x1x16xf32>
    %457 = vector.shape_cast %456 : vector<1x1x16xf32> to vector<1x16xf32>
    %458 = vector.broadcast %457 : vector<1x16xf32> to vector<16x16xf32>
    %459 = arith.addf %455, %458 : vector<16x16xf32>
    %c3_271 = arith.constant 3 : index
    %c0_272 = arith.constant 0 : index
    %c0_273 = arith.constant 0 : index
    %460 = vector.load %arg9[%c3_271, %c0_272, %c0_273] : memref<4x64x16xbf16, #tpu.memory_space<vmem>>, vector<1x64x16xbf16>
    %461 = vector.shape_cast %460 : vector<1x64x16xbf16> to vector<64x16xbf16>
    %462 = arith.truncf %300 : vector<16x64xf32> to vector<16x64xbf16>
    %cst_274 = arith.constant dense<0.000000e+00> : vector<16x16xf32>
    %463 = tpu.matmul %462, %461, %cst_274 {dimension_numbers = #tpu.dot_dimension_numbers<[1], [0], [0], [1], [0, 0, 1, 1], [], []>} : vector<16x64xbf16>, vector<64x16xbf16>, vector<16x16xf32> -> vector<16x16xf32>
    %c3_275 = arith.constant 3 : index
    %c0_276 = arith.constant 0 : index
    %c0_277 = arith.constant 0 : index
    %464 = vector.load %arg12[%c3_275, %c0_276, %c0_277] : memref<4x1x16xf32, #tpu.memory_space<vmem>>, vector<1x1x16xf32>
    %465 = vector.shape_cast %464 : vector<1x1x16xf32> to vector<1x16xf32>
    %466 = vector.broadcast %465 : vector<1x16xf32> to vector<16x16xf32>
    %467 = arith.addf %463, %466 : vector<16x16xf32>
    %468 = arith.truncf %451 : vector<16x16xf32> to vector<16x16xbf16>
    %469 = arith.truncf %459 : vector<16x16xf32> to vector<16x16xbf16>
    %cst_278 = arith.constant dense<0.000000e+00> : vector<16x16xf32>
    %470 = tpu.matmul %468, %469, %cst_278 {dimension_numbers = #tpu.dot_dimension_numbers<[1], [1], [0], [0], [0, 0, 1, 0], [], []>} : vector<16x16xbf16>, vector<16x16xbf16>, vector<16x16xf32> -> vector<16x16xf32>
    %cst_279 = arith.constant 2.500000e-01 : f32
    %471 = vector.broadcast %cst_279 : f32 to vector<16x16xf32>
    %472 = arith.mulf %470, %471 : vector<16x16xf32>
    %473 = arith.addf %472, %0 : vector<16x16xf32>
    %cst_280 = arith.constant dense<0xFF800000> : vector<16xf32>
    %474 = vector.multi_reduction <maximumf>, %473, %cst_280 [1] : vector<16x16xf32> to vector<16xf32>
    %475 = vector.shape_cast %474 : vector<16xf32> to vector<16x1xf32>
    %476 = vector.broadcast %475 : vector<16x1xf32> to vector<16x16xf32>
    %477 = arith.subf %473, %476 : vector<16x16xf32>
    %478 = math.exp %477 : vector<16x16xf32>
    %cst_281 = arith.constant dense<0.000000e+00> : vector<16xf32>
    %479 = vector.multi_reduction <add>, %478, %cst_281 [1] : vector<16x16xf32> to vector<16xf32>
    %480 = vector.shape_cast %479 : vector<16xf32> to vector<16x1xf32>
    %481 = tpu.reciprocal %480 {approx = true} : vector<16x1xf32> -> vector<16x1xf32>
    %482 = vector.broadcast %481 : vector<16x1xf32> to vector<16x16xf32>
    %483 = arith.mulf %478, %482 : vector<16x16xf32>
    %484 = arith.truncf %483 : vector<16x16xf32> to vector<16x16xbf16>
    %485 = arith.truncf %467 : vector<16x16xf32> to vector<16x16xbf16>
    %cst_282 = arith.constant dense<0.000000e+00> : vector<16x16xf32>
    %486 = tpu.matmul %484, %485, %cst_282 {dimension_numbers = #tpu.dot_dimension_numbers<[1], [0], [0], [1], [0, 0, 1, 1], [], []>} : vector<16x16xbf16>, vector<16x16xbf16>, vector<16x16xf32> -> vector<16x16xf32>
    %c3_283 = arith.constant 3 : index
    %c0_284 = arith.constant 0 : index
    %c0_285 = arith.constant 0 : index
    %487 = vector.load %arg13[%c3_283, %c0_284, %c0_285] : memref<4x16x64xbf16, #tpu.memory_space<vmem>>, vector<1x16x64xbf16>
    %488 = vector.shape_cast %487 : vector<1x16x64xbf16> to vector<16x64xbf16>
    %489 = arith.truncf %486 : vector<16x16xf32> to vector<16x16xbf16>
    %cst_286 = arith.constant dense<0.000000e+00> : vector<16x64xf32>
    %490 = tpu.matmul %489, %488, %cst_286 {dimension_numbers = #tpu.dot_dimension_numbers<[1], [0], [0], [1], [0, 0, 1, 1], [], []>} : vector<16x16xbf16>, vector<16x64xbf16>, vector<16x64xf32> -> vector<16x64xf32>
    %491 = arith.addf %443, %490 : vector<16x64xf32>
    %c0_287 = arith.constant 0 : index
    %c0_288 = arith.constant 0 : index
    %492 = vector.load %arg14[%c0_287, %c0_288] : memref<1x64xf32, #tpu.memory_space<vmem>>, vector<1x64xf32>
    %493 = vector.broadcast %492 : vector<1x64xf32> to vector<16x64xf32>
    %494 = arith.addf %491, %493 : vector<16x64xf32>
    %495 = arith.addf %494, %300 : vector<16x64xf32>
    %c0_289 = arith.constant 0 : index
    %c0_290 = arith.constant 0 : index
    %496 = vector.load %arg15[%c0_289, %c0_290] : memref<1x64xf32, #tpu.memory_space<vmem>>, vector<1x64xf32>
    %c0_291 = arith.constant 0 : index
    %c0_292 = arith.constant 0 : index
    %497 = vector.load %arg16[%c0_291, %c0_292] : memref<1x64xf32, #tpu.memory_space<vmem>>, vector<1x64xf32>
    %cst_293 = arith.constant dense<0.000000e+00> : vector<16xf32>
    %498 = vector.multi_reduction <add>, %495, %cst_293 [1] : vector<16x64xf32> to vector<16xf32>
    %499 = vector.shape_cast %498 : vector<16xf32> to vector<16x1xf32>
    %cst_294 = arith.constant 6.400000e+01 : f32
    %500 = vector.broadcast %cst_294 : f32 to vector<16x1xf32>
    %501 = arith.divf %499, %500 : vector<16x1xf32>
    %502 = vector.broadcast %501 : vector<16x1xf32> to vector<16x64xf32>
    %503 = arith.subf %495, %502 : vector<16x64xf32>
    %504 = arith.mulf %503, %503 : vector<16x64xf32>
    %cst_295 = arith.constant dense<0.000000e+00> : vector<16xf32>
    %505 = vector.multi_reduction <add>, %504, %cst_295 [1] : vector<16x64xf32> to vector<16xf32>
    %506 = vector.shape_cast %505 : vector<16xf32> to vector<16x1xf32>
    %cst_296 = arith.constant 6.400000e+01 : f32
    %507 = vector.broadcast %cst_296 : f32 to vector<16x1xf32>
    %508 = arith.divf %506, %507 : vector<16x1xf32>
    %509 = vector.broadcast %501 : vector<16x1xf32> to vector<16x64xf32>
    %510 = arith.subf %495, %509 : vector<16x64xf32>
    %cst_297 = arith.constant 9.99999996E-13 : f32
    %511 = vector.broadcast %cst_297 : f32 to vector<16x1xf32>
    %512 = arith.addf %508, %511 : vector<16x1xf32>
    %513 = math.rsqrt %512 : vector<16x1xf32>
    %514 = vector.broadcast %513 : vector<16x1xf32> to vector<16x64xf32>
    %515 = arith.mulf %510, %514 : vector<16x64xf32>
    %516 = vector.broadcast %496 : vector<1x64xf32> to vector<16x64xf32>
    %517 = arith.mulf %515, %516 : vector<16x64xf32>
    %518 = vector.broadcast %497 : vector<1x64xf32> to vector<16x64xf32>
    %519 = arith.addf %517, %518 : vector<16x64xf32>
    %c0_298 = arith.constant 0 : index
    %c0_299 = arith.constant 0 : index
    %520 = vector.load %arg17[%c0_298, %c0_299] : memref<64x128xbf16, #tpu.memory_space<vmem>>, vector<64x128xbf16>
    %521 = arith.truncf %519 : vector<16x64xf32> to vector<16x64xbf16>
    %cst_300 = arith.constant dense<0.000000e+00> : vector<16x128xf32>
    %522 = tpu.matmul %521, %520, %cst_300 {dimension_numbers = #tpu.dot_dimension_numbers<[1], [0], [0], [1], [0, 0, 1, 1], [], []>} : vector<16x64xbf16>, vector<64x128xbf16>, vector<16x128xf32> -> vector<16x128xf32>
    %c0_301 = arith.constant 0 : index
    %c0_302 = arith.constant 0 : index
    %523 = vector.load %arg18[%c0_301, %c0_302] : memref<1x128xf32, #tpu.memory_space<vmem>>, vector<1x128xf32>
    %524 = vector.broadcast %523 : vector<1x128xf32> to vector<16x128xf32>
    %525 = arith.addf %522, %524 : vector<16x128xf32>
    %cst_303 = arith.constant 5.000000e-01 : f32
    %526 = vector.broadcast %cst_303 : f32 to vector<16x128xf32>
    %527 = arith.mulf %526, %525 : vector<16x128xf32>
    %cst_304 = arith.constant 4.471500e-02 : f32
    %528 = vector.broadcast %cst_304 : f32 to vector<16x128xf32>
    %529 = arith.mulf %528, %525 : vector<16x128xf32>
    %530 = arith.mulf %529, %525 : vector<16x128xf32>
    %531 = arith.mulf %530, %525 : vector<16x128xf32>
    %532 = arith.addf %525, %531 : vector<16x128xf32>
    %cst_305 = arith.constant 0.797884583 : f32
    %533 = vector.broadcast %cst_305 : f32 to vector<16x128xf32>
    %534 = arith.mulf %533, %532 : vector<16x128xf32>
    %535 = math.tanh %534 : vector<16x128xf32>
    %cst_306 = arith.constant 1.000000e+00 : f32
    %536 = vector.broadcast %cst_306 : f32 to vector<16x128xf32>
    %537 = arith.addf %536, %535 : vector<16x128xf32>
    %538 = arith.mulf %527, %537 : vector<16x128xf32>
    %c0_307 = arith.constant 0 : index
    %c0_308 = arith.constant 0 : index
    %539 = vector.load %arg19[%c0_307, %c0_308] : memref<128x64xbf16, #tpu.memory_space<vmem>>, vector<128x64xbf16>
    %540 = arith.truncf %538 : vector<16x128xf32> to vector<16x128xbf16>
    %cst_309 = arith.constant dense<0.000000e+00> : vector<16x64xf32>
    %541 = tpu.matmul %540, %539, %cst_309 {dimension_numbers = #tpu.dot_dimension_numbers<[1], [0], [0], [1], [0, 0, 1, 1], [], []>} : vector<16x128xbf16>, vector<128x64xbf16>, vector<16x64xf32> -> vector<16x64xf32>
    %c0_310 = arith.constant 0 : index
    %c0_311 = arith.constant 0 : index
    %542 = vector.load %arg20[%c0_310, %c0_311] : memref<1x64xf32, #tpu.memory_space<vmem>>, vector<1x64xf32>
    %543 = vector.broadcast %542 : vector<1x64xf32> to vector<16x64xf32>
    %544 = arith.addf %541, %543 : vector<16x64xf32>
    %545 = arith.addf %544, %519 : vector<16x64xf32>
    %c0_312 = arith.constant 0 : index
    %c0_313 = arith.constant 0 : index
    %546 = vector.load %arg21[%c0_312, %c0_313] : memref<1x64xf32, #tpu.memory_space<vmem>>, vector<1x64xf32>
    %c0_314 = arith.constant 0 : index
    %c0_315 = arith.constant 0 : index
    %547 = vector.load %arg22[%c0_314, %c0_315] : memref<1x64xf32, #tpu.memory_space<vmem>>, vector<1x64xf32>
    %cst_316 = arith.constant dense<0.000000e+00> : vector<16xf32>
    %548 = vector.multi_reduction <add>, %545, %cst_316 [1] : vector<16x64xf32> to vector<16xf32>
    %549 = vector.shape_cast %548 : vector<16xf32> to vector<16x1xf32>
    %cst_317 = arith.constant 6.400000e+01 : f32
    %550 = vector.broadcast %cst_317 : f32 to vector<16x1xf32>
    %551 = arith.divf %549, %550 : vector<16x1xf32>
    %552 = vector.broadcast %551 : vector<16x1xf32> to vector<16x64xf32>
    %553 = arith.subf %545, %552 : vector<16x64xf32>
    %554 = arith.mulf %553, %553 : vector<16x64xf32>
    %cst_318 = arith.constant dense<0.000000e+00> : vector<16xf32>
    %555 = vector.multi_reduction <add>, %554, %cst_318 [1] : vector<16x64xf32> to vector<16xf32>
    %556 = vector.shape_cast %555 : vector<16xf32> to vector<16x1xf32>
    %cst_319 = arith.constant 6.400000e+01 : f32
    %557 = vector.broadcast %cst_319 : f32 to vector<16x1xf32>
    %558 = arith.divf %556, %557 : vector<16x1xf32>
    %559 = vector.broadcast %551 : vector<16x1xf32> to vector<16x64xf32>
    %560 = arith.subf %545, %559 : vector<16x64xf32>
    %cst_320 = arith.constant 9.99999996E-13 : f32
    %561 = vector.broadcast %cst_320 : f32 to vector<16x1xf32>
    %562 = arith.addf %558, %561 : vector<16x1xf32>
    %563 = math.rsqrt %562 : vector<16x1xf32>
    %564 = vector.broadcast %563 : vector<16x1xf32> to vector<16x64xf32>
    %565 = arith.mulf %560, %564 : vector<16x64xf32>
    %566 = vector.broadcast %546 : vector<1x64xf32> to vector<16x64xf32>
    %567 = arith.mulf %565, %566 : vector<16x64xf32>
    %568 = vector.broadcast %547 : vector<1x64xf32> to vector<16x64xf32>
    %569 = arith.addf %567, %568 : vector<16x64xf32>
    %c0_321 = arith.constant 0 : index
    %c0_322 = arith.constant 0 : index
    %570 = vector.load %arg23[%c0_321, %c0_322] : memref<16x64xf32, #tpu.memory_space<vmem>>, vector<16x64xf32>
    tpu.vector_store %arg23[%c0_321, %c0_322], %569 {strides = array<i32>} : memref<16x64xf32, #tpu.memory_space<vmem>>, vector<16x64xf32>,
    return
  }
  func.func @transform_0(%arg0: i32) -> (i32, i32) {
    %c0_i32 = arith.constant 0 : i32
    %c0_i32_0 = arith.constant 0 : i32
    %c0_i32_1 = arith.constant 0 : i32
    return %c0_i32, %c0_i32_0 : i32, i32
  }
  func.func @transform_1(%arg0: i32) -> (i32, i32) {
    %c0_i32 = arith.constant 0 : i32
    %c0_i32_0 = arith.constant 0 : i32
    %c0_i32_1 = arith.constant 0 : i32
    return %c0_i32, %c0_i32_0 : i32, i32
  }
  func.func @transform_2(%arg0: i32) -> (i32, i32) {
    %c0_i32 = arith.constant 0 : i32
    %c0_i32_0 = arith.constant 0 : i32
    %c0_i32_1 = arith.constant 0 : i32
    return %c0_i32, %c0_i32_0 : i32, i32
  }
  func.func @transform_3(%arg0: i32) -> (i32, i32) {
    %c0_i32 = arith.constant 0 : i32
    %c0_i32_0 = arith.constant 0 : i32
    %c0_i32_1 = arith.constant 0 : i32
    return %c0_i32, %c0_i32_0 : i32, i32
  }
  func.func @transform_4(%arg0: i32) -> (i32, i32) {
    %c0_i32 = arith.constant 0 : i32
    %c0_i32_0 = arith.constant 0 : i32
    %c0_i32_1 = arith.constant 0 : i32
    return %c0_i32, %c0_i32_0 : i32, i32
  }
  func.func @transform_5(%arg0: i32) -> (i32, i32) {
    %c0_i32 = arith.constant 0 : i32
    %c0_i32_0 = arith.constant 0 : i32
    %c0_i32_1 = arith.constant 0 : i32
    return %c0_i32, %c0_i32_0 : i32, i32
  }
  func.func @transform_6(%arg0: i32) -> (i32, i32, i32) {
    %c0_i32 = arith.constant 0 : i32
    %c0_i32_0 = arith.constant 0 : i32
    %c0_i32_1 = arith.constant 0 : i32
    %c0_i32_2 = arith.constant 0 : i32
    return %c0_i32, %c0_i32_0, %c0_i32_1 : i32, i32, i32
  }
  func.func @transform_7(%arg0: i32) -> (i32, i32, i32) {
    %c0_i32 = arith.constant 0 : i32
    %c0_i32_0 = arith.constant 0 : i32
    %c0_i32_1 = arith.constant 0 : i32
    %c0_i32_2 = arith.constant 0 : i32
    return %c0_i32, %c0_i32_0, %c0_i32_1 : i32, i32, i32
  }
  func.func @transform_8(%arg0: i32) -> (i32, i32, i32) {
    %c0_i32 = arith.constant 0 : i32
    %c0_i32_0 = arith.constant 0 : i32
    %c0_i32_1 = arith.constant 0 : i32
    %c0_i32_2 = arith.constant 0 : i32
    return %c0_i32, %c0_i32_0, %c0_i32_1 : i32, i32, i32
  }
  func.func @transform_9(%arg0: i32) -> (i32, i32, i32) {
    %c0_i32 = arith.constant 0 : i32
    %c0_i32_0 = arith.constant 0 : i32
    %c0_i32_1 = arith.constant 0 : i32
    %c0_i32_2 = arith.constant 0 : i32
    return %c0_i32, %c0_i32_0, %c0_i32_1 : i32, i32, i32
  }
  func.func @transform_10(%arg0: i32) -> (i32, i32, i32) {
    %c0_i32 = arith.constant 0 : i32
    %c0_i32_0 = arith.constant 0 : i32
    %c0_i32_1 = arith.constant 0 : i32
    %c0_i32_2 = arith.constant 0 : i32
    return %c0_i32, %c0_i32_0, %c0_i32_1 : i32, i32, i32
  }
  func.func @transform_11(%arg0: i32) -> (i32, i32, i32) {
    %c0_i32 = arith.constant 0 : i32
    %c0_i32_0 = arith.constant 0 : i32
    %c0_i32_1 = arith.constant 0 : i32
    %c0_i32_2 = arith.constant 0 : i32
    return %c0_i32, %c0_i32_0, %c0_i32_1 : i32, i32, i32
  }
  func.func @transform_12(%arg0: i32) -> (i32, i32, i32) {
    %c0_i32 = arith.constant 0 : i32
    %c0_i32_0 = arith.constant 0 : i32
    %c0_i32_1 = arith.constant 0 : i32
    %c0_i32_2 = arith.constant 0 : i32
    return %c0_i32, %c0_i32_0, %c0_i32_1 : i32, i32, i32
  }
  func.func @transform_13(%arg0: i32) -> (i32, i32) {
    %c0_i32 = arith.constant 0 : i32
    %c0_i32_0 = arith.constant 0 : i32
    %c0_i32_1 = arith.constant 0 : i32
    return %c0_i32, %c0_i32_0 : i32, i32
  }
  func.func @transform_14(%arg0: i32) -> (i32, i32) {
    %c0_i32 = arith.constant 0 : i32
    %c0_i32_0 = arith.constant 0 : i32
    %c0_i32_1 = arith.constant 0 : i32
    return %c0_i32, %c0_i32_0 : i32, i32
  }
  func.func @transform_15(%arg0: i32) -> (i32, i32) {
    %c0_i32 = arith.constant 0 : i32
    %c0_i32_0 = arith.constant 0 : i32
    %c0_i32_1 = arith.constant 0 : i32
    return %c0_i32, %c0_i32_0 : i32, i32
  }
  func.func @transform_16(%arg0: i32) -> (i32, i32) {
    %c0_i32 = arith.constant 0 : i32
    %c0_i32_0 = arith.constant 0 : i32
    %c0_i32_1 = arith.constant 0 : i32
    return %c0_i32, %c0_i32_0 : i32, i32
  }
  func.func @transform_17(%arg0: i32) -> (i32, i32) {
    %c0_i32 = arith.constant 0 : i32
    %c0_i32_0 = arith.constant 0 : i32
    %c0_i32_1 = arith.constant 0 : i32
    return %c0_i32, %c0_i32_0 : i32, i32
  }
  func.func @transform_18(%arg0: i32) -> (i32, i32) {
    %c0_i32 = arith.constant 0 : i32
    %c0_i32_0 = arith.constant 0 : i32
    %c0_i32_1 = arith.constant 0 : i32
    return %c0_i32, %c0_i32_0 : i32, i32
  }
  func.func @transform_19(%arg0: i32) -> (i32, i32) {
    %c0_i32 = arith.constant 0 : i32
    %c0_i32_0 = arith.constant 0 : i32
    %c0_i32_1 = arith.constant 0 : i32
    return %c0_i32, %c0_i32_0 : i32, i32
  }
  func.func @transform_20(%arg0: i32) -> (i32, i32) {
    %c0_i32 = arith.constant 0 : i32
    %c0_i32_0 = arith.constant 0 : i32
    %c0_i32_1 = arith.constant 0 : i32
    return %c0_i32, %c0_i32_0 : i32, i32
  }
  func.func @transform_21(%arg0: i32) -> (i32, i32) {
    %c0_i32 = arith.constant 0 : i32
    %c0_i32_0 = arith.constant 0 : i32
    %c0_i32_1 = arith.constant 0 : i32
    return %c0_i32, %c0_i32_0 : i32, i32
  }
  func.func @transform_22(%arg0: i32) -> (i32, i32) {
    %c0_i32 = arith.constant 0 : i32
    %c0_i32_0 = arith.constant 0 : i32
    %c0_i32_1 = arith.constant 0 : i32
    return %c0_i32, %c0_i32_0 : i32, i32
  }
}

</mosaic_0001>

<bundles_post_ra>
// kernel: albert_forward.1
= control target key start
LH: loop header
LB: loop body
LE: loop exit
PB: predicated region body
PF: predicated region fallthrough
CT: control target
= control target key end

     0   :  { %vm78_vm0 = vcmask 261120   ;;  %v4709_v15 = vmov 0.0   ;;  %vm4710_vm1 = vmmov 0   ;;  %vm230_vm2 = vcmask 523264   ;;  %s5861_s0 = inlined_call_operand.vmem [shape: f32[16,32], index: 0, kind: input, shape index: {}]   ;;  %s5862_s4 = inlined_call_operand.vmem [shape: bf16[32,64], index: 4, kind: input, shape index: {}]   ;;  %s5863_s6 = inlined_call_operand.vmem [shape: bf16[4,64,16], index: 6, kind: input, shape index: {}]   ;;  %s5864_s7 = inlined_call_operand.vmem [shape: bf16[4,64,16], index: 7, kind: input, shape index: {}]   ;;  %s5865_s2 = inlined_call_operand.vmem [shape: f32[1,32], index: 2, kind: input, shape index: {}]   ;;  %s5866_s3 = inlined_call_operand.vmem [shape: f32[1,32], index: 3, kind: input, shape index: {}]   ;;  %s5867_s8 = inlined_call_operand.vmem [shape: bf16[4,64,16], index: 8, kind: input, shape index: {}]   ;;  %s5868_s5 = inlined_call_operand.vmem [shape: f32[1,64], index: 5, kind: input, shape index: {}]   ;;  %s5869_s9 = inlined_call_operand.vmem [shape: f32[4,1,16], index: 9, kind: input, shape index: {}]   ;;  %s5870_s10 = inlined_call_operand.vmem [shape: f32[4,1,16], index: 10, kind: input, shape index: {}]   ;;  %s5871_s11 = inlined_call_operand.vmem [shape: f32[4,1,16], index: 11, kind: input, shape index: {}]   ;;  %s5872_s1 = inlined_call_operand.vmem [shape: f32[16,16], index: 1, kind: input, shape index: {}]   ;;  %s5873_s12 = inlined_call_operand.vmem [shape: bf16[4,16,64], index: 12, kind: input, shape index: {}]   ;;  %s5874_s13 = inlined_call_operand.vmem [shape: f32[1,64], index: 13, kind: input, shape index: {}]   ;;  %s5875_s16 = inlined_call_operand.vmem [shape: bf16[64,128], index: 16, kind: input, shape index: {}]   ;;  %s5876_s14 = inlined_call_operand.vmem [shape: f32[1,64], index: 14, kind: input, shape index: {}]   ;;  %s5877_s15 = inlined_call_operand.vmem [shape: f32[1,64], index: 15, kind: input, shape index: {}]   ;;  %s5878_s18 = inlined_call_operand.vmem [shape: bf16[128,64], index: 18, kind: input, shape index: {}]   ;;  %s5879_s17 = inlined_call_operand.vmem [shape: f32[1,128], index: 17, kind: input, shape index: {}]   ;;  %s5880_s19 = inlined_call_operand.vmem [shape: f32[1,64], index: 19, kind: input, shape index: {}]   ;;  %s5881_s20 = inlined_call_operand.vmem [shape: f32[1,64], index: 20, kind: input, shape index: {}]   ;;  %s5882_s21 = inlined_call_operand.vmem [shape: f32[1,64], index: 21, kind: input, shape index: {}]   ;;  %s5883_s22 = inlined_call_operand.vmem [shape: f32[16,64], index: 22, kind: output, shape index: {}]  }
   0x1   :  { %5889 = sst [smem:[#allocation2_spill]] %s5861_s0  ;;  %3960 = vmatprep.subr.bf16.mxu1 %v4709_v15  ;;  %3980 = vmatprep.subr.bf16.mxu0 %v4709_v15  ;;  %v3537_v42 = vld [vmem:[%s5868_s5] ss:$0 sm:$0xff]  ;;  %vm437_vm3 = vcmask 130048  }
   0x2   :  { %5890 = sst [smem:[#allocation3_spill]] %s5862_s4  ;;  %s5896_s29 = sld [smem:[#allocation2_spill]]  ;;  %3964 = vmatprep.mubr.msk.bf16.mxu1 %vm4710_vm1, %v4709_v15  ;;  %3988 = vmatprep.mubr.msk.bf16.mxu0 %vm4710_vm1, %v4709_v15  ;;  %v3541_v62 = vld [vmem:[%s5869_s9] ss:$0 sm:$0xff] }
   0x3   :  { %5891 = sst [smem:[#allocation4_spill]] %s5863_s6  ;;  %s5897_s23 = sld [smem:[#allocation3_spill]] }
   0x4   :  { %5892 = sst [smem:[#allocation5_spill]] %s5864_s7  ;;  %s5901_s4 = sld [smem:[#allocation4_spill]] }
   0x5   :  { %5893 = sst [smem:[#allocation6_spill]] %s5865_s2  ;;  %s5898_s26 = sld [smem:[#allocation5_spill]] }
   0x6   :  { %5894 = sst [smem:[#allocation7_spill]] %s5866_s3 }
   0x7   :  { %5895 = sst [smem:[#allocation8_spill]] %s5867_s8  ;;  %s5900_s0 = sld [smem:[#allocation7_spill]] }
   0x8   :  { %v74_v0 = vld [vmem:[%s5896_s29] sm:$0xff]  ;;  %v75_v1 = vld [vmem:[%s5896_s29 + $0x8] sm:$0xff]  ;;  %s5899_s29 = sld [smem:[#allocation6_spill]]  ;;  %s5902_s8 = sld [smem:[#allocation8_spill]] }
   0x9   :  { %v79_v2 = vsel %vm78_vm0, %v74_v0, 0.0  ;;  %v82_v3 = vsel %vm78_vm0, %v75_v1, 0.0  ;;  %v4466_v14 = vld [vmem:[%s5897_s23] sm:$0xff]   ;;  %v4467_v16 = vld [vmem:[%s5897_s23 + $0x8] sm:$0xff]  }
   0xa   :  { %80 = vadd.xlane.f32.xlu0 %v79_v2  ;;  %3961 = vmatpush3.bf16.msra.mxu1 %v4466_v14  ;;  %v4468_v35 = vld [vmem:[%s5901_s4] sm:$0xff]   ;;  %v4470_v37 = vld [vmem:[%s5901_s4 + $0x8] sm:$0xff]   ;;  %v4472_v38 = vld [vmem:[%s5901_s4 + $0x10] sm:$0xff]  }
   0xb   :  { %3962 = vmatprep.subr.bf16.mxu1 %v4709_v15  ;;  %v4469_v17 = vld [vmem:[%s5898_s26] sm:$0xff]   ;;  %v4471_v18 = vld [vmem:[%s5898_s26 + $0x8] sm:$0xff]   ;;  %v4473_v39 = vld [vmem:[%s5898_s26 + $0x10] sm:$0xff]  }
   0xc   :  { %3981 = vmatpush3.bf16.msra.mxu0 %v4469_v17  ;;  %v4474_v40 = vld [vmem:[%s5901_s4 + $0x18] sm:$0xff]   ;;  %v4480_v54 = vld [vmem:[%s5901_s4 + $0x20] sm:$0xff]   ;;  %v4481_v55 = vld [vmem:[%s5901_s4 + $0x28] sm:$0xff]  }
   0xd   :  { %3982 = vmatprep.subr.bf16.mxu0 %v4709_v15  ;;  %v3536_v31 = vld [vmem:[%s5900_s0] ss:$0 sm:$0xff]  ;;  %v4475_v41 = vld [vmem:[%s5898_s26 + $0x18] sm:$0xff]   ;;  %v4482_v56 = vld [vmem:[%s5901_s4 + $0x30] sm:$0xff]  }
   0xe   :  { %83 = vadd.xlane.f32.xlu0 %v82_v3  ;;  %3963 = vmatpush3.bf16.msra.mxu1 %v4467_v16  ;;  %v3535_v27 = vld [vmem:[%s5899_s29] ss:$0 sm:$0xff]  ;;  %v4477_v51 = vld [vmem:[%s5902_s8 + $0x8] sm:$0xff]   ;;  %v4478_v52 = vld [vmem:[%s5902_s8 + $0x10] sm:$0xff]  }
   0xf   :  { %3968 = vmatprep.subr.bf16.mxu1 %v4709_v15  ;;  %v4476_v49 = vld [vmem:[%s5902_s8] sm:$0xff]   ;;  %v4479_v53 = vld [vmem:[%s5902_s8 + $0x18] sm:$0xff]   ;;  %v4485_v59 = vld [vmem:[%s5902_s8 + $0x28] sm:$0xff]  }
  0x10   :  { %3983 = vmatpush3.bf16.msra.mxu0 %v4471_v18  ;;  %v4483_v57 = vld [vmem:[%s5901_s4 + $0x38] sm:$0xff]   ;;  %v4484_v58 = vld [vmem:[%s5902_s8 + $0x20] sm:$0xff]   ;;  %v4486_v60 = vld [vmem:[%s5902_s8 + $0x30] sm:$0xff]  }
  0x11   :  { %3984 = vmatprep.subr.bf16.mxu0 %v4709_v15  ;;  %v4487_v61 = vld [vmem:[%s5902_s8 + $0x38] sm:$0xff]   ;;  %v3553_v16 = vld [vmem:[%s5871_s11] ss:$0 sm:$0xff] }
  0x14   :  { %3985 = vmatpush3.bf16.msra.mxu0 %v4473_v39 }
  0x15   :  { %3986 = vmatprep.subr.bf16.mxu0 %v4709_v15 }
  0x18   :  { %3987 = vmatpush3.bf16.msra.mxu0 %v4475_v41  ;;  %v5006_v41 = vld [vmem:[%s5872_s1] sm:$0xff] }
  0x19   :  { %4004 = vmatprep.subr.bf16.mxu0 %v4709_v15 }
  0x97   :  { %v81_v4 = vpop.xlane.xlu0 %80 }
  0x98   :  { %v86_v5 = vmul.f32 0.03125, %v81_v4 }
  0x9a   :  { %v88_v6 = vsub.f32 %v74_v0, %v86_v5  ;;  %v3547_v0 = vld [vmem:[%s5870_s10] ss:$0 sm:$0xff] }
  0x9b   :  { %v84_v7 = vpop.xlane.xlu0 %83 }
  0x9c   :  { %v87_v8 = vmul.f32 0.03125, %v84_v7  ;;  %v90_v9 = vmul.f32 %v88_v6, %v88_v6 }
  0x9e   :  { %v89_v10 = vsub.f32 %v75_v1, %v87_v8  ;;  %v92_v11 = vsel %vm78_vm0, %v90_v9, 0.0 }
  0x9f   :  { %93 = vadd.xlane.f32.xlu1 %v92_v11 }
  0xa0   :  { %v91_v12 = vmul.f32 %v89_v10, %v89_v10 }
  0xa2   :  { %v95_v13 = vsel %vm78_vm0, %v91_v12, 0.0 }
  0xa3   :  { %96 = vadd.xlane.f32.xlu1 %v95_v13 }
 0x12c   :  { %v94_v19 = vpop.xlane.xlu1 %93 }
 0x12d   :  { %v98_v20 = vmul.f32 0.03125, %v94_v19 }
 0x12f   :  { %v100_v21 = vadd.f32 1e-12, %v98_v20 }
 0x130   :  { %v97_v22 = vpop.xlane.xlu1 %96 }
 0x131   :  { %4532 = vrsqrt.f32 %v100_v21  ;;  %v99_v23 = vmul.f32 0.03125, %v97_v22 }
 0x133   :  { %v101_v24 = vadd.f32 1e-12, %v99_v23 }
 0x135   :  { %4534 = vrsqrt.f32 %v101_v24  ;;  %v3570_v24 = vld [vmem:[%s5869_s9 + $0x1] ss:$0 sm:$0xff] }
 0x13b   :  { %v4533_v25 = vpop.eup %4532 }
 0x13c   :  { %v104_v26 = vmul.f32 %v4533_v25, %v88_v6 }
 0x13e   :  { %v112_v30 = vmul.f32 %v3535_v27, %v104_v26 }
 0x13f   :  { %v4535_v28 = vpop.eup %4534 }
 0x140   :  { %v105_v29 = vmul.f32 %v4535_v28, %v89_v10  ;;  %v120_v33 = vadd.f32 %v3536_v31, %v112_v30 }
 0x142   :  { %v113_v32 = vmul.f32 %v3535_v27, %v105_v29 }
 0x144   :  { %v121_v34 = vadd.f32 %v3536_v31, %v113_v32  ;;  %v3600_v32 = vld [vmem:[%s5871_s11 + $0x1] ss:$0 sm:$0xff] }
 0x146   :  { %v126_v36 = vpack.c.bf16 %v121_v34, %v120_v33 }
 0x148   :  { %3965 = vmatmul.mubr.msk.bf16.vlgmr.msra.gmra.mrb[0].mxu1 %vm78_vm0, %v126_v36 }
 0x149   :  { %3969 = vmatpush3.bf16.msra.mxu1 %v4468_v35  ;;  %3976 = vmatprep.mubr.msk.bf16.mxu1 %vm4710_vm1, %v4709_v15 }
 0x14a   :  { %3970 = vmatprep.subr.bf16.mxu1 %v4709_v15 }
 0x14d   :  { %3971 = vmatpush3.bf16.msra.mxu1 %v4470_v37 }
 0x14e   :  { %3972 = vmatprep.subr.bf16.mxu1 %v4709_v15 }
 0x151   :  { %3973 = vmatpush3.bf16.msra.mxu1 %v4472_v38 }
 0x152   :  { %3974 = vmatprep.subr.bf16.mxu1 %v4709_v15 }
 0x155   :  { %3975 = vmatpush3.bf16.msra.mxu1 %v4474_v40 }
 0x156   :  { %3992 = vmatprep.subr.bf16.mxu1 %v4709_v15 }
 0x21b   :  { %v183_v43 = vpop.f32.mrb[0].mxu1 }
 0x21c   :  { %v3966_v44 = vpop.f32.mrb[1].mxu1  ;;  %v4894_v46 = vadd.f32 %v3537_v42, %v183_v43 }
 0x21d   :  { %v186_v45 = vpop.f32.mrb[2].mxu1 }
 0x21e   :  { %v4896_v47 = vadd.f32 %v3537_v42, %v186_v45  ;;  %v3967_v48 = vpop.f32.mrb[3].mxu1  ;;  %v5011_v45 = vld [vmem:[%s5872_s1 + $0x8] sm:$0xff] }
 0x220   :  { %v4903_v50 = vpack.c.bf16 %v4896_v47, %v4894_v46 }
 0x222   :  { %3977 = vmatmul.mubr.msk.bf16.vlgmr.msra.gmra.mrb[4].mxu1 %vm230_vm2, %v4903_v50  ;;  %3989 = vmatmul.mubr.msk.bf16.vlgmr.msra.gmra.mrb[0].mxu0 %vm230_vm2, %v4903_v50 }
 0x223   :  { %3993 = vmatpush3.bf16.msra.mxu1 %v4476_v49  ;;  %4000 = vmatprep.mubr.msk.bf16.mxu1 %vm4710_vm1, %v4709_v15 }
 0x224   :  { %3994 = vmatprep.subr.bf16.mxu1 %v4709_v15  ;;  %4006 = vmatprep.mubr.msk.bf16.mxu0 %vm4710_vm1, %v4709_v15 }
 0x227   :  { %3995 = vmatpush3.bf16.msra.mxu1 %v4477_v51 }
 0x228   :  { %3996 = vmatprep.subr.bf16.mxu1 %v4709_v15 }
 0x22b   :  { %3997 = vmatpush3.bf16.msra.mxu1 %v4478_v52 }
 0x22c   :  { %3998 = vmatprep.subr.bf16.mxu1 %v4709_v15 }
 0x22f   :  { %3999 = vmatpush3.bf16.msra.mxu1 %v4479_v53 }
 0x230   :  { %4016 = vmatprep.subr.bf16.mxu1 %v4709_v15 }
 0x232   :  { %4001 = vmatmul.mubr.msk.bf16.vlgmr.msra.gmra.mrb[8].mxu1 %vm230_vm2, %v4903_v50 }
 0x233   :  { %4017 = vmatpush3.bf16.msra.mxu1 %v4480_v54  ;;  %4024 = vmatprep.mubr.msk.bf16.mxu1 %vm4710_vm1, %v4709_v15 }
 0x234   :  { %4018 = vmatprep.subr.bf16.mxu1 %v4709_v15 }
 0x237   :  { %4019 = vmatpush3.bf16.msra.mxu1 %v4481_v55 }
 0x238   :  { %4020 = vmatprep.subr.bf16.mxu1 %v4709_v15 }
 0x23b   :  { %4021 = vmatpush3.bf16.msra.mxu1 %v4482_v56 }
 0x23c   :  { %4022 = vmatprep.subr.bf16.mxu1 %v4709_v15 }
 0x23f   :  { %4023 = vmatpush3.bf16.msra.mxu1 %v4483_v57 }
 0x240   :  { %4040 = vmatprep.subr.bf16.mxu1 %v4709_v15 }
 0x242   :  { %4025 = vmatmul.mubr.msk.bf16.vlgmr.msra.gmra.mrb[12].mxu1 %vm230_vm2, %v4903_v50 }
 0x243   :  { %4041 = vmatpush3.bf16.msra.mxu1 %v4484_v58  ;;  %4048 = vmatprep.mubr.msk.bf16.mxu1 %vm4710_vm1, %v4709_v15 }
 0x244   :  { %4042 = vmatprep.subr.bf16.mxu1 %v4709_v15 }
 0x247   :  { %4043 = vmatpush3.bf16.msra.mxu1 %v4485_v59 }
 0x248   :  { %4044 = vmatprep.subr.bf16.mxu1 %v4709_v15 }
 0x24b   :  { %4045 = vmatpush3.bf16.msra.mxu1 %v4486_v60 }
 0x24c   :  { %4046 = vmatprep.subr.bf16.mxu1 %v4709_v15 }
 0x24f   :  { %4047 = vmatpush3.bf16.msra.mxu1 %v4487_v61 }
 0x250   :  { %4064 = vmatprep.subr.bf16.mxu1 %v4709_v15 }
 0x252   :  { %4049 = vmatmul.mubr.msk.bf16.vlgmr.msra.gmra.mrb[16].mxu1 %vm230_vm2, %v4903_v50 }
 0x253   :  { %4066 = vmatprep.mubr.msk.bf16.mxu1 %vm4710_vm1, %v4709_v15 }
 0x2f5   :  { %v268_v63 = vpop.f32.mrb[4].mxu1  ;;  %v348_v1 = vpop.f32.mrb[0].mxu0 }
 0x2f6   :  { %v3978_v2 = vpop.f32.mrb[5].mxu1  ;;  %v3990_v3 = vpop.f32.mrb[1].mxu0  ;;  %v269_v6 = vadd.f32 %v3541_v62, %v268_v63  ;;  %v349_v7 = vadd.f32 %v3547_v0, %v348_v1 }
 0x2f7   :  { %v271_v4 = vpop.f32.mrb[6].mxu1  ;;  %v351_v5 = vpop.f32.mrb[2].mxu0 }
 0x2f8   :  { %v272_v8 = vadd.f32 %v3541_v62, %v271_v4  ;;  %v352_v9 = vadd.f32 %v3547_v0, %v351_v5  ;;  %v3979_v10 = vpop.f32.mrb[7].mxu1  ;;  %v3991_v11 = vpop.f32.mrb[3].mxu0 }
 0x2f9   :  { %v4490_v10 = vld [vmem:[%s5898_s26 + $0x30] sm:$0xff]   ;;  %v4491_v11 = vld [vmem:[%s5898_s26 + $0x38] sm:$0xff]  }
 0x2fa   :  { %v435_v12 = vpack.c.bf16 %v272_v8, %v269_v6  ;;  %v436_v13 = vpack.c.bf16 %v352_v9, %v349_v7  ;;  %v4488_v7 = vld [vmem:[%s5898_s26 + $0x20] sm:$0xff]   ;;  %v4489_v9 = vld [vmem:[%s5898_s26 + $0x28] sm:$0xff]  }
 0x2fc   :  { %v442_v14 = vsel %vm437_vm3, %v436_v13, 0 }
 0x2fd   :  { %4005 = vmatpush3.bf16.xpose.msra.mxu0 %v442_v14 }
 0x2fe   :  { %4010 = vmatprep.subr.bf16.mxu0 %v4709_v15 }
 0x304   :  { %4007 = vmatmul.mubr.msk.bf16.vlgmr.msra.gmra.mrb[4].mxu0 %vm437_vm3, %v435_v12 }
 0x305   :  { %v428_v17 = vpop.f32.mrb[8].mxu1  ;;  %4012 = vmatprep.mubr.msk.bf16.mxu0 %vm4710_vm1, %v4709_v15 }
 0x306   :  { %v4002_v18 = vpop.f32.mrb[9].mxu1  ;;  %v429_v20 = vadd.f32 %v3553_v16, %v428_v17 }
 0x307   :  { %v431_v19 = vpop.f32.mrb[10].mxu1  ;;  %v3585_v18 = vld [vmem:[%s5870_s10 + $0x1] ss:$0 sm:$0xff] }
 0x308   :  { %v432_v21 = vadd.f32 %v3553_v16, %v431_v19  ;;  %v4003_v22 = vpop.f32.mrb[11].mxu1 }
 0x30a   :  { %v512_v23 = vpack.c.bf16 %v432_v21, %v429_v20 }
 0x30c   :  { %4011 = vmatpush3.bf16.msra.mxu0 %v512_v23 }
 0x30d   :  { %4028 = vmatprep.subr.bf16.mxu0 %v4709_v15 }
 0x315   :  { %v635_v25 = vpop.f32.mrb[12].mxu1 }
 0x316   :  { %v4026_v26 = vpop.f32.mrb[13].mxu1  ;;  %v4988_v28 = vadd.f32 %v3570_v24, %v635_v25 }
 0x317   :  { %v638_v27 = vpop.f32.mrb[14].mxu1 }
 0x318   :  { %v4990_v29 = vadd.f32 %v3570_v24, %v638_v27  ;;  %v4027_v30 = vpop.f32.mrb[15].mxu1 }
 0x31a   :  { %v806_v31 = vpack.c.bf16 %v4990_v29, %v4988_v28 }
 0x325   :  { %v799_v33 = vpop.f32.mrb[16].mxu1 }
 0x326   :  { %v4050_v34 = vpop.f32.mrb[17].mxu1  ;;  %v4997_v36 = vadd.f32 %v3600_v32, %v799_v33 }
 0x327   :  { %v802_v35 = vpop.f32.mrb[18].mxu1 }
 0x328   :  { %v4999_v37 = vadd.f32 %v3600_v32, %v802_v35  ;;  %v4051_v38 = vpop.f32.mrb[19].mxu1 }
 0x32a   :  { %v882_v39 = vpack.c.bf16 %v4999_v37, %v4997_v36 }
 0x3d7   :  { %v478_v40 = vpop.f32.mrb[4].mxu0 }
 0x3d8   :  { %v485_v42 = vmul.f32 0.25, %v478_v40  ;;  %v4008_v43 = vpop.f32.mrb[5].mxu0 }
 0x3d9   :  { %v481_v44 = vpop.f32.mrb[6].mxu0 }
 0x3da   :  { %v486_v48 = vmul.f32 0.25, %v481_v44  ;;  %v4009_v49 = vpop.f32.mrb[7].mxu0  ;;  %v487_v51 = vadd.f32 %v485_v42, %v5006_v41 }
 0x3dc   :  { %v489_v52 = vsel %vm437_vm3, %v487_v51, -inf  ;;  %v488_v53 = vadd.f32 %v486_v48, %v5011_v45 }
 0x3dd   :  { %490 = vmax.xlane.f32.xlu0 %v489_v52  ;;  %v4497_v52 = vld [vmem:[%s5873_s12 + $0x8] sm:$0xff]  }
 0x3de   :  { %v492_v54 = vsel %vm437_vm3, %v488_v53, -inf  ;;  %4065 = vmatpush3.bf16.msra.mxu1 %v4497_v52 }
 0x3df   :  { %493 = vmax.xlane.f32.xlu1 %v492_v54  ;;  %4076 = vmatprep.subr.bf16.mxu1 %v4709_v15 }
 0x46a   :  { %v491_v55 = vpop.xlane.xlu0 %490 }
 0x46b   :  { %v495_v56 = vsub.f32 %v487_v51, %v491_v55 }
 0x46c   :  { %v494_v57 = vpop.xlane.xlu1 %493 }
 0x46d   :  { %v497_v58 = vmul.f32 1.442695, %v495_v56  ;;  %v496_v59 = vsub.f32 %v488_v53, %v494_v57 }
 0x46f   :  { %4536 = vpow2.f32 %v497_v58  ;;  %v499_v60 = vmul.f32 1.442695, %v496_v59  ;;  %v4492_v59 = vld [vmem:[%s5873_s12] sm:$0xff]  }
 0x471   :  { %4538 = vpow2.f32 %v499_v60 }
 0x479   :  { %v4537_v61 = vpop.eup %4536 }
 0x47a   :  { %v501_v62 = vsel %vm437_vm3, %v4537_v61, 0.0 }
 0x47b   :  { %v4539_v63 = vpop.eup %4538  ;;  %502 = vadd.xlane.f32.xlu0 %v501_v62  ;;  %v4494_v62 = vld [vmem:[%s5898_s26 + $0x48] sm:$0xff]  }
 0x47c   :  { %v504_v0 = vsel %vm437_vm3, %v4539_v63, 0.0 }
 0x47d   :  { %505 = vadd.xlane.f32.xlu1 %v504_v0  ;;  %v4496_v0 = vld [vmem:[%s5898_s26 + $0x58] sm:$0xff]  }
 0x508   :  { %v503_v1 = vpop.xlane.xlu0 %502 }
 0x509   :  { %4540 = vrcp.f32 %v503_v1 }
 0x50a   :  { %v506_v2 = vpop.xlane.xlu1 %505 }
 0x50b   :  { %4542 = vrcp.f32 %v506_v2 }
 0x513   :  { %v4541_v3 = vpop.eup %4540 }
 0x514   :  { %v509_v5 = vmul.f32 %v4541_v3, %v4537_v61  ;;  %v4493_v61 = vld [vmem:[%s5898_s26 + $0x40] sm:$0xff]  }
 0x515   :  { %v4543_v4 = vpop.eup %4542 }
 0x516   :  { %v510_v6 = vmul.f32 %v4543_v4, %v4539_v63  ;;  %v4495_v63 = vld [vmem:[%s5898_s26 + $0x50] sm:$0xff]   ;;  %v4498_v4 = vld [vmem:[%s5901_s4 + $0x40] sm:$0xff]  }
 0x518   :  { %v511_v8 = vpack.c.bf16 %v510_v6, %v509_v5 }
 0x51a   :  { %4013 = vmatmul.mubr.msk.bf16.vlgmr.msra.gmra.mrb[8].mxu0 %vm437_vm3, %v511_v8 }
 0x51b   :  { %4029 = vmatpush3.bf16.msra.mxu0 %v4488_v7  ;;  %4036 = vmatprep.mubr.msk.bf16.mxu0 %vm4710_vm1, %v4709_v15  ;;  %v4499_v7 = vld [vmem:[%s5901_s4 + $0x48] sm:$0xff]  }
 0x51c   :  { %4030 = vmatprep.subr.bf16.mxu0 %v4709_v15 }
 0x51f   :  { %4031 = vmatpush3.bf16.msra.mxu0 %v4489_v9 }
 0x520   :  { %4032 = vmatprep.subr.bf16.mxu0 %v4709_v15 }
 0x523   :  { %4033 = vmatpush3.bf16.msra.mxu0 %v4490_v10 }
 0x524   :  { %4034 = vmatprep.subr.bf16.mxu0 %v4709_v15 }
 0x527   :  { %4035 = vmatpush3.bf16.msra.mxu0 %v4491_v11  ;;  %v4500_v11 = vld [vmem:[%s5901_s4 + $0x50] sm:$0xff]  }
 0x528   :  { %4052 = vmatprep.subr.bf16.mxu0 %v4709_v15 }
 0x52a   :  { %4037 = vmatmul.mubr.msk.bf16.vlgmr.msra.gmra.mrb[12].mxu0 %vm230_vm2, %v4903_v50 }
 0x52b   :  { %4054 = vmatprep.mubr.msk.bf16.mxu0 %vm4710_vm1, %v4709_v15 }
 0x5ed   :  { %v5042_v12 = vpop.f32.mrb[8].mxu0 }
 0x5ee   :  { %v4014_v13 = vpop.f32.mrb[9].mxu0 }
 0x5ef   :  { %v5044_v14 = vpop.f32.mrb[10].mxu0  ;;  %v4501_v13 = vld [vmem:[%s5901_s4 + $0x58] sm:$0xff]  }
 0x5f0   :  { %v559_v16 = vpack.c.bf16 %v5044_v14, %v5042_v12  ;;  %v4015_v17 = vpop.f32.mrb[11].mxu0  ;;  %v4502_v14 = vld [vmem:[%s5902_s8 + $0x40] sm:$0xff]  }
 0x5f1   :  { %v3638_v17 = vld [vmem:[%s5870_s10 + $0x2] ss:$0 sm:$0xff] }
 0x5fd   :  { %v717_v19 = vpop.f32.mrb[12].mxu0 }
 0x5fe   :  { %v4038_v20 = vpop.f32.mrb[13].mxu0  ;;  %v718_v22 = vadd.f32 %v3585_v18, %v717_v19 }
 0x5ff   :  { %v720_v21 = vpop.f32.mrb[14].mxu0 }
 0x600   :  { %v721_v23 = vadd.f32 %v3585_v18, %v720_v21  ;;  %v4039_v24 = vpop.f32.mrb[15].mxu0  ;;  %v4504_v21 = vld [vmem:[%s5902_s8 + $0x50] sm:$0xff]  }
 0x602   :  { %v807_v25 = vpack.c.bf16 %v721_v23, %v718_v22 }
 0x604   :  { %v812_v26 = vsel %vm437_vm3, %v807_v25, 0 }
 0x605   :  { %4053 = vmatpush3.bf16.xpose.msra.mxu0 %v812_v26  ;;  %v4505_v26 = vld [vmem:[%s5902_s8 + $0x58] sm:$0xff]  }
 0x606   :  { %4058 = vmatprep.subr.bf16.mxu0 %v4709_v15 }
 0x60c   :  { %4055 = vmatmul.mubr.msk.bf16.vlgmr.msra.gmra.mrb[16].mxu0 %vm437_vm3, %v806_v31 }
 0x60d   :  { %4059 = vmatpush3.bf16.msra.mxu0 %v882_v39  ;;  %4060 = vmatprep.mubr.msk.bf16.mxu0 %vm4710_vm1, %v4709_v15 }
 0x60e   :  { %4070 = vmatprep.subr.bf16.mxu0 %v4709_v15 }
 0x6df   :  { %v848_v27 = vpop.f32.mrb[16].mxu0 }
 0x6e0   :  { %v855_v30 = vmul.f32 0.25, %v848_v27  ;;  %v4056_v32 = vpop.f32.mrb[17].mxu0 }
 0x6e1   :  { %v851_v33 = vpop.f32.mrb[18].mxu0 }
 0x6e2   :  { %v856_v34 = vmul.f32 0.25, %v851_v33  ;;  %v4057_v35 = vpop.f32.mrb[19].mxu0  ;;  %v857_v38 = vadd.f32 %v855_v30, %v5006_v41 }
 0x6e4   :  { %v859_v28 = vsel %vm437_vm3, %v857_v38, -inf  ;;  %v858_v29 = vadd.f32 %v856_v34, %v5011_v45 }
 0x6e5   :  { %860 = vmax.xlane.f32.xlu0 %v859_v28  ;;  %v3623_v28 = vld [vmem:[%s5869_s9 + $0x2] ss:$0 sm:$0xff] }
 0x6e6   :  { %v862_v31 = vsel %vm437_vm3, %v858_v29, -inf }
 0x6e7   :  { %863 = vmax.xlane.f32.xlu1 %v862_v31 }
 0x772   :  { %v861_v36 = vpop.xlane.xlu0 %860 }
 0x773   :  { %v865_v37 = vsub.f32 %v857_v38, %v861_v36 }
 0x774   :  { %v864_v39 = vpop.xlane.xlu1 %863 }
 0x775   :  { %v867_v40 = vmul.f32 1.442695, %v865_v37  ;;  %v866_v42 = vsub.f32 %v858_v29, %v864_v39 }
 0x777   :  { %4544 = vpow2.f32 %v867_v40  ;;  %v869_v43 = vmul.f32 1.442695, %v866_v42 }
 0x779   :  { %4546 = vpow2.f32 %v869_v43  ;;  %v3653_v43 = vld [vmem:[%s5871_s11 + $0x2] ss:$0 sm:$0xff] }
 0x781   :  { %v4545_v44 = vpop.eup %4544 }
 0x782   :  { %v871_v48 = vsel %vm437_vm3, %v4545_v44, 0.0 }
 0x783   :  { %v4547_v49 = vpop.eup %4546  ;;  %872 = vadd.xlane.f32.xlu0 %v871_v48 }
 0x784   :  { %v874_v51 = vsel %vm437_vm3, %v4547_v49, 0.0 }
 0x785   :  { %875 = vadd.xlane.f32.xlu1 %v874_v51 }
 0x810   :  { %v873_v53 = vpop.xlane.xlu0 %872 }
 0x811   :  { %4548 = vrcp.f32 %v873_v53 }
 0x812   :  { %v876_v54 = vpop.xlane.xlu1 %875 }
 0x813   :  { %4550 = vrcp.f32 %v876_v54 }
 0x81b   :  { %v4549_v55 = vpop.eup %4548 }
 0x81c   :  { %v879_v57 = vmul.f32 %v4549_v55, %v4545_v44 }
 0x81d   :  { %v4551_v56 = vpop.eup %4550 }
 0x81e   :  { %v880_v58 = vmul.f32 %v4551_v56, %v4547_v49 }
 0x820   :  { %v881_v60 = vpack.c.bf16 %v880_v58, %v879_v57 }
 0x822   :  { %4061 = vmatmul.mubr.msk.bf16.vlgmr.msra.gmra.mrb[20].mxu0 %vm437_vm3, %v881_v60 }
 0x823   :  { %4071 = vmatpush3.bf16.msra.mxu0 %v4492_v59  ;;  %4072 = vmatprep.mubr.msk.bf16.mxu0 %vm4710_vm1, %v4709_v15 }
 0x824   :  { %4088 = vmatprep.subr.bf16.mxu0 %v4709_v15 }
 0x82a   :  { %4073 = vmatmul.mubr.msk.bf16.vlgmr.msra.gmra.mrb[24].mxu0 %vm437_vm3, %v559_v16  ;;  %v4503_v16 = vld [vmem:[%s5902_s8 + $0x48] sm:$0xff]  }
 0x82b   :  { %4089 = vmatpush3.bf16.msra.mxu0 %v4493_v61  ;;  %4096 = vmatprep.mubr.msk.bf16.mxu0 %vm4710_vm1, %v4709_v15 }
 0x82c   :  { %4090 = vmatprep.subr.bf16.mxu0 %v4709_v15 }
 0x82f   :  { %4091 = vmatpush3.bf16.msra.mxu0 %v4494_v62 }
 0x830   :  { %4092 = vmatprep.subr.bf16.mxu0 %v4709_v15 }
 0x833   :  { %4093 = vmatpush3.bf16.msra.mxu0 %v4495_v63 }
 0x834   :  { %4094 = vmatprep.subr.bf16.mxu0 %v4709_v15 }
 0x837   :  { %4095 = vmatpush3.bf16.msra.mxu0 %v4496_v0 }
 0x838   :  { %4112 = vmatprep.subr.bf16.mxu0 %v4709_v15 }
 0x83a   :  { %4097 = vmatmul.mubr.msk.bf16.vlgmr.msra.gmra.mrb[28].mxu0 %vm230_vm2, %v4903_v50 }
 0x83b   :  { %4114 = vmatprep.mubr.msk.bf16.mxu0 %vm4710_vm1, %v4709_v15 }
 0x8f5   :  { %v920_v1 = vpop.f32.mrb[20].mxu0 }
 0x8f6   :  { %v4062_v2 = vpop.f32.mrb[21].mxu0 }
 0x8f7   :  { %v923_v3 = vpop.f32.mrb[22].mxu0 }
 0x8f8   :  { %v930_v5 = vpack.c.bf16 %v923_v3, %v920_v1  ;;  %v4063_v6 = vpop.f32.mrb[23].mxu0 }
 0x8fa   :  { %4067 = vmatmul.mubr.msk.bf16.vlgmr.msra.gmra.mrb[20].mxu1 %vm437_vm3, %v930_v5 }
 0x8fb   :  { %4077 = vmatpush3.bf16.msra.mxu1 %v4498_v4  ;;  %4084 = vmatprep.mubr.msk.bf16.mxu1 %vm4710_vm1, %v4709_v15 }
 0x8fc   :  { %4078 = vmatprep.subr.bf16.mxu1 %v4709_v15 }
 0x8fd   :  { %v1024_v8 = vpop.f32.mrb[24].mxu0 }
 0x8fe   :  { %v4074_v9 = vpop.f32.mrb[25].mxu0 }
 0x8ff   :  { %4079 = vmatpush3.bf16.msra.mxu1 %v4499_v7  ;;  %v1027_v10 = vpop.f32.mrb[26].mxu0 }
 0x900   :  { %v4075_v12 = vpop.f32.mrb[27].mxu0  ;;  %4080 = vmatprep.subr.bf16.mxu1 %v4709_v15 }
 0x903   :  { %4081 = vmatpush3.bf16.msra.mxu1 %v4500_v11  ;;  %v4514_v11 = vld [vmem:[%s5873_s12 + $0x10] sm:$0xff]  }
 0x904   :  { %4082 = vmatprep.subr.bf16.mxu1 %v4709_v15 }
 0x907   :  { %4083 = vmatpush3.bf16.msra.mxu1 %v4501_v13 }
 0x908   :  { %4100 = vmatprep.subr.bf16.mxu1 %v4709_v15 }
 0x90a   :  { %4085 = vmatmul.mubr.msk.bf16.vlgmr.msra.gmra.mrb[24].mxu1 %vm230_vm2, %v4903_v50 }
 0x90b   :  { %4101 = vmatpush3.bf16.msra.mxu1 %v4502_v14  ;;  %4108 = vmatprep.mubr.msk.bf16.mxu1 %vm4710_vm1, %v4709_v15 }
 0x90c   :  { %4102 = vmatprep.subr.bf16.mxu1 %v4709_v15 }
 0x90d   :  { %v1188_v18 = vpop.f32.mrb[28].mxu0 }
 0x90e   :  { %v4098_v19 = vpop.f32.mrb[29].mxu0  ;;  %v1189_v22 = vadd.f32 %v3638_v17, %v1188_v18 }
 0x90f   :  { %v1191_v20 = vpop.f32.mrb[30].mxu0  ;;  %4103 = vmatpush3.bf16.msra.mxu1 %v4503_v16  ;;  %v4506_v19 = vld [vmem:[%s5901_s4 + $0x60] sm:$0xff]  }
 0x910   :  { %v1192_v23 = vadd.f32 %v3638_v17, %v1191_v20  ;;  %v4099_v24 = vpop.f32.mrb[31].mxu0  ;;  %4104 = vmatprep.subr.bf16.mxu1 %v4709_v15 }
 0x911   :  { %v4510_v24 = vld [vmem:[%s5902_s8 + $0x60] sm:$0xff]  }
 0x912   :  { %v1278_v25 = vpack.c.bf16 %v1192_v23, %v1189_v22  ;;  %v4508_v22 = vld [vmem:[%s5901_s4 + $0x70] sm:$0xff]   ;;  %v4509_v23 = vld [vmem:[%s5901_s4 + $0x78] sm:$0xff]  }
 0x913   :  { %4105 = vmatpush3.bf16.msra.mxu1 %v4504_v21  ;;  %v4507_v21 = vld [vmem:[%s5901_s4 + $0x68] sm:$0xff]  }
 0x914   :  { %v1283_v27 = vsel %vm437_vm3, %v1278_v25, 0  ;;  %4106 = vmatprep.subr.bf16.mxu1 %v4709_v15  ;;  %v4511_v25 = vld [vmem:[%s5902_s8 + $0x68] sm:$0xff]  }
 0x915   :  { %4113 = vmatpush3.bf16.xpose.msra.mxu0 %v1283_v27  ;;  %v4513_v27 = vld [vmem:[%s5902_s8 + $0x78] sm:$0xff]  }
 0x916   :  { %4118 = vmatprep.subr.bf16.mxu0 %v4709_v15 }
 0x917   :  { %4107 = vmatpush3.bf16.msra.mxu1 %v4505_v26  ;;  %v4512_v26 = vld [vmem:[%s5902_s8 + $0x70] sm:$0xff]  }
 0x918   :  { %4124 = vmatprep.subr.bf16.mxu1 %v4709_v15 }
 0x91a   :  { %4109 = vmatmul.mubr.msk.bf16.vlgmr.msra.gmra.mrb[28].mxu1 %vm230_vm2, %v4903_v50 }
 0x91b   :  { %4126 = vmatprep.mubr.msk.bf16.mxu1 %vm4710_vm1, %v4709_v15  ;;  %4125 = vmatpush3.bf16.msra.mxu1 %v4514_v11 }
 0x91c   :  { %4142 = vmatprep.subr.bf16.mxu1 %v4709_v15 }
 0x9cd   :  { %v974_v30 = vpop.f32.mrb[20].mxu1 }
 0x9ce   :  { %v5151_v32 = vadd.f32 %v1024_v8, %v974_v30  ;;  %v4068_v33 = vpop.f32.mrb[21].mxu1 }
 0x9cf   :  { %v977_v34 = vpop.f32.mrb[22].mxu1 }
 0x9d0   :  { %v5153_v35 = vadd.f32 %v1027_v10, %v977_v34  ;;  %v4069_v38 = vpop.f32.mrb[23].mxu1 }
 0x9d1   :  { %v4515_v38 = vld [vmem:[%s5898_s26 + $0x60] sm:$0xff]  }
 0x9dd   :  { %v1106_v29 = vpop.f32.mrb[24].mxu1 }
 0x9de   :  { %v4086_v31 = vpop.f32.mrb[25].mxu1  ;;  %v1107_v37 = vadd.f32 %v3623_v28, %v1106_v29 }
 0x9df   :  { %v1109_v36 = vpop.f32.mrb[26].mxu1  ;;  %v4516_v31 = vld [vmem:[%s5898_s26 + $0x68] sm:$0xff]  }
 0x9e0   :  { %v1110_v39 = vadd.f32 %v3623_v28, %v1109_v36  ;;  %v4087_v40 = vpop.f32.mrb[27].mxu1  ;;  %v4517_v36 = vld [vmem:[%s5898_s26 + $0x70] sm:$0xff]  }
 0x9e2   :  { %v1277_v42 = vpack.c.bf16 %v1110_v39, %v1107_v37  ;;  %v4518_v37 = vld [vmem:[%s5898_s26 + $0x78] sm:$0xff]   ;;  %v3674_v39 = vld [vmem:[%s5869_s9 + $0x3] ss:$0 sm:$0xff] }
 0x9e4   :  { %4115 = vmatmul.mubr.msk.bf16.vlgmr.msra.gmra.mrb[32].mxu0 %vm437_vm3, %v1277_v42 }
 0x9e5   :  { %4120 = vmatprep.mubr.msk.bf16.mxu0 %vm4710_vm1, %v4709_v15 }
 0x9ed   :  { %v1270_v44 = vpop.f32.mrb[28].mxu1 }
 0x9ee   :  { %v4110_v48 = vpop.f32.mrb[29].mxu1  ;;  %v1271_v51 = vadd.f32 %v3653_v43, %v1270_v44 }
 0x9ef   :  { %v1273_v49 = vpop.f32.mrb[30].mxu1 }
 0x9f0   :  { %v1274_v52 = vadd.f32 %v3653_v43, %v1273_v49  ;;  %v4111_v53 = vpop.f32.mrb[31].mxu1 }
 0x9f2   :  { %v1353_v54 = vpack.c.bf16 %v1274_v52, %v1271_v51  ;;  %v3704_v52 = vld [vmem:[%s5871_s11 + $0x3] ss:$0 sm:$0xff] }
 0x9f4   :  { %4119 = vmatpush3.bf16.msra.mxu0 %v1353_v54 }
 0x9f5   :  { %4130 = vmatprep.subr.bf16.mxu0 %v4709_v15 }
 0xab7   :  { %v1319_v55 = vpop.f32.mrb[32].mxu0 }
 0xab8   :  { %v1326_v56 = vmul.f32 0.25, %v1319_v55  ;;  %v4116_v57 = vpop.f32.mrb[33].mxu0 }
 0xab9   :  { %v1322_v58 = vpop.f32.mrb[34].mxu0 }
 0xaba   :  { %v1327_v59 = vmul.f32 0.25, %v1322_v58  ;;  %v4117_v60 = vpop.f32.mrb[35].mxu0  ;;  %v1328_v61 = vadd.f32 %v1326_v56, %v5006_v41 }
 0xabc   :  { %v1330_v62 = vsel %vm437_vm3, %v1328_v61, -inf  ;;  %v1329_v63 = vadd.f32 %v1327_v59, %v5011_v45 }
 0xabd   :  { %1331 = vmax.xlane.f32.xlu0 %v1330_v62 }
 0xabe   :  { %v1333_v0 = vsel %vm437_vm3, %v1329_v63, -inf }
 0xabf   :  { %1334 = vmax.xlane.f32.xlu1 %v1333_v0 }
 0xb4a   :  { %v1332_v1 = vpop.xlane.xlu0 %1331 }
 0xb4b   :  { %v1336_v2 = vsub.f32 %v1328_v61, %v1332_v1  ;;  %v3689_v1 = vld [vmem:[%s5870_s10 + $0x3] ss:$0 sm:$0xff] }
 0xb4c   :  { %v1335_v3 = vpop.xlane.xlu1 %1334 }
 0xb4d   :  { %v1338_v4 = vmul.f32 1.442695, %v1336_v2  ;;  %v1337_v5 = vsub.f32 %v1329_v63, %v1335_v3 }
 0xb4f   :  { %4552 = vpow2.f32 %v1338_v4  ;;  %v1340_v6 = vmul.f32 1.442695, %v1337_v5 }
 0xb51   :  { %4554 = vpow2.f32 %v1340_v6 }
 0xb59   :  { %v4553_v7 = vpop.eup %4552 }
 0xb5a   :  { %v1342_v8 = vsel %vm437_vm3, %v4553_v7, 0.0 }
 0xb5b   :  { %v4555_v9 = vpop.eup %4554  ;;  %1343 = vadd.xlane.f32.xlu0 %v1342_v8 }
 0xb5c   :  { %v1345_v10 = vsel %vm437_vm3, %v4555_v9, 0.0 }
 0xb5d   :  { %1346 = vadd.xlane.f32.xlu1 %v1345_v10 }
 0xbe8   :  { %v1344_v12 = vpop.xlane.xlu0 %1343 }
 0xbe9   :  { %4556 = vrcp.f32 %v1344_v12 }
 0xbea   :  { %v1347_v13 = vpop.xlane.xlu1 %1346 }
 0xbeb   :  { %4558 = vrcp.f32 %v1347_v13 }
 0xbf3   :  { %v4557_v14 = vpop.eup %4556 }
 0xbf4   :  { %v1350_v17 = vmul.f32 %v4557_v14, %v4553_v7 }
 0xbf5   :  { %v4559_v16 = vpop.eup %4558 }
 0xbf6   :  { %v1351_v18 = vmul.f32 %v4559_v16, %v4555_v9 }
 0xbf8   :  { %v1352_v20 = vpack.c.bf16 %v1351_v18, %v1350_v17 }
 0xbfa   :  { %4121 = vmatmul.mubr.msk.bf16.vlgmr.msra.gmra.mrb[36].mxu0 %vm437_vm3, %v1352_v20 }
 0xbfb   :  { %4131 = vmatpush3.bf16.msra.mxu0 %v4506_v19  ;;  %4138 = vmatprep.mubr.msk.bf16.mxu0 %vm4710_vm1, %v4709_v15 }
 0xbfc   :  { %4132 = vmatprep.subr.bf16.mxu0 %v4709_v15 }
 0xbff   :  { %4133 = vmatpush3.bf16.msra.mxu0 %v4507_v21 }
 0xc00   :  { %4134 = vmatprep.subr.bf16.mxu0 %v4709_v15 }
 0xc03   :  { %4135 = vmatpush3.bf16.msra.mxu0 %v4508_v22 }
 0xc04   :  { %4136 = vmatprep.subr.bf16.mxu0 %v4709_v15 }
 0xc07   :  { %4137 = vmatpush3.bf16.msra.mxu0 %v4509_v23 }
 0xc08   :  { %4154 = vmatprep.subr.bf16.mxu0 %v4709_v15 }
 0xc0a   :  { %4139 = vmatmul.mubr.msk.bf16.vlgmr.msra.gmra.mrb[40].mxu0 %vm230_vm2, %v4903_v50 }
 0xc0b   :  { %4155 = vmatpush3.bf16.msra.mxu0 %v4510_v24  ;;  %4162 = vmatprep.mubr.msk.bf16.mxu0 %vm4710_vm1, %v4709_v15 }
 0xc0c   :  { %4156 = vmatprep.subr.bf16.mxu0 %v4709_v15 }
 0xc0f   :  { %4157 = vmatpush3.bf16.msra.mxu0 %v4511_v25 }
 0xc10   :  { %4158 = vmatprep.subr.bf16.mxu0 %v4709_v15 }
 0xc13   :  { %4159 = vmatpush3.bf16.msra.mxu0 %v4512_v26 }
 0xc14   :  { %4160 = vmatprep.subr.bf16.mxu0 %v4709_v15 }
 0xc17   :  { %4161 = vmatpush3.bf16.msra.mxu0 %v4513_v27 }
 0xc18   :  { %4178 = vmatprep.subr.bf16.mxu0 %v4709_v15 }
 0xc1a   :  { %4163 = vmatmul.mubr.msk.bf16.vlgmr.msra.gmra.mrb[44].mxu0 %vm230_vm2, %v4903_v50 }
 0xc1b   :  { %4180 = vmatprep.mubr.msk.bf16.mxu0 %vm4710_vm1, %v4709_v15 }
 0xccd   :  { %v1391_v30 = vpop.f32.mrb[36].mxu0 }
 0xcce   :  { %v4122_v33 = vpop.f32.mrb[37].mxu0 }
 0xccf   :  { %v1394_v34 = vpop.f32.mrb[38].mxu0 }
 0xcd0   :  { %v1401_v28 = vpack.c.bf16 %v1394_v34, %v1391_v30  ;;  %v4123_v29 = vpop.f32.mrb[39].mxu0 }
 0xcd2   :  { %4127 = vmatmul.mubr.msk.bf16.vlgmr.msra.gmra.mrb[32].mxu1 %vm437_vm3, %v1401_v28 }
 0xcd3   :  { %4143 = vmatpush3.bf16.msra.mxu1 %v4515_v38  ;;  %4150 = vmatprep.mubr.msk.bf16.mxu1 %vm4710_vm1, %v4709_v15 }
 0xcd4   :  { %4144 = vmatprep.subr.bf16.mxu1 %v4709_v15 }
 0xcd7   :  { %4145 = vmatpush3.bf16.msra.mxu1 %v4516_v31 }
 0xcd8   :  { %4146 = vmatprep.subr.bf16.mxu1 %v4709_v15 }
 0xcdb   :  { %4147 = vmatpush3.bf16.msra.mxu1 %v4517_v36 }
 0xcdc   :  { %4148 = vmatprep.subr.bf16.mxu1 %v4709_v15 }
 0xcdd   :  { %v1529_v40 = vpop.f32.mrb[40].mxu0 }
 0xcde   :  { %v4140_v42 = vpop.f32.mrb[41].mxu0  ;;  %v1530_v44 = vadd.f32 %v3674_v39, %v1529_v40 }
 0xcdf   :  { %v1532_v43 = vpop.f32.mrb[42].mxu0  ;;  %4149 = vmatpush3.bf16.msra.mxu1 %v4518_v37 }
 0xce0   :  { %v1533_v48 = vadd.f32 %v3674_v39, %v1532_v43  ;;  %v4141_v49 = vpop.f32.mrb[43].mxu0  ;;  %4166 = vmatprep.subr.bf16.mxu1 %v4709_v15 }
 0xce2   :  { %v1700_v51 = vpack.c.bf16 %v1533_v48, %v1530_v44  ;;  %4151 = vmatmul.mubr.msk.bf16.vlgmr.msra.gmra.mrb[36].mxu1 %vm230_vm2, %v4903_v50  ;;  %v3716_v44 = vld [vmem:[%s5874_s13] ss:$0 sm:$0xff] }
 0xce3   :  { %4168 = vmatprep.mubr.msk.bf16.mxu1 %vm4710_vm1, %v4709_v15 }
 0xced   :  { %v1693_v53 = vpop.f32.mrb[44].mxu0 }
 0xcee   :  { %v4164_v54 = vpop.f32.mrb[45].mxu0  ;;  %v1694_v56 = vadd.f32 %v3704_v52, %v1693_v53 }
 0xcef   :  { %v1696_v55 = vpop.f32.mrb[46].mxu0 }
 0xcf0   :  { %v1697_v57 = vadd.f32 %v3704_v52, %v1696_v55  ;;  %v4165_v58 = vpop.f32.mrb[47].mxu0 }
 0xcf2   :  { %v1776_v59 = vpack.c.bf16 %v1697_v57, %v1694_v56 }
 0xda5   :  { %v1445_v60 = vpop.f32.mrb[32].mxu1 }
 0xda6   :  { %v5248_v61 = vadd.f32 %v1445_v60, %v5151_v32  ;;  %v4128_v62 = vpop.f32.mrb[33].mxu1 }
 0xda7   :  { %v1448_v50 = vpop.f32.mrb[34].mxu1 }
 0xda8   :  { %v5251_v63 = vadd.f32 %v1448_v50, %v5153_v35  ;;  %v4129_v0 = vpop.f32.mrb[35].mxu1 }
 0xdb5   :  { %v1611_v2 = vpop.f32.mrb[36].mxu1 }
 0xdb6   :  { %v4152_v3 = vpop.f32.mrb[37].mxu1  ;;  %v1612_v5 = vadd.f32 %v3689_v1, %v1611_v2 }
 0xdb7   :  { %v1614_v4 = vpop.f32.mrb[38].mxu1 }
 0xdb8   :  { %v1615_v6 = vadd.f32 %v3689_v1, %v1614_v4  ;;  %v4153_v7 = vpop.f32.mrb[39].mxu1  ;;  %v4521_v4 = vld [vmem:[%s5875_s16 + $0x8] sm:$0xff]  }
 0xdba   :  { %v1701_v8 = vpack.c.bf16 %v1615_v6, %v1612_v5  ;;  %v4522_v5 = vld [vmem:[%s5875_s16 + $0x10] sm:$0xff]   ;;  %v4523_v6 = vld [vmem:[%s5875_s16 + $0x18] sm:$0xff]  }
 0xdbc   :  { %v1706_v32 = vsel %vm437_vm3, %v1701_v8, 0 }
 0xdbd   :  { %4167 = vmatpush3.bf16.xpose.msra.mxu1 %v1706_v32 }
 0xdbe   :  { %4172 = vmatprep.subr.bf16.mxu1 %v4709_v15 }
 0xdc4   :  { %4169 = vmatmul.mubr.msk.bf16.vlgmr.msra.gmra.mrb[40].mxu1 %vm437_vm3, %v1700_v51 }
 0xdc5   :  { %4173 = vmatpush3.bf16.msra.mxu1 %v1776_v59  ;;  %4174 = vmatprep.mubr.msk.bf16.mxu1 %vm4710_vm1, %v4709_v15 }
 0xdc6   :  { %4184 = vmatprep.subr.bf16.mxu1 %v4709_v15 }
 0xe97   :  { %v1742_v35 = vpop.f32.mrb[40].mxu1 }
 0xe98   :  { %v1749_v9 = vmul.f32 0.25, %v1742_v35  ;;  %v4170_v10 = vpop.f32.mrb[41].mxu1 }
 0xe99   :  { %v1745_v11 = vpop.f32.mrb[42].mxu1 }
 0xe9a   :  { %v1750_v12 = vmul.f32 0.25, %v1745_v11  ;;  %v4171_v13 = vpop.f32.mrb[43].mxu1  ;;  %v1751_v14 = vadd.f32 %v1749_v9, %v5006_v41 }
 0xe9c   :  { %v1753_v16 = vsel %vm437_vm3, %v1751_v14, -inf  ;;  %v1752_v17 = vadd.f32 %v1750_v12, %v5011_v45  ;;  %v4519_v45 = vld [vmem:[%s5873_s12 + $0x18] sm:$0xff]   ;;  %v3717_v12 = vld [vmem:[%s5876_s14] ss:$0 sm:$0xff] }
 0xe9d   :  { %1754 = vmax.xlane.f32.xlu0 %v1753_v16  ;;  %4179 = vmatpush3.bf16.msra.mxu0 %v4519_v45  ;;  %v4526_v45 = vld [vmem:[%s5878_s18 + $0x10] sm:$0xff]  }
 0xe9e   :  { %v1756_v18 = vsel %vm437_vm3, %v1752_v17, -inf  ;;  %4196 = vmatprep.subr.bf16.mxu0 %v4709_v15 }
 0xe9f   :  { %1757 = vmax.xlane.f32.xlu1 %v1756_v18  ;;  %v3718_v18 = vld [vmem:[%s5877_s15] ss:$0 sm:$0xff] }
 0xf2a   :  { %v1755_v19 = vpop.xlane.xlu0 %1754 }
 0xf2b   :  { %v1759_v20 = vsub.f32 %v1751_v14, %v1755_v19 }
 0xf2c   :  { %v1758_v21 = vpop.xlane.xlu1 %1757 }
 0xf2d   :  { %v1761_v22 = vmul.f32 1.442695, %v1759_v20  ;;  %v1760_v23 = vsub.f32 %v1752_v17, %v1758_v21 }
 0xf2f   :  { %4560 = vpow2.f32 %v1761_v22  ;;  %v1763_v24 = vmul.f32 1.442695, %v1760_v23  ;;  %v4624_v23 = vld [vmem:[%s5901_s4] sm:$0xff]  }
 0xf31   :  { %4562 = vpow2.f32 %v1763_v24  ;;  %v4625_v24 = vld [vmem:[%s5901_s4 + $0x8] sm:$0xff]  }
 0xf39   :  { %v4561_v25 = vpop.eup %4560 }
 0xf3a   :  { %v1765_v26 = vsel %vm437_vm3, %v4561_v25, 0.0 }
 0xf3b   :  { %v4563_v41 = vpop.eup %4562  ;;  %1766 = vadd.xlane.f32.xlu0 %v1765_v26  ;;  %v4627_v26 = vld [vmem:[%s5901_s4 + $0x18] sm:$0xff]  }
 0xf3c   :  { %v1768_v27 = vsel %vm437_vm3, %v4563_v41, 0.0 }
 0xf3d   :  { %1769 = vadd.xlane.f32.xlu1 %v1768_v27  ;;  %v4525_v27 = vld [vmem:[%s5878_s18 + $0x8] sm:$0xff]  }
 0xfc8   :  { %v1767_v30 = vpop.xlane.xlu0 %1766 }
 0xfc9   :  { %4564 = vrcp.f32 %v1767_v30  ;;  %v4527_v30 = vld [vmem:[%s5878_s18 + $0x18] sm:$0xff]  }
 0xfca   :  { %v1770_v33 = vpop.xlane.xlu1 %1769 }
 0xfcb   :  { %4566 = vrcp.f32 %v1770_v33  ;;  %v4528_v33 = vld [vmem:[%s5878_s18 + $0x20] sm:$0xff]  }
 0xfd3   :  { %v4565_v34 = vpop.eup %4564 }
 0xfd4   :  { %v1773_v28 = vmul.f32 %v4565_v34, %v4561_v25  ;;  %v4626_v25 = vld [vmem:[%s5901_s4 + $0x10] sm:$0xff]   ;;  %v4529_v34 = vld [vmem:[%s5878_s18 + $0x28] sm:$0xff]  }
 0xfd5   :  { %v4567_v38 = vpop.eup %4566 }
 0xfd6   :  { %v1774_v29 = vmul.f32 %v4567_v38, %v4563_v41  ;;  %v4524_v41 = vld [vmem:[%s5878_s18] sm:$0xff]   ;;  %v4530_v38 = vld [vmem:[%s5878_s18 + $0x30] sm:$0xff]  }
 0xfd8   :  { %v1775_v31 = vpack.c.bf16 %v1774_v29, %v1773_v28  ;;  %v4531_v28 = vld [vmem:[%s5878_s18 + $0x38] sm:$0xff]   ;;  %v3719_v29 = vld [vmem:[%s5879_s17] ss:$0 sm:$0xff] }
 0xfda   :  { %4175 = vmatmul.mubr.msk.bf16.vlgmr.msra.gmra.mrb[44].mxu1 %vm437_vm3, %v1775_v31 }
 0xfdb   :  { %4192 = vmatprep.mubr.msk.bf16.mxu1 %vm4710_vm1, %v4709_v15 }
0x10ad   :  { %v1814_v36 = vpop.f32.mrb[44].mxu1 }
0x10ae   :  { %v4176_v37 = vpop.f32.mrb[45].mxu1 }
0x10af   :  { %v1817_v39 = vpop.f32.mrb[46].mxu1 }
0x10b0   :  { %v1824_v40 = vpack.c.bf16 %v1817_v39, %v1814_v36  ;;  %v4177_v42 = vpop.f32.mrb[47].mxu1 }
0x10b2   :  { %4181 = vmatmul.mubr.msk.bf16.vlgmr.msra.gmra.mrb[48].mxu0 %vm437_vm3, %v1824_v40 }
0x10b3   :  { %4212 = vmatprep.mubr.msk.bf16.mxu0 %vm4710_vm1, %v4709_v15  ;;  %4197 = vmatpush3.bf16.msra.mxu0 %v4524_v41 }
0x10b4   :  { %4198 = vmatprep.subr.bf16.mxu0 %v4709_v15 }
0x10b7   :  { %4199 = vmatpush3.bf16.msra.mxu0 %v4525_v27 }
0x10b8   :  { %4200 = vmatprep.subr.bf16.mxu0 %v4709_v15 }
0x10bb   :  { %4201 = vmatpush3.bf16.msra.mxu0 %v4526_v45 }
0x10bc   :  { %4202 = vmatprep.subr.bf16.mxu0 %v4709_v15 }
0x10bf   :  { %4203 = vmatpush3.bf16.msra.mxu0 %v4527_v30  ;;  %v3734_v30 = vld [vmem:[%s5881_s20] ss:$0 sm:$0xff] }
0x10c0   :  { %4204 = vmatprep.subr.bf16.mxu0 %v4709_v15 }
0x10c3   :  { %4205 = vmatpush3.bf16.msra.mxu0 %v4528_v33 }
0x10c4   :  { %4206 = vmatprep.subr.bf16.mxu0 %v4709_v15 }
0x10c7   :  { %4207 = vmatpush3.bf16.msra.mxu0 %v4529_v34 }
0x10c8   :  { %4208 = vmatprep.subr.bf16.mxu0 %v4709_v15 }
0x10cb   :  { %4209 = vmatpush3.bf16.msra.mxu0 %v4530_v38 }
0x10cc   :  { %4210 = vmatprep.subr.bf16.mxu0 %v4709_v15 }
0x10cf   :  { %4211 = vmatpush3.bf16.msra.mxu0 %v4531_v28 }
0x10d0   :  { %4240 = vmatprep.subr.bf16.mxu0 %v4709_v15 }
0x1185   :  { %v1868_v43 = vpop.f32.mrb[48].mxu0 }
0x1186   :  { %v1875_v48 = vadd.f32 %v1868_v43, %v5248_v61  ;;  %v4182_v49 = vpop.f32.mrb[49].mxu0 }
0x1187   :  { %v1871_v51 = vpop.f32.mrb[50].mxu0 }
0x1188   :  { %v1884_v52 = vadd.f32 %v3716_v44, %v1875_v48  ;;  %v1876_v53 = vadd.f32 %v1871_v51, %v5251_v63  ;;  %v4183_v54 = vpop.f32.mrb[51].mxu0 }
0x118a   :  { %v1885_v55 = vadd.f32 %v3716_v44, %v1876_v53  ;;  %v1886_v56 = vadd.f32 %v1884_v52, %v4894_v46 }
0x118c   :  { %v1890_v57 = vsel %vm230_vm2, %v1886_v56, 0.0  ;;  %v1887_v58 = vadd.f32 %v1885_v55, %v4896_v47  ;;  %v4520_v47 = vld [vmem:[%s5875_s16] sm:$0xff]  }
0x118d   :  { %1891 = vadd.xlane.f32.xlu0 %v1890_v57  ;;  %4185 = vmatpush3.bf16.msra.mxu1 %v4520_v47  ;;  %v3725_v47 = vld [vmem:[%s5880_s19] ss:$0 sm:$0xff] }
0x118e   :  { %v1893_v59 = vsel %vm230_vm2, %v1887_v58, 0.0  ;;  %4186 = vmatprep.subr.bf16.mxu1 %v4709_v15 }
0x118f   :  { %1894 = vadd.xlane.f32.xlu1 %v1893_v59 }
0x1191   :  { %4187 = vmatpush3.bf16.msra.mxu1 %v4521_v4 }
0x1192   :  { %4188 = vmatprep.subr.bf16.mxu1 %v4709_v15 }
0x1195   :  { %4189 = vmatpush3.bf16.msra.mxu1 %v4522_v5 }
0x1196   :  { %4190 = vmatprep.subr.bf16.mxu1 %v4709_v15 }
0x1199   :  { %4191 = vmatpush3.bf16.msra.mxu1 %v4523_v6 }
0x119a   :  { %4216 = vmatprep.subr.bf16.mxu1 %v4709_v15 }
0x121a   :  { %v1892_v60 = vpop.xlane.xlu0 %1891 }
0x121b   :  { %v1897_v62 = vmul.f32 0.015625, %v1892_v60 }
0x121c   :  { %v1895_v61 = vpop.xlane.xlu1 %1894 }
0x121d   :  { %v1899_v50 = vsub.f32 %v1886_v56, %v1897_v62  ;;  %v1898_v0 = vmul.f32 0.015625, %v1895_v61 }
0x121f   :  { %v1900_v1 = vsub.f32 %v1887_v58, %v1898_v0  ;;  %v1901_v2 = vmul.f32 %v1899_v50, %v1899_v50 }
0x1221   :  { %v1903_v63 = vsel %vm230_vm2, %v1901_v2, 0.0  ;;  %v1902_v3 = vmul.f32 %v1900_v1, %v1900_v1  ;;  %v4628_v2 = vld [vmem:[%s5902_s8] sm:$0xff]  }
0x1222   :  { %1904 = vadd.xlane.f32.xlu0 %v1903_v63  ;;  %v4629_v63 = vld [vmem:[%s5902_s8 + $0x8] sm:$0xff]  }
0x1223   :  { %v1906_v46 = vsel %vm230_vm2, %v1902_v3, 0.0  ;;  %v4630_v3 = vld [vmem:[%s5902_s8 + $0x10] sm:$0xff]  }
0x1224   :  { %1907 = vadd.xlane.f32.xlu1 %v1906_v46  ;;  %v4631_v46 = vld [vmem:[%s5902_s8 + $0x18] sm:$0xff]  }
0x12af   :  { %v1905_v7 = vpop.xlane.xlu0 %1904 }
0x12b0   :  { %v1909_v8 = vmul.f32 0.015625, %v1905_v7 }
0x12b1   :  { %v1908_v32 = vpop.xlane.xlu1 %1907 }
0x12b2   :  { %v1911_v35 = vadd.f32 1e-12, %v1909_v8  ;;  %v1910_v9 = vmul.f32 0.015625, %v1908_v32 }
0x12b4   :  { %4568 = vrsqrt.f32 %v1911_v35  ;;  %v1912_v10 = vadd.f32 1e-12, %v1910_v9 }
0x12b6   :  { %4570 = vrsqrt.f32 %v1912_v10 }
0x12be   :  { %v4569_v11 = vpop.eup %4568 }
0x12bf   :  { %v1915_v13 = vmul.f32 %v4569_v11, %v1899_v50 }
0x12c0   :  { %v4571_v14 = vpop.eup %4570 }
0x12c1   :  { %v1923_v16 = vmul.f32 %v3717_v12, %v1915_v13  ;;  %v1916_v17 = vmul.f32 %v4571_v14, %v1900_v1 }
0x12c3   :  { %v1924_v19 = vmul.f32 %v3717_v12, %v1916_v17  ;;  %v5311_v20 = vadd.f32 %v3718_v18, %v1923_v16 }
0x12c5   :  { %v5313_v21 = vadd.f32 %v3718_v18, %v1924_v19 }
0x12c7   :  { %v1941_v22 = vpack.c.bf16 %v5313_v21, %v5311_v20 }
0x12c9   :  { %4193 = vmatmul.mubr.msk.bf16.vlgmr.msra.gmra.mrb[48].mxu1 %vm230_vm2, %v1941_v22 }
0x12ca   :  { %4217 = vmatpush3.bf16.msra.mxu1 %v4624_v23  ;;  %4224 = vmatprep.mubr.msk.bf16.mxu1 %vm4710_vm1, %v4709_v15 }
0x12cb   :  { %4218 = vmatprep.subr.bf16.mxu1 %v4709_v15 }
0x12ce   :  { %4219 = vmatpush3.bf16.msra.mxu1 %v4625_v24 }
0x12cf   :  { %4220 = vmatprep.subr.bf16.mxu1 %v4709_v15 }
0x12d2   :  { %4221 = vmatpush3.bf16.msra.mxu1 %v4626_v25 }
0x12d3   :  { %4222 = vmatprep.subr.bf16.mxu1 %v4709_v15 }
0x12d6   :  { %4223 = vmatpush3.bf16.msra.mxu1 %v4627_v26 }
0x12d7   :  { %4228 = vmatprep.subr.bf16.mxu1 %v4709_v15 }
0x139c   :  { %v2010_v31 = vpop.f32.mrb[48].mxu1 }
0x139d   :  { %v2011_v36 = vadd.f32 %v3719_v29, %v2010_v31  ;;  %v4194_v37 = vpop.f32.mrb[49].mxu1 }
0x139e   :  { %v2013_v39 = vpop.f32.mrb[50].mxu1 }
0x139f   :  { %v2019_v40 = vmul.f32 0.044715, %v2011_v36  ;;  %v2014_v42 = vadd.f32 %v3719_v29, %v2013_v39  ;;  %v4195_v43 = vpop.f32.mrb[51].mxu1  ;;  %v2017_v60 = vmul.f32 0.5, %v2011_v36  ;;  %v3735_v29 = vld [vmem:[%s5882_s21] ss:$0 sm:$0xff] }
0x13a0   :  { %v4634_v43 = vld [vmem:[%s5898_s26 + $0x10] sm:$0xff]  }
0x13a1   :  { %v2021_v44 = vmul.f32 %v2019_v40, %v2011_v36  ;;  %v2020_v48 = vmul.f32 0.044715, %v2014_v42  ;;  %v2018_v62 = vmul.f32 0.5, %v2014_v42  ;;  %v4632_v40 = vld [vmem:[%s5898_s26] sm:$0xff]  }
0x13a3   :  { %v2023_v49 = vmul.f32 %v2021_v44, %v2011_v36  ;;  %v2022_v51 = vmul.f32 %v2020_v48, %v2014_v42  ;;  %v4635_v44 = vld [vmem:[%s5898_s26 + $0x18] sm:$0xff]  }
0x13a5   :  { %v2025_v52 = vadd.f32 %v2023_v49, %v2011_v36  ;;  %v2024_v53 = vmul.f32 %v2022_v51, %v2014_v42 }
0x13a7   :  { %v2027_v54 = vmul.f32 0.7978846, %v2025_v52  ;;  %v2026_v55 = vadd.f32 %v2024_v53, %v2014_v42  ;;  %v4633_v42 = vld [vmem:[%s5898_s26 + $0x8] sm:$0xff]  }
0x13a9   :  { %4572 = vtanh.f32 %v2027_v54  ;;  %v2028_v56 = vmul.f32 0.7978846, %v2026_v55  ;;  %v4636_v55 = vld [vmem:[%s5869_s9] ss:$0 sm:$0xff] }
0x13ab   :  { %4574 = vtanh.f32 %v2028_v56 }
0x13b3   :  { %v4573_v57 = vpop.eup %4572 }
0x13b4   :  { %v2031_v58 = vadd.f32 1.0, %v4573_v57  ;;  %v4637_v57 = vld [vmem:[%s5871_s11] ss:$0 sm:$0xff] }
0x13b5   :  { %v4575_v59 = vpop.eup %4574 }
0x13b6   :  { %v2032_v61 = vadd.f32 1.0, %v4575_v59  ;;  %v2033_v50 = vmul.f32 %v2031_v58, %v2017_v60 }
0x13b8   :  { %v2034_v0 = vmul.f32 %v2032_v61, %v2018_v62 }
0x13ba   :  { %v2051_v1 = vpack.c.bf16 %v2034_v0, %v2033_v50 }
0x13bc   :  { %4213 = vmatmul.mubr.bf16.vlgmr.msra.gmra.mrb[52].mxu0 %v2051_v1 }
0x13bd   :  { %4241 = vmatpush3.bf16.msra.mxu0 %v4628_v2  ;;  %4248 = vmatprep.mubr.msk.bf16.mxu0 %vm4710_vm1, %v4709_v15 }
0x13be   :  { %4242 = vmatprep.subr.bf16.mxu0 %v4709_v15 }
0x13c1   :  { %4243 = vmatpush3.bf16.msra.mxu0 %v4629_v63 }
0x13c2   :  { %4244 = vmatprep.subr.bf16.mxu0 %v4709_v15 }
0x13c5   :  { %4245 = vmatpush3.bf16.msra.mxu0 %v4630_v3  ;;  %v4638_v3 = vld [vmem:[%s5870_s10] ss:$0 sm:$0xff] }
0x13c6   :  { %4246 = vmatprep.subr.bf16.mxu0 %v4709_v15 }
0x13c9   :  { %4247 = vmatpush3.bf16.msra.mxu0 %v4631_v46 }
0x13ca   :  { %4258 = vmatprep.subr.bf16.mxu0 %v4709_v15 }
0x148f   :  { %v2141_v4 = vpop.f32.mrb[52].mxu0 }
0x1490   :  { %v2142_v5 = vadd.f32 %v3725_v47, %v2141_v4  ;;  %v4214_v6 = vpop.f32.mrb[53].mxu0 }
0x1491   :  { %v2144_v7 = vpop.f32.mrb[54].mxu0 }
0x1492   :  { %v2145_v8 = vadd.f32 %v3725_v47, %v2144_v7  ;;  %v4215_v32 = vpop.f32.mrb[55].mxu0  ;;  %v2148_v35 = vadd.f32 %v2142_v5, %v5311_v20  ;;  %v4639_v7 = vld [vmem:[%s5901_s4 + $0x20] sm:$0xff]  }
0x1493   :  { %v4641_v32 = vld [vmem:[%s5901_s4 + $0x30] sm:$0xff]  }
0x1494   :  { %v2152_v9 = vsel %vm230_vm2, %v2148_v35, 0.0  ;;  %v2149_v10 = vadd.f32 %v2145_v8, %v5313_v21  ;;  %v4640_v8 = vld [vmem:[%s5901_s4 + $0x28] sm:$0xff]  }
0x1495   :  { %2153 = vadd.xlane.f32.xlu0 %v2152_v9  ;;  %v4643_v9 = vld [vmem:[%s5902_s8 + $0x20] sm:$0xff]  }
0x1496   :  { %v2155_v11 = vsel %vm230_vm2, %v2149_v10, 0.0 }
0x1497   :  { %2156 = vadd.xlane.f32.xlu1 %v2155_v11  ;;  %v4645_v11 = vld [vmem:[%s5902_s8 + $0x30] sm:$0xff]  }
0x1522   :  { %v2154_v12 = vpop.xlane.xlu0 %2153 }
0x1523   :  { %v2158_v13 = vmul.f32 0.015625, %v2154_v12  ;;  %v4646_v12 = vld [vmem:[%s5902_s8 + $0x38] sm:$0xff]  }
0x1524   :  { %v2157_v14 = vpop.xlane.xlu1 %2156 }
0x1525   :  { %v2160_v16 = vsub.f32 %v2148_v35, %v2158_v13  ;;  %v2159_v17 = vmul.f32 0.015625, %v2157_v14  ;;  %v4642_v35 = vld [vmem:[%s5901_s4 + $0x38] sm:$0xff]   ;;  %v4647_v13 = vld [vmem:[%s5873_s12 + $0x8] sm:$0xff]  }
0x1527   :  { %v2161_v18 = vsub.f32 %v2149_v10, %v2159_v17  ;;  %v2162_v19 = vmul.f32 %v2160_v16, %v2160_v16  ;;  %v4644_v10 = vld [vmem:[%s5902_s8 + $0x28] sm:$0xff]  }
0x1529   :  { %v2164_v22 = vsel %vm230_vm2, %v2162_v19, 0.0  ;;  %v2163_v23 = vmul.f32 %v2161_v18, %v2161_v18 }
0x152a   :  { %2165 = vadd.xlane.f32.xlu0 %v2164_v22 }
0x152b   :  { %v2167_v20 = vsel %vm230_vm2, %v2163_v23, 0.0  ;;  %v5502_v23 = vld [vmem:[%s5872_s1] sm:$0xff] }
0x152c   :  { %2168 = vadd.xlane.f32.xlu1 %v2167_v20 }
0x15b7   :  { %v2166_v24 = vpop.xlane.xlu0 %2165 }
0x15b8   :  { %v2170_v21 = vmul.f32 0.015625, %v2166_v24 }
0x15b9   :  { %v2169_v25 = vpop.xlane.xlu1 %2168 }
0x15ba   :  { %v2172_v26 = vadd.f32 1e-12, %v2170_v21  ;;  %v2171_v41 = vmul.f32 0.015625, %v2169_v25  ;;  %v5509_v21 = vld [vmem:[%s5872_s1 + $0x8] sm:$0xff] }
0x15bc   :  { %4576 = vrsqrt.f32 %v2172_v26  ;;  %v2173_v27 = vadd.f32 1e-12, %v2171_v41 }
0x15be   :  { %4578 = vrsqrt.f32 %v2173_v27 }
0x15c6   :  { %v4577_v45 = vpop.eup %4576 }
0x15c7   :  { %v2176_v33 = vmul.f32 %v4577_v45, %v2160_v16 }
0x15c8   :  { %v4579_v34 = vpop.eup %4578 }
0x15c9   :  { %v2184_v38 = vmul.f32 %v3734_v30, %v2176_v33  ;;  %v2177_v28 = vmul.f32 %v4579_v34, %v2161_v18 }
0x15cb   :  { %v2185_v31 = vmul.f32 %v3734_v30, %v2177_v28  ;;  %v5404_v36 = vadd.f32 %v3735_v29, %v2184_v38  ;;  %v4650_v30 = vld [vmem:[%s5869_s9 + $0x1] ss:$0 sm:$0xff] }
0x15cd   :  { %v5406_v37 = vadd.f32 %v3735_v29, %v2185_v31 }
0x15cf   :  { %v5410_v39 = vpack.c.bf16 %v5406_v37, %v5404_v36 }
0x15d1   :  { %4225 = vmatmul.mubr.msk.bf16.vlgmr.msra.gmra.mrb[52].mxu1 %vm230_vm2, %v5410_v39  ;;  %4249 = vmatmul.mubr.msk.bf16.vlgmr.msra.gmra.mrb[56].mxu0 %vm230_vm2, %v5410_v39 }
0x15d2   :  { %4229 = vmatpush3.bf16.msra.mxu1 %v4632_v40  ;;  %4236 = vmatprep.mubr.msk.bf16.mxu1 %vm4710_vm1, %v4709_v15 }
0x15d3   :  { %4230 = vmatprep.subr.bf16.mxu1 %v4709_v15  ;;  %4260 = vmatprep.mubr.msk.bf16.mxu0 %vm4710_vm1, %v4709_v15 }
0x15d6   :  { %4231 = vmatpush3.bf16.msra.mxu1 %v4633_v42  ;;  %v4651_v42 = vld [vmem:[%s5871_s11 + $0x1] ss:$0 sm:$0xff] }
0x15d7   :  { %4232 = vmatprep.subr.bf16.mxu1 %v4709_v15 }
0x15da   :  { %4233 = vmatpush3.bf16.msra.mxu1 %v4634_v43 }
0x15db   :  { %4234 = vmatprep.subr.bf16.mxu1 %v4709_v15 }
0x15de   :  { %4235 = vmatpush3.bf16.msra.mxu1 %v4635_v44 }
0x15df   :  { %4252 = vmatprep.subr.bf16.mxu1 %v4709_v15 }
0x15e1   :  { %4237 = vmatmul.mubr.msk.bf16.vlgmr.msra.gmra.mrb[56].mxu1 %vm230_vm2, %v5410_v39 }
0x15e2   :  { %4254 = vmatprep.mubr.msk.bf16.mxu1 %vm4710_vm1, %v4709_v15 }
0x16a4   :  { %v2232_v48 = vpop.f32.mrb[52].mxu1  ;;  %v2314_v49 = vpop.f32.mrb[56].mxu0 }
0x16a5   :  { %v4226_v51 = vpop.f32.mrb[53].mxu1  ;;  %v4250_v52 = vpop.f32.mrb[57].mxu0  ;;  %v2233_v56 = vadd.f32 %v4636_v55, %v2232_v48  ;;  %v2315_v58 = vadd.f32 %v4637_v57, %v2314_v49 }
0x16a6   :  { %v2235_v53 = vpop.f32.mrb[54].mxu1  ;;  %v2317_v54 = vpop.f32.mrb[58].mxu0 }
0x16a7   :  { %v2236_v59 = vadd.f32 %v4636_v55, %v2235_v53  ;;  %v2318_v60 = vadd.f32 %v4637_v57, %v2317_v54  ;;  %v4227_v62 = vpop.f32.mrb[55].mxu1  ;;  %v4251_v61 = vpop.f32.mrb[59].mxu0 }
0x16a9   :  { %v2321_v50 = vpack.c.bf16 %v2236_v59, %v2233_v56  ;;  %v2397_v0 = vpack.c.bf16 %v2318_v60, %v2315_v58 }
0x16ab   :  { %4259 = vmatpush3.bf16.msra.mxu0 %v2397_v0 }
0x16ac   :  { %4276 = vmatprep.subr.bf16.mxu0 %v4709_v15 }
0x16b4   :  { %v2273_v1 = vpop.f32.mrb[56].mxu1 }
0x16b5   :  { %v4238_v2 = vpop.f32.mrb[57].mxu1  ;;  %v2274_v46 = vadd.f32 %v4638_v3, %v2273_v1 }
0x16b6   :  { %v2276_v63 = vpop.f32.mrb[58].mxu1 }
0x16b7   :  { %v2277_v47 = vadd.f32 %v4638_v3, %v2276_v63  ;;  %v4239_v4 = vpop.f32.mrb[59].mxu1  ;;  %v4652_v3 = vld [vmem:[%s5898_s26 + $0x20] sm:$0xff]  }
0x16b8   :  { %v4655_v4 = vld [vmem:[%s5898_s26 + $0x38] sm:$0xff]  }
0x16b9   :  { %v2322_v5 = vpack.c.bf16 %v2277_v47, %v2274_v46  ;;  %v4653_v46 = vld [vmem:[%s5898_s26 + $0x28] sm:$0xff]   ;;  %v4654_v47 = vld [vmem:[%s5898_s26 + $0x30] sm:$0xff]  }
0x16bb   :  { %v2327_v6 = vsel %vm437_vm3, %v2322_v5, 0 }
0x16bc   :  { %4253 = vmatpush3.bf16.xpose.msra.mxu1 %v2327_v6 }
0x16bd   :  { %4264 = vmatprep.subr.bf16.mxu1 %v4709_v15 }
0x16c3   :  { %4255 = vmatmul.mubr.msk.bf16.vlgmr.msra.gmra.mrb[60].mxu1 %vm437_vm3, %v2321_v50 }
0x16c4   :  { %4265 = vmatpush3.bf16.msra.mxu1 %v4639_v7  ;;  %4272 = vmatprep.mubr.msk.bf16.mxu1 %vm4710_vm1, %v4709_v15 }
0x16c5   :  { %4266 = vmatprep.subr.bf16.mxu1 %v4709_v15 }
0x16c8   :  { %4267 = vmatpush3.bf16.msra.mxu1 %v4640_v8 }
0x16c9   :  { %4268 = vmatprep.subr.bf16.mxu1 %v4709_v15 }
0x16cc   :  { %4269 = vmatpush3.bf16.msra.mxu1 %v4641_v32 }
0x16cd   :  { %4270 = vmatprep.subr.bf16.mxu1 %v4709_v15 }
0x16d0   :  { %4271 = vmatpush3.bf16.msra.mxu1 %v4642_v35 }
0x16d1   :  { %4288 = vmatprep.subr.bf16.mxu1 %v4709_v15 }
0x16d3   :  { %4273 = vmatmul.mubr.msk.bf16.vlgmr.msra.gmra.mrb[64].mxu1 %vm230_vm2, %v5410_v39 }
0x16d4   :  { %4289 = vmatpush3.bf16.msra.mxu1 %v4643_v9  ;;  %4296 = vmatprep.mubr.msk.bf16.mxu1 %vm4710_vm1, %v4709_v15 }
0x16d5   :  { %4290 = vmatprep.subr.bf16.mxu1 %v4709_v15 }
0x16d8   :  { %4291 = vmatpush3.bf16.msra.mxu1 %v4644_v10 }
0x16d9   :  { %4292 = vmatprep.subr.bf16.mxu1 %v4709_v15 }
0x16dc   :  { %4293 = vmatpush3.bf16.msra.mxu1 %v4645_v11  ;;  %v4656_v11 = vld [vmem:[%s5870_s10 + $0x1] ss:$0 sm:$0xff] }
0x16dd   :  { %4294 = vmatprep.subr.bf16.mxu1 %v4709_v15 }
0x16e0   :  { %4295 = vmatpush3.bf16.msra.mxu1 %v4646_v12 }
0x16e1   :  { %4312 = vmatprep.subr.bf16.mxu1 %v4709_v15 }
0x16e3   :  { %4297 = vmatmul.mubr.msk.bf16.vlgmr.msra.gmra.mrb[68].mxu1 %vm230_vm2, %v5410_v39 }
0x16e4   :  { %4313 = vmatpush3.bf16.msra.mxu1 %v4647_v13  ;;  %4314 = vmatprep.mubr.msk.bf16.mxu1 %vm4710_vm1, %v4709_v15 }
0x16e5   :  { %4324 = vmatprep.subr.bf16.mxu1 %v4709_v15 }
0x1796   :  { %v2363_v14 = vpop.f32.mrb[60].mxu1 }
0x1797   :  { %v2370_v16 = vmul.f32 0.25, %v2363_v14  ;;  %v4256_v17 = vpop.f32.mrb[61].mxu1 }
0x1798   :  { %v2366_v18 = vpop.f32.mrb[62].mxu1 }
0x1799   :  { %v2371_v19 = vmul.f32 0.25, %v2366_v18  ;;  %v4257_v22 = vpop.f32.mrb[63].mxu1  ;;  %v2372_v20 = vadd.f32 %v5502_v23, %v2370_v16 }
0x179b   :  { %v2374_v24 = vsel %vm437_vm3, %v2372_v20, -inf  ;;  %v2373_v25 = vadd.f32 %v5509_v21, %v2371_v19 }
0x179c   :  { %2375 = vmax.xlane.f32.xlu0 %v2374_v24 }
0x179d   :  { %v2377_v26 = vsel %vm437_vm3, %v2373_v25, -inf }
0x179e   :  { %2378 = vmax.xlane.f32.xlu1 %v2377_v26 }
0x17a6   :  { %v2477_v41 = vpop.f32.mrb[64].mxu1 }
0x17a7   :  { %v4274_v27 = vpop.f32.mrb[65].mxu1  ;;  %v5516_v33 = vadd.f32 %v4650_v30, %v2477_v41 }
0x17a8   :  { %v2480_v45 = vpop.f32.mrb[66].mxu1 }
0x17a9   :  { %v5518_v34 = vadd.f32 %v4650_v30, %v2480_v45  ;;  %v4275_v38 = vpop.f32.mrb[67].mxu1 }
0x17ab   :  { %v2566_v28 = vpack.c.bf16 %v5518_v34, %v5516_v33 }
0x17b6   :  { %v2559_v29 = vpop.f32.mrb[68].mxu1 }
0x17b7   :  { %v4298_v31 = vpop.f32.mrb[69].mxu1  ;;  %v2560_v43 = vadd.f32 %v4651_v42, %v2559_v29 }
0x17b8   :  { %v2562_v40 = vpop.f32.mrb[70].mxu1 }
0x17b9   :  { %v2563_v44 = vadd.f32 %v4651_v42, %v2562_v40  ;;  %v4299_v48 = vpop.f32.mrb[71].mxu1 }
0x17bb   :  { %v2642_v49 = vpack.c.bf16 %v2563_v44, %v2560_v43 }
0x1829   :  { %v2376_v51 = vpop.xlane.xlu0 %2375 }
0x182a   :  { %v2380_v52 = vsub.f32 %v2372_v20, %v2376_v51 }
0x182b   :  { %v2379_v53 = vpop.xlane.xlu1 %2378 }
0x182c   :  { %v2382_v54 = vmul.f32 1.442695, %v2380_v52  ;;  %v2381_v55 = vsub.f32 %v2373_v25, %v2379_v53 }
0x182e   :  { %4580 = vpow2.f32 %v2382_v54  ;;  %v2384_v56 = vmul.f32 1.442695, %v2381_v55  ;;  %v4657_v55 = vld [vmem:[%s5873_s12] sm:$0xff]  }
0x1830   :  { %4582 = vpow2.f32 %v2384_v56  ;;  %v4658_v56 = vld [vmem:[%s5898_s26 + $0x40] sm:$0xff]  }
0x1838   :  { %v4581_v57 = vpop.eup %4580 }
0x1839   :  { %v2386_v58 = vsel %vm437_vm3, %v4581_v57, 0.0 }
0x183a   :  { %v4583_v59 = vpop.eup %4582  ;;  %2387 = vadd.xlane.f32.xlu0 %v2386_v58  ;;  %v4660_v58 = vld [vmem:[%s5898_s26 + $0x50] sm:$0xff]  }
0x183b   :  { %v2389_v60 = vsel %vm437_vm3, %v4583_v59, 0.0 }
0x183c   :  { %2390 = vadd.xlane.f32.xlu1 %v2389_v60 }
0x18c7   :  { %v2388_v62 = vpop.xlane.xlu0 %2387 }
0x18c8   :  { %4584 = vrcp.f32 %v2388_v62 }
0x18c9   :  { %v2391_v61 = vpop.xlane.xlu1 %2390 }
0x18ca   :  { %4586 = vrcp.f32 %v2391_v61 }
0x18d2   :  { %v4585_v50 = vpop.eup %4584 }
0x18d3   :  { %v2394_v1 = vmul.f32 %v4585_v50, %v4581_v57  ;;  %v4659_v57 = vld [vmem:[%s5898_s26 + $0x48] sm:$0xff]  }
0x18d4   :  { %v4587_v0 = vpop.eup %4586 }
0x18d5   :  { %v2395_v2 = vmul.f32 %v4587_v0, %v4583_v59  ;;  %v4661_v59 = vld [vmem:[%s5898_s26 + $0x58] sm:$0xff]  }
0x18d7   :  { %v2396_v63 = vpack.c.bf16 %v2395_v2, %v2394_v1  ;;  %v4662_v1 = vld [vmem:[%s5901_s4 + $0x40] sm:$0xff]  }
0x18d9   :  { %4261 = vmatmul.mubr.msk.bf16.vlgmr.msra.gmra.mrb[60].mxu0 %vm437_vm3, %v2396_v63 }
0x18da   :  { %4277 = vmatpush3.bf16.msra.mxu0 %v4652_v3  ;;  %4284 = vmatprep.mubr.msk.bf16.mxu0 %vm4710_vm1, %v4709_v15  ;;  %v4663_v3 = vld [vmem:[%s5901_s4 + $0x48] sm:$0xff]  }
0x18db   :  { %4278 = vmatprep.subr.bf16.mxu0 %v4709_v15 }
0x18de   :  { %4279 = vmatpush3.bf16.msra.mxu0 %v4653_v46 }
0x18df   :  { %4280 = vmatprep.subr.bf16.mxu0 %v4709_v15 }
0x18e2   :  { %4281 = vmatpush3.bf16.msra.mxu0 %v4654_v47 }
0x18e3   :  { %4282 = vmatprep.subr.bf16.mxu0 %v4709_v15 }
0x18e6   :  { %4283 = vmatpush3.bf16.msra.mxu0 %v4655_v4  ;;  %v4664_v4 = vld [vmem:[%s5901_s4 + $0x50] sm:$0xff]  }
0x18e7   :  { %4300 = vmatprep.subr.bf16.mxu0 %v4709_v15 }
0x18e9   :  { %4285 = vmatmul.mubr.msk.bf16.vlgmr.msra.gmra.mrb[64].mxu0 %vm230_vm2, %v5410_v39 }
0x18ea   :  { %4302 = vmatprep.mubr.msk.bf16.mxu0 %vm4710_vm1, %v4709_v15 }
0x19ac   :  { %v2435_v5 = vpop.f32.mrb[60].mxu0 }
0x19ad   :  { %v4262_v6 = vpop.f32.mrb[61].mxu0 }
0x19ae   :  { %v2438_v7 = vpop.f32.mrb[62].mxu0  ;;  %v4666_v6 = vld [vmem:[%s5902_s8 + $0x40] sm:$0xff]  }
0x19af   :  { %v2442_v8 = vpack.c.bf16 %v2438_v7, %v2435_v5  ;;  %v4263_v32 = vpop.f32.mrb[63].mxu0  ;;  %v4665_v5 = vld [vmem:[%s5901_s4 + $0x58] sm:$0xff]  }
0x19bc   :  { %v2518_v35 = vpop.f32.mrb[64].mxu0 }
0x19bd   :  { %v4286_v9 = vpop.f32.mrb[65].mxu0  ;;  %v2519_v12 = vadd.f32 %v4656_v11, %v2518_v35  ;;  %v4667_v35 = vld [vmem:[%s5902_s8 + $0x48] sm:$0xff]  }
0x19be   :  { %v2521_v10 = vpop.f32.mrb[66].mxu0  ;;  %v4668_v9 = vld [vmem:[%s5870_s10 + $0x2] ss:$0 sm:$0xff] }
0x19bf   :  { %v2522_v13 = vadd.f32 %v4656_v11, %v2521_v10  ;;  %v4287_v14 = vpop.f32.mrb[67].mxu0 }
0x19c0   :  { %v4669_v14 = vld [vmem:[%s5902_s8 + $0x50] sm:$0xff]  }
0x19c1   :  { %v2567_v16 = vpack.c.bf16 %v2522_v13, %v2519_v12 }
0x19c3   :  { %v2572_v17 = vsel %vm437_vm3, %v2567_v16, 0 }
0x19c4   :  { %4301 = vmatpush3.bf16.xpose.msra.mxu0 %v2572_v17  ;;  %v4670_v17 = vld [vmem:[%s5902_s8 + $0x58] sm:$0xff]  }
0x19c5   :  { %4306 = vmatprep.subr.bf16.mxu0 %v4709_v15 }
0x19cb   :  { %4303 = vmatmul.mubr.msk.bf16.vlgmr.msra.gmra.mrb[68].mxu0 %vm437_vm3, %v2566_v28 }
0x19cc   :  { %4307 = vmatpush3.bf16.msra.mxu0 %v2642_v49  ;;  %4308 = vmatprep.mubr.msk.bf16.mxu0 %vm4710_vm1, %v4709_v15 }
0x19cd   :  { %4318 = vmatprep.subr.bf16.mxu0 %v4709_v15 }
0x1a9e   :  { %v2608_v18 = vpop.f32.mrb[68].mxu0 }
0x1a9f   :  { %v2615_v19 = vmul.f32 0.25, %v2608_v18  ;;  %v4304_v22 = vpop.f32.mrb[69].mxu0  ;;  %v4671_v18 = vld [vmem:[%s5873_s12 + $0x10] sm:$0xff]  }
0x1aa0   :  { %v2611_v20 = vpop.f32.mrb[70].mxu0 }
0x1aa1   :  { %v2616_v24 = vmul.f32 0.25, %v2611_v20  ;;  %v4305_v25 = vpop.f32.mrb[71].mxu0  ;;  %v2617_v26 = vadd.f32 %v5502_v23, %v2615_v19 }
0x1aa3   :  { %v2619_v41 = vsel %vm437_vm3, %v2617_v26, -inf  ;;  %v2618_v27 = vadd.f32 %v5509_v21, %v2616_v24 }
0x1aa4   :  { %2620 = vmax.xlane.f32.xlu0 %v2619_v41 }
0x1aa5   :  { %v2622_v45 = vsel %vm437_vm3, %v2618_v27, -inf }
0x1aa6   :  { %2623 = vmax.xlane.f32.xlu1 %v2622_v45 }
0x1b31   :  { %v2621_v30 = vpop.xlane.xlu0 %2620 }
0x1b32   :  { %v2625_v33 = vsub.f32 %v2617_v26, %v2621_v30  ;;  %v4672_v30 = vld [vmem:[%s5869_s9 + $0x2] ss:$0 sm:$0xff] }
0x1b33   :  { %v2624_v34 = vpop.xlane.xlu1 %2623 }
0x1b34   :  { %v2627_v38 = vmul.f32 1.442695, %v2625_v33  ;;  %v2626_v28 = vsub.f32 %v2618_v27, %v2624_v34 }
0x1b36   :  { %4588 = vpow2.f32 %v2627_v38  ;;  %v2629_v29 = vmul.f32 1.442695, %v2626_v28 }
0x1b38   :  { %4590 = vpow2.f32 %v2629_v29 }
0x1b40   :  { %v4589_v31 = vpop.eup %4588 }
0x1b41   :  { %v2631_v40 = vsel %vm437_vm3, %v4589_v31, 0.0 }
0x1b42   :  { %v4591_v42 = vpop.eup %4590  ;;  %2632 = vadd.xlane.f32.xlu0 %v2631_v40 }
0x1b43   :  { %v2634_v43 = vsel %vm437_vm3, %v4591_v42, 0.0 }
0x1b44   :  { %2635 = vadd.xlane.f32.xlu1 %v2634_v43 }
0x1bcf   :  { %v2633_v44 = vpop.xlane.xlu0 %2632 }
0x1bd0   :  { %4592 = vrcp.f32 %v2633_v44 }
0x1bd1   :  { %v2636_v48 = vpop.xlane.xlu1 %2635 }
0x1bd2   :  { %4594 = vrcp.f32 %v2636_v48 }
0x1bda   :  { %v4593_v49 = vpop.eup %4592 }
0x1bdb   :  { %v2639_v52 = vmul.f32 %v4593_v49, %v4589_v31 }
0x1bdc   :  { %v4595_v51 = vpop.eup %4594 }
0x1bdd   :  { %v2640_v53 = vmul.f32 %v4595_v51, %v4591_v42  ;;  %v4673_v42 = vld [vmem:[%s5871_s11 + $0x2] ss:$0 sm:$0xff] }
0x1bdf   :  { %v2641_v54 = vpack.c.bf16 %v2640_v53, %v2639_v52 }
0x1be1   :  { %4309 = vmatmul.mubr.msk.bf16.vlgmr.msra.gmra.mrb[72].mxu0 %vm437_vm3, %v2641_v54 }
0x1be2   :  { %4319 = vmatpush3.bf16.msra.mxu0 %v4657_v55  ;;  %4320 = vmatprep.mubr.msk.bf16.mxu0 %vm4710_vm1, %v4709_v15 }
0x1be3   :  { %4336 = vmatprep.subr.bf16.mxu0 %v4709_v15 }
0x1be9   :  { %4321 = vmatmul.mubr.msk.bf16.vlgmr.msra.gmra.mrb[76].mxu0 %vm437_vm3, %v2442_v8 }
0x1bea   :  { %4337 = vmatpush3.bf16.msra.mxu0 %v4658_v56  ;;  %4344 = vmatprep.mubr.msk.bf16.mxu0 %vm4710_vm1, %v4709_v15 }
0x1beb   :  { %4338 = vmatprep.subr.bf16.mxu0 %v4709_v15 }
0x1bee   :  { %4339 = vmatpush3.bf16.msra.mxu0 %v4659_v57 }
0x1bef   :  { %4340 = vmatprep.subr.bf16.mxu0 %v4709_v15 }
0x1bf2   :  { %4341 = vmatpush3.bf16.msra.mxu0 %v4660_v58 }
0x1bf3   :  { %4342 = vmatprep.subr.bf16.mxu0 %v4709_v15 }
0x1bf6   :  { %4343 = vmatpush3.bf16.msra.mxu0 %v4661_v59 }
0x1bf7   :  { %4360 = vmatprep.subr.bf16.mxu0 %v4709_v15 }
0x1bf9   :  { %4345 = vmatmul.mubr.msk.bf16.vlgmr.msra.gmra.mrb[80].mxu0 %vm230_vm2, %v5410_v39 }
0x1bfa   :  { %4362 = vmatprep.mubr.msk.bf16.mxu0 %vm4710_vm1, %v4709_v15 }
0x1cb4   :  { %v2680_v60 = vpop.f32.mrb[72].mxu0 }
0x1cb5   :  { %v4310_v62 = vpop.f32.mrb[73].mxu0 }
0x1cb6   :  { %v2683_v61 = vpop.f32.mrb[74].mxu0 }
0x1cb7   :  { %v2687_v50 = vpack.c.bf16 %v2683_v61, %v2680_v60  ;;  %v4311_v0 = vpop.f32.mrb[75].mxu0 }
0x1cb9   :  { %4315 = vmatmul.mubr.msk.bf16.vlgmr.msra.gmra.mrb[72].mxu1 %vm437_vm3, %v2687_v50 }
0x1cba   :  { %4325 = vmatpush3.bf16.msra.mxu1 %v4662_v1  ;;  %4332 = vmatprep.mubr.msk.bf16.mxu1 %vm4710_vm1, %v4709_v15 }
0x1cbb   :  { %4326 = vmatprep.subr.bf16.mxu1 %v4709_v15 }
0x1cbc   :  { %v2769_v2 = vpop.f32.mrb[76].mxu0 }
0x1cbd   :  { %v4322_v63 = vpop.f32.mrb[77].mxu0 }
0x1cbe   :  { %4327 = vmatpush3.bf16.msra.mxu1 %v4663_v3  ;;  %v2772_v46 = vpop.f32.mrb[78].mxu0 }
0x1cbf   :  { %v4323_v47 = vpop.f32.mrb[79].mxu0  ;;  %4328 = vmatprep.subr.bf16.mxu1 %v4709_v15 }
0x1cc2   :  { %4329 = vmatpush3.bf16.msra.mxu1 %v4664_v4 }
0x1cc3   :  { %4330 = vmatprep.subr.bf16.mxu1 %v4709_v15 }
0x1cc6   :  { %4331 = vmatpush3.bf16.msra.mxu1 %v4665_v5 }
0x1cc7   :  { %4348 = vmatprep.subr.bf16.mxu1 %v4709_v15 }
0x1cc9   :  { %4333 = vmatmul.mubr.msk.bf16.vlgmr.msra.gmra.mrb[76].mxu1 %vm230_vm2, %v5410_v39 }
0x1cca   :  { %4349 = vmatpush3.bf16.msra.mxu1 %v4666_v6  ;;  %4356 = vmatprep.mubr.msk.bf16.mxu1 %vm4710_vm1, %v4709_v15 }
0x1ccb   :  { %4350 = vmatprep.subr.bf16.mxu1 %v4709_v15 }
0x1ccc   :  { %v2851_v7 = vpop.f32.mrb[80].mxu0 }
0x1ccd   :  { %v4346_v8 = vpop.f32.mrb[81].mxu0  ;;  %v2852_v10 = vadd.f32 %v4668_v9, %v2851_v7 }
0x1cce   :  { %v2854_v32 = vpop.f32.mrb[82].mxu0  ;;  %4351 = vmatpush3.bf16.msra.mxu1 %v4667_v35 }
0x1ccf   :  { %v2855_v11 = vadd.f32 %v4668_v9, %v2854_v32  ;;  %v4347_v12 = vpop.f32.mrb[83].mxu0  ;;  %4352 = vmatprep.subr.bf16.mxu1 %v4709_v15  ;;  %v4674_v9 = vld [vmem:[%s5901_s4 + $0x60] sm:$0xff]  }
0x1cd0   :  { %v4677_v12 = vld [vmem:[%s5901_s4 + $0x78] sm:$0xff]  }
0x1cd1   :  { %v2900_v13 = vpack.c.bf16 %v2855_v11, %v2852_v10  ;;  %v4675_v10 = vld [vmem:[%s5901_s4 + $0x68] sm:$0xff]   ;;  %v4676_v11 = vld [vmem:[%s5901_s4 + $0x70] sm:$0xff]  }
0x1cd2   :  { %4353 = vmatpush3.bf16.msra.mxu1 %v4669_v14  ;;  %v4679_v14 = vld [vmem:[%s5902_s8 + $0x68] sm:$0xff]  }
0x1cd3   :  { %v2905_v16 = vsel %vm437_vm3, %v2900_v13, 0  ;;  %4354 = vmatprep.subr.bf16.mxu1 %v4709_v15  ;;  %v4678_v13 = vld [vmem:[%s5902_s8 + $0x60] sm:$0xff]  }
0x1cd4   :  { %4361 = vmatpush3.bf16.xpose.msra.mxu0 %v2905_v16  ;;  %v4680_v16 = vld [vmem:[%s5902_s8 + $0x70] sm:$0xff]  }
0x1cd5   :  { %4366 = vmatprep.subr.bf16.mxu0 %v4709_v15 }
0x1cd6   :  { %4355 = vmatpush3.bf16.msra.mxu1 %v4670_v17  ;;  %v4681_v17 = vld [vmem:[%s5902_s8 + $0x78] sm:$0xff]  }
0x1cd7   :  { %4372 = vmatprep.subr.bf16.mxu1 %v4709_v15 }
0x1cd9   :  { %4357 = vmatmul.mubr.msk.bf16.vlgmr.msra.gmra.mrb[80].mxu1 %vm230_vm2, %v5410_v39 }
0x1cda   :  { %4373 = vmatpush3.bf16.msra.mxu1 %v4671_v18  ;;  %4374 = vmatprep.mubr.msk.bf16.mxu1 %vm4710_vm1, %v4709_v15  ;;  %v4682_v18 = vld [vmem:[%s5873_s12 + $0x18] sm:$0xff]  }
0x1cdb   :  { %4390 = vmatprep.subr.bf16.mxu1 %v4709_v15 }
0x1d8c   :  { %v2725_v19 = vpop.f32.mrb[72].mxu1 }
0x1d8d   :  { %v5650_v22 = vadd.f32 %v2769_v2, %v2725_v19  ;;  %v4316_v20 = vpop.f32.mrb[73].mxu1 }
0x1d8e   :  { %v2728_v24 = vpop.f32.mrb[74].mxu1 }
0x1d8f   :  { %v5652_v25 = vadd.f32 %v2772_v46, %v2728_v24  ;;  %v4317_v26 = vpop.f32.mrb[75].mxu1 }
0x1d9c   :  { %v2810_v41 = vpop.f32.mrb[76].mxu1 }
0x1d9d   :  { %v4334_v27 = vpop.f32.mrb[77].mxu1  ;;  %v2811_v33 = vadd.f32 %v4672_v30, %v2810_v41 }
0x1d9e   :  { %v2813_v45 = vpop.f32.mrb[78].mxu1  ;;  %v4683_v27 = vld [vmem:[%s5898_s26 + $0x60] sm:$0xff]  }
0x1d9f   :  { %v2814_v34 = vadd.f32 %v4672_v30, %v2813_v45  ;;  %v4335_v38 = vpop.f32.mrb[79].mxu1  ;;  %v4684_v45 = vld [vmem:[%s5898_s26 + $0x68] sm:$0xff]   ;;  %v4685_v30 = vld [vmem:[%s5898_s26 + $0x70] sm:$0xff]  }
0x1da1   :  { %v2899_v28 = vpack.c.bf16 %v2814_v34, %v2811_v33 }
0x1da3   :  { %4363 = vmatmul.mubr.msk.bf16.vlgmr.msra.gmra.mrb[84].mxu0 %vm437_vm3, %v2899_v28  ;;  %v4686_v28 = vld [vmem:[%s5898_s26 + $0x78] sm:$0xff]  }
0x1da4   :  { %4368 = vmatprep.mubr.msk.bf16.mxu0 %vm4710_vm1, %v4709_v15 }
0x1dac   :  { %v2892_v29 = vpop.f32.mrb[80].mxu1 }
0x1dad   :  { %v4358_v31 = vpop.f32.mrb[81].mxu1  ;;  %v2893_v43 = vadd.f32 %v4673_v42, %v2892_v29  ;;  %v4687_v29 = vld [vmem:[%s5869_s9 + $0x3] ss:$0 sm:$0xff] }
0x1dae   :  { %v2895_v40 = vpop.f32.mrb[82].mxu1 }
0x1daf   :  { %v2896_v44 = vadd.f32 %v4673_v42, %v2895_v40  ;;  %v4359_v48 = vpop.f32.mrb[83].mxu1 }
0x1db1   :  { %v2975_v49 = vpack.c.bf16 %v2896_v44, %v2893_v43 }
0x1db3   :  { %4367 = vmatpush3.bf16.msra.mxu0 %v2975_v49 }
0x1db4   :  { %4378 = vmatprep.subr.bf16.mxu0 %v4709_v15 }
0x1e76   :  { %v2941_v51 = vpop.f32.mrb[84].mxu0 }
0x1e77   :  { %v2948_v52 = vmul.f32 0.25, %v2941_v51  ;;  %v4364_v53 = vpop.f32.mrb[85].mxu0  ;;  %v4688_v51 = vld [vmem:[%s5871_s11 + $0x3] ss:$0 sm:$0xff] }
0x1e78   :  { %v2944_v54 = vpop.f32.mrb[86].mxu0 }
0x1e79   :  { %v2949_v55 = vmul.f32 0.25, %v2944_v54  ;;  %v4365_v56 = vpop.f32.mrb[87].mxu0  ;;  %v2950_v57 = vadd.f32 %v5502_v23, %v2948_v52 }
0x1e7b   :  { %v2952_v58 = vsel %vm437_vm3, %v2950_v57, -inf  ;;  %v2951_v59 = vadd.f32 %v5509_v21, %v2949_v55 }
0x1e7c   :  { %2953 = vmax.xlane.f32.xlu0 %v2952_v58 }
0x1e7d   :  { %v2955_v60 = vsel %vm437_vm3, %v2951_v59, -inf }
0x1e7e   :  { %2956 = vmax.xlane.f32.xlu1 %v2955_v60 }
0x1f09   :  { %v2954_v62 = vpop.xlane.xlu0 %2953 }
0x1f0a   :  { %v2958_v61 = vsub.f32 %v2950_v57, %v2954_v62 }
0x1f0b   :  { %v2957_v50 = vpop.xlane.xlu1 %2956 }
0x1f0c   :  { %v2960_v0 = vmul.f32 1.442695, %v2958_v61  ;;  %v2959_v1 = vsub.f32 %v2951_v59, %v2957_v50 }
0x1f0e   :  { %4596 = vpow2.f32 %v2960_v0  ;;  %v2962_v2 = vmul.f32 1.442695, %v2959_v1  ;;  %v4689_v0 = vld [vmem:[%s5870_s10 + $0x3] ss:$0 sm:$0xff] }
0x1f10   :  { %4598 = vpow2.f32 %v2962_v2 }
0x1f18   :  { %v4597_v63 = vpop.eup %4596 }
0x1f19   :  { %v2964_v3 = vsel %vm437_vm3, %v4597_v63, 0.0 }
0x1f1a   :  { %v4599_v46 = vpop.eup %4598  ;;  %2965 = vadd.xlane.f32.xlu0 %v2964_v3 }
0x1f1b   :  { %v2967_v47 = vsel %vm437_vm3, %v4599_v46, 0.0 }
0x1f1c   :  { %2968 = vadd.xlane.f32.xlu1 %v2967_v47 }
0x1fa7   :  { %v2966_v4 = vpop.xlane.xlu0 %2965 }
0x1fa8   :  { %4600 = vrcp.f32 %v2966_v4 }
0x1fa9   :  { %v2969_v5 = vpop.xlane.xlu1 %2968 }
0x1faa   :  { %4602 = vrcp.f32 %v2969_v5 }
0x1fb2   :  { %v4601_v6 = vpop.eup %4600 }
0x1fb3   :  { %v2972_v8 = vmul.f32 %v4601_v6, %v4597_v63 }
0x1fb4   :  { %v4603_v7 = vpop.eup %4602 }
0x1fb5   :  { %v2973_v32 = vmul.f32 %v4603_v7, %v4599_v46 }
0x1fb7   :  { %v2974_v35 = vpack.c.bf16 %v2973_v32, %v2972_v8 }
0x1fb9   :  { %4369 = vmatmul.mubr.msk.bf16.vlgmr.msra.gmra.mrb[88].mxu0 %vm437_vm3, %v2974_v35 }
0x1fba   :  { %4379 = vmatpush3.bf16.msra.mxu0 %v4674_v9  ;;  %4386 = vmatprep.mubr.msk.bf16.mxu0 %vm4710_vm1, %v4709_v15 }
0x1fbb   :  { %4380 = vmatprep.subr.bf16.mxu0 %v4709_v15 }
0x1fbe   :  { %4381 = vmatpush3.bf16.msra.mxu0 %v4675_v10 }
0x1fbf   :  { %4382 = vmatprep.subr.bf16.mxu0 %v4709_v15 }
0x1fc2   :  { %4383 = vmatpush3.bf16.msra.mxu0 %v4676_v11 }
0x1fc3   :  { %4384 = vmatprep.subr.bf16.mxu0 %v4709_v15 }
0x1fc6   :  { %4385 = vmatpush3.bf16.msra.mxu0 %v4677_v12 }
0x1fc7   :  { %4402 = vmatprep.subr.bf16.mxu0 %v4709_v15 }
0x1fc9   :  { %4387 = vmatmul.mubr.msk.bf16.vlgmr.msra.gmra.mrb[92].mxu0 %vm230_vm2, %v5410_v39 }
0x1fca   :  { %4403 = vmatpush3.bf16.msra.mxu0 %v4678_v13  ;;  %4410 = vmatprep.mubr.msk.bf16.mxu0 %vm4710_vm1, %v4709_v15 }
0x1fcb   :  { %4404 = vmatprep.subr.bf16.mxu0 %v4709_v15 }
0x1fce   :  { %4405 = vmatpush3.bf16.msra.mxu0 %v4679_v14 }
0x1fcf   :  { %4406 = vmatprep.subr.bf16.mxu0 %v4709_v15 }
0x1fd2   :  { %4407 = vmatpush3.bf16.msra.mxu0 %v4680_v16 }
0x1fd3   :  { %4408 = vmatprep.subr.bf16.mxu0 %v4709_v15 }
0x1fd6   :  { %4409 = vmatpush3.bf16.msra.mxu0 %v4681_v17 }
0x1fd7   :  { %4426 = vmatprep.subr.bf16.mxu0 %v4709_v15 }
0x1fd9   :  { %4411 = vmatmul.mubr.msk.bf16.vlgmr.msra.gmra.mrb[96].mxu0 %vm230_vm2, %v5410_v39 }
0x1fda   :  { %4427 = vmatpush3.bf16.msra.mxu0 %v4682_v18  ;;  %4428 = vmatprep.mubr.msk.bf16.mxu0 %vm4710_vm1, %v4709_v15 }
0x1fdb   :  { %4444 = vmatprep.subr.bf16.mxu0 %v4709_v15 }
0x208c   :  { %v3013_v19 = vpop.f32.mrb[88].mxu0 }
0x208d   :  { %v4370_v20 = vpop.f32.mrb[89].mxu0 }
0x208e   :  { %v3016_v24 = vpop.f32.mrb[90].mxu0 }
0x208f   :  { %v3020_v26 = vpack.c.bf16 %v3016_v24, %v3013_v19  ;;  %v4371_v41 = vpop.f32.mrb[91].mxu0 }
0x2091   :  { %4375 = vmatmul.mubr.msk.bf16.vlgmr.msra.gmra.mrb[84].mxu1 %vm437_vm3, %v3020_v26 }
0x2092   :  { %4391 = vmatpush3.bf16.msra.mxu1 %v4683_v27  ;;  %4398 = vmatprep.mubr.msk.bf16.mxu1 %vm4710_vm1, %v4709_v15 }
0x2093   :  { %4392 = vmatprep.subr.bf16.mxu1 %v4709_v15 }
0x2096   :  { %4393 = vmatpush3.bf16.msra.mxu1 %v4684_v45  ;;  %v4690_v45 = vld [vmem:[%s5875_s16] sm:$0xff]  }
0x2097   :  { %4394 = vmatprep.subr.bf16.mxu1 %v4709_v15 }
0x209a   :  { %4395 = vmatpush3.bf16.msra.mxu1 %v4685_v30  ;;  %v4691_v30 = vld [vmem:[%s5875_s16 + $0x8] sm:$0xff]  }
0x209b   :  { %4396 = vmatprep.subr.bf16.mxu1 %v4709_v15 }
0x209c   :  { %v3101_v33 = vpop.f32.mrb[92].mxu0 }
0x209d   :  { %v4388_v34 = vpop.f32.mrb[93].mxu0  ;;  %v3102_v31 = vadd.f32 %v4687_v29, %v3101_v33  ;;  %v4692_v33 = vld [vmem:[%s5875_s16 + $0x10] sm:$0xff]  }
0x209e   :  { %v3104_v38 = vpop.f32.mrb[94].mxu0  ;;  %4397 = vmatpush3.bf16.msra.mxu1 %v4686_v28  ;;  %v4693_v34 = vld [vmem:[%s5875_s16 + $0x18] sm:$0xff]  }
0x209f   :  { %v3105_v40 = vadd.f32 %v4687_v29, %v3104_v38  ;;  %v4389_v42 = vpop.f32.mrb[95].mxu0  ;;  %4414 = vmatprep.subr.bf16.mxu1 %v4709_v15 }
0x20a0   :  { %v4694_v42 = vld [vmem:[%s5878_s18] sm:$0xff]  }
0x20a1   :  { %v3190_v43 = vpack.c.bf16 %v3105_v40, %v3102_v31  ;;  %4399 = vmatmul.mubr.msk.bf16.vlgmr.msra.gmra.mrb[88].mxu1 %vm230_vm2, %v5410_v39 }
0x20a2   :  { %4416 = vmatprep.mubr.msk.bf16.mxu1 %vm4710_vm1, %v4709_v15 }
0x20ac   :  { %v3183_v44 = vpop.f32.mrb[96].mxu0 }
0x20ad   :  { %v4412_v48 = vpop.f32.mrb[97].mxu0  ;;  %v3184_v52 = vadd.f32 %v4688_v51, %v3183_v44  ;;  %v4696_v44 = vld [vmem:[%s5878_s18 + $0x10] sm:$0xff]  }
0x20ae   :  { %v3186_v49 = vpop.f32.mrb[98].mxu0  ;;  %v4697_v48 = vld [vmem:[%s5878_s18 + $0x18] sm:$0xff]  }
0x20af   :  { %v3187_v53 = vadd.f32 %v4688_v51, %v3186_v49  ;;  %v4413_v54 = vpop.f32.mrb[99].mxu0  ;;  %v4698_v49 = vld [vmem:[%s5878_s18 + $0x20] sm:$0xff]   ;;  %v4699_v51 = vld [vmem:[%s5878_s18 + $0x28] sm:$0xff]  }
0x20b1   :  { %v3266_v55 = vpack.c.bf16 %v3187_v53, %v3184_v52  ;;  %v4700_v52 = vld [vmem:[%s5878_s18 + $0x30] sm:$0xff]   ;;  %v4701_v53 = vld [vmem:[%s5878_s18 + $0x38] sm:$0xff]  }
0x2164   :  { %v3058_v56 = vpop.f32.mrb[84].mxu1 }
0x2165   :  { %v5747_v57 = vadd.f32 %v3058_v56, %v5650_v22  ;;  %v4376_v58 = vpop.f32.mrb[85].mxu1 }
0x2166   :  { %v3061_v39 = vpop.f32.mrb[86].mxu1 }
0x2167   :  { %v5750_v59 = vadd.f32 %v3061_v39, %v5652_v25  ;;  %v4377_v60 = vpop.f32.mrb[87].mxu1  ;;  %v4702_v39 = vld [vmem:[%s5874_s13] ss:$0 sm:$0xff] }
0x2174   :  { %v3142_v62 = vpop.f32.mrb[88].mxu1 }
0x2175   :  { %v4400_v61 = vpop.f32.mrb[89].mxu1  ;;  %v3143_v1 = vadd.f32 %v4689_v0, %v3142_v62 }
0x2176   :  { %v3145_v50 = vpop.f32.mrb[90].mxu1 }
0x2177   :  { %v3146_v2 = vadd.f32 %v4689_v0, %v3145_v50  ;;  %v4401_v63 = vpop.f32.mrb[91].mxu1 }
0x2179   :  { %v3191_v3 = vpack.c.bf16 %v3146_v2, %v3143_v1 }
0x217b   :  { %v3196_v22 = vsel %vm437_vm3, %v3191_v3, 0 }
0x217c   :  { %4415 = vmatpush3.bf16.xpose.msra.mxu1 %v3196_v22 }
0x217d   :  { %4420 = vmatprep.subr.bf16.mxu1 %v4709_v15 }
0x2183   :  { %4417 = vmatmul.mubr.msk.bf16.vlgmr.msra.gmra.mrb[92].mxu1 %vm437_vm3, %v3190_v43  ;;  %v4695_v43 = vld [vmem:[%s5878_s18 + $0x8] sm:$0xff]  }
0x2184   :  { %4421 = vmatpush3.bf16.msra.mxu1 %v3266_v55  ;;  %4422 = vmatprep.mubr.msk.bf16.mxu1 %vm4710_vm1, %v4709_v15 }
0x2185   :  { %4432 = vmatprep.subr.bf16.mxu1 %v4709_v15 }
0x2256   :  { %v3232_v25 = vpop.f32.mrb[92].mxu1 }
0x2257   :  { %v3239_v46 = vmul.f32 0.25, %v3232_v25  ;;  %v4418_v47 = vpop.f32.mrb[93].mxu1 }
0x2258   :  { %v3235_v4 = vpop.f32.mrb[94].mxu1 }
0x2259   :  { %v3240_v5 = vmul.f32 0.25, %v3235_v4  ;;  %v4419_v6 = vpop.f32.mrb[95].mxu1  ;;  %v3241_v7 = vadd.f32 %v5502_v23, %v3239_v46 }
0x225b   :  { %v3243_v8 = vsel %vm437_vm3, %v3241_v7, -inf  ;;  %v3242_v32 = vadd.f32 %v5509_v21, %v3240_v5 }
0x225c   :  { %3244 = vmax.xlane.f32.xlu0 %v3243_v8 }
0x225d   :  { %v3246_v35 = vsel %vm437_vm3, %v3242_v32, -inf }
0x225e   :  { %3247 = vmax.xlane.f32.xlu1 %v3246_v35 }
0x22e9   :  { %v3245_v9 = vpop.xlane.xlu0 %3244 }
0x22ea   :  { %v3249_v10 = vsub.f32 %v3241_v7, %v3245_v9 }
0x22eb   :  { %v3248_v11 = vpop.xlane.xlu1 %3247 }
0x22ec   :  { %v3251_v12 = vmul.f32 1.442695, %v3249_v10  ;;  %v3250_v13 = vsub.f32 %v3242_v32, %v3248_v11  ;;  %v4703_v11 = vld [vmem:[%s5876_s14] ss:$0 sm:$0xff] }
0x22ee   :  { %4604 = vpow2.f32 %v3251_v12  ;;  %v3253_v14 = vmul.f32 1.442695, %v3250_v13 }
0x22f0   :  { %4606 = vpow2.f32 %v3253_v14 }
0x22f8   :  { %v4605_v16 = vpop.eup %4604 }
0x22f9   :  { %v3255_v17 = vsel %vm437_vm3, %v4605_v16, 0.0 }
0x22fa   :  { %v4607_v23 = vpop.eup %4606  ;;  %3256 = vadd.xlane.f32.xlu0 %v3255_v17 }
0x22fb   :  { %v3258_v18 = vsel %vm437_vm3, %v4607_v23, 0.0 }
0x22fc   :  { %3259 = vadd.xlane.f32.xlu1 %v3258_v18 }
0x2387   :  { %v3257_v21 = vpop.xlane.xlu0 %3256 }
0x2388   :  { %4608 = vrcp.f32 %v3257_v21 }
0x2389   :  { %v3260_v19 = vpop.xlane.xlu1 %3259 }
0x238a   :  { %4610 = vrcp.f32 %v3260_v19  ;;  %v4705_v19 = vld [vmem:[%s5879_s17] ss:$0 sm:$0xff] }
0x2392   :  { %v4609_v20 = vpop.eup %4608 }
0x2393   :  { %v3263_v26 = vmul.f32 %v4609_v20, %v4605_v16  ;;  %v4704_v16 = vld [vmem:[%s5877_s15] ss:$0 sm:$0xff] }
0x2394   :  { %v4611_v24 = vpop.eup %4610 }
0x2395   :  { %v3264_v41 = vmul.f32 %v4611_v24, %v4607_v23 }
0x2397   :  { %v3265_v27 = vpack.c.bf16 %v3264_v41, %v3263_v26 }
0x2399   :  { %4423 = vmatmul.mubr.msk.bf16.vlgmr.msra.gmra.mrb[96].mxu1 %vm437_vm3, %v3265_v27 }
0x239a   :  { %4433 = vmatpush3.bf16.msra.mxu1 %v4690_v45  ;;  %4440 = vmatprep.mubr.msk.bf16.mxu1 %vm4710_vm1, %v4709_v15 }
0x239b   :  { %4434 = vmatprep.subr.bf16.mxu1 %v4709_v15 }
0x239e   :  { %4435 = vmatpush3.bf16.msra.mxu1 %v4691_v30 }
0x239f   :  { %4436 = vmatprep.subr.bf16.mxu1 %v4709_v15 }
0x23a2   :  { %4437 = vmatpush3.bf16.msra.mxu1 %v4692_v33 }
0x23a3   :  { %4438 = vmatprep.subr.bf16.mxu1 %v4709_v15 }
0x23a6   :  { %4439 = vmatpush3.bf16.msra.mxu1 %v4693_v34 }
0x246c   :  { %v3304_v38 = vpop.f32.mrb[96].mxu1 }
0x246d   :  { %v4424_v28 = vpop.f32.mrb[97].mxu1 }
0x246e   :  { %v3307_v29 = vpop.f32.mrb[98].mxu1 }
0x246f   :  { %v3311_v31 = vpack.c.bf16 %v3307_v29, %v3304_v38  ;;  %v4425_v40 = vpop.f32.mrb[99].mxu1 }
0x2471   :  { %4429 = vmatmul.mubr.msk.bf16.vlgmr.msra.gmra.mrb[100].mxu0 %vm437_vm3, %v3311_v31 }
0x2472   :  { %4445 = vmatpush3.bf16.msra.mxu0 %v4694_v42  ;;  %4460 = vmatprep.mubr.msk.bf16.mxu0 %vm4710_vm1, %v4709_v15 }
0x2473   :  { %4446 = vmatprep.subr.bf16.mxu0 %v4709_v15 }
0x2476   :  { %4447 = vmatpush3.bf16.msra.mxu0 %v4695_v43 }
0x2477   :  { %4448 = vmatprep.subr.bf16.mxu0 %v4709_v15 }
0x247a   :  { %4449 = vmatpush3.bf16.msra.mxu0 %v4696_v44 }
0x247b   :  { %4450 = vmatprep.subr.bf16.mxu0 %v4709_v15 }
0x247e   :  { %4451 = vmatpush3.bf16.msra.mxu0 %v4697_v48 }
0x247f   :  { %4452 = vmatprep.subr.bf16.mxu0 %v4709_v15 }
0x2482   :  { %4453 = vmatpush3.bf16.msra.mxu0 %v4698_v49 }
0x2483   :  { %4454 = vmatprep.subr.bf16.mxu0 %v4709_v15 }
0x2486   :  { %4455 = vmatpush3.bf16.msra.mxu0 %v4699_v51 }
0x2487   :  { %4456 = vmatprep.subr.bf16.mxu0 %v4709_v15 }
0x248a   :  { %4457 = vmatpush3.bf16.msra.mxu0 %v4700_v52 }
0x248b   :  { %4458 = vmatprep.subr.bf16.mxu0 %v4709_v15 }
0x248e   :  { %4459 = vmatpush3.bf16.msra.mxu0 %v4701_v53 }
0x2544   :  { %v3349_v54 = vpop.f32.mrb[100].mxu0 }
0x2545   :  { %v3356_v55 = vadd.f32 %v3349_v54, %v5747_v57  ;;  %v4430_v56 = vpop.f32.mrb[101].mxu0 }
0x2546   :  { %v3352_v58 = vpop.f32.mrb[102].mxu0 }
0x2547   :  { %v3358_v60 = vadd.f32 %v4702_v39, %v3356_v55  ;;  %v3357_v62 = vadd.f32 %v3352_v58, %v5750_v59  ;;  %v4431_v61 = vpop.f32.mrb[103].mxu0  ;;  %v4706_v58 = vld [vmem:[%s5880_s19] ss:$0 sm:$0xff] }
0x2549   :  { %v3359_v50 = vadd.f32 %v4702_v39, %v3357_v62  ;;  %v3360_v15 = vadd.f32 %v3358_v60, %v5404_v36 }
0x254b   :  { %v3362_v0 = vsel %vm230_vm2, %v3360_v15, 0.0  ;;  %v3361_v1 = vadd.f32 %v3359_v50, %v5406_v37 }
0x254c   :  { %3363 = vadd.xlane.f32.xlu0 %v3362_v0 }
0x254d   :  { %v3365_v57 = vsel %vm230_vm2, %v3361_v1, 0.0 }
0x254e   :  { %3366 = vadd.xlane.f32.xlu1 %v3365_v57 }
0x25d9   :  { %v3364_v2 = vpop.xlane.xlu0 %3363 }
0x25da   :  { %v3368_v63 = vmul.f32 0.015625, %v3364_v2 }
0x25db   :  { %v3367_v3 = vpop.xlane.xlu1 %3366 }
0x25dc   :  { %v3370_v22 = vsub.f32 %v3360_v15, %v3368_v63  ;;  %v3369_v25 = vmul.f32 0.015625, %v3367_v3 }
0x25de   :  { %v3371_v46 = vsub.f32 %v3361_v1, %v3369_v25  ;;  %v3372_v47 = vmul.f32 %v3370_v22, %v3370_v22 }
0x25e0   :  { %v3374_v59 = vsel %vm230_vm2, %v3372_v47, 0.0  ;;  %v3373_v4 = vmul.f32 %v3371_v46, %v3371_v46 }
0x25e1   :  { %3375 = vadd.xlane.f32.xlu0 %v3374_v59 }
0x25e2   :  { %v3377_v36 = vsel %vm230_vm2, %v3373_v4, 0.0 }
0x25e3   :  { %3378 = vadd.xlane.f32.xlu1 %v3377_v36 }
0x266e   :  { %v3376_v5 = vpop.xlane.xlu0 %3375 }
0x266f   :  { %v3380_v37 = vmul.f32 0.015625, %v3376_v5 }
0x2670   :  { %v3379_v6 = vpop.xlane.xlu1 %3378 }
0x2671   :  { %v3382_v7 = vadd.f32 1e-12, %v3380_v37  ;;  %v3381_v8 = vmul.f32 0.015625, %v3379_v6 }
0x2673   :  { %4612 = vrsqrt.f32 %v3382_v7  ;;  %v3383_v32 = vadd.f32 1e-12, %v3381_v8 }
0x2675   :  { %4614 = vrsqrt.f32 %v3383_v32 }
0x267d   :  { %v4613_v35 = vpop.eup %4612 }
0x267e   :  { %v3386_v9 = vmul.f32 %v4613_v35, %v3370_v22 }
0x267f   :  { %v4615_v10 = vpop.eup %4614 }
0x2680   :  { %v3388_v12 = vmul.f32 %v4703_v11, %v3386_v9  ;;  %v3387_v13 = vmul.f32 %v4615_v10, %v3371_v46 }
0x2682   :  { %v3389_v14 = vmul.f32 %v4703_v11, %v3387_v13  ;;  %v3390_v17 = vadd.f32 %v4704_v16, %v3388_v12  ;;  %v4707_v11 = vld [vmem:[%s5881_s20] ss:$0 sm:$0xff] }
0x2684   :  { %v3391_v23 = vadd.f32 %v4704_v16, %v3389_v14  ;;  %v4708_v14 = vld [vmem:[%s5882_s21] ss:$0 sm:$0xff] }
0x2686   :  { %v3392_v18 = vpack.c.bf16 %v3391_v23, %v3390_v17 }
0x2688   :  { %4441 = vmatmul.mubr.msk.bf16.vlgmr.msra.gmra.mrb[100].mxu1 %vm230_vm2, %v3392_v18 }
0x275b   :  { %v3430_v21 = vpop.f32.mrb[100].mxu1 }
0x275c   :  { %v3431_v20 = vadd.f32 %v4705_v19, %v3430_v21  ;;  %v4442_v24 = vpop.f32.mrb[101].mxu1 }
0x275d   :  { %v3433_v26 = vpop.f32.mrb[102].mxu1 }
0x275e   :  { %v3439_v41 = vmul.f32 0.044715, %v3431_v20  ;;  %v3434_v27 = vadd.f32 %v4705_v19, %v3433_v26  ;;  %v4443_v45 = vpop.f32.mrb[103].mxu1  ;;  %v3437_v49 = vmul.f32 0.5, %v3431_v20 }
0x2760   :  { %v3441_v30 = vmul.f32 %v3439_v41, %v3431_v20  ;;  %v3440_v33 = vmul.f32 0.044715, %v3434_v27  ;;  %v3438_v51 = vmul.f32 0.5, %v3434_v27 }
0x2762   :  { %v3443_v34 = vmul.f32 %v3441_v30, %v3431_v20  ;;  %v3442_v38 = vmul.f32 %v3440_v33, %v3434_v27 }
0x2764   :  { %v3445_v28 = vadd.f32 %v3443_v34, %v3431_v20  ;;  %v3444_v29 = vmul.f32 %v3442_v38, %v3434_v27 }
0x2766   :  { %v3447_v31 = vmul.f32 0.7978846, %v3445_v28  ;;  %v3446_v40 = vadd.f32 %v3444_v29, %v3434_v27 }
0x2768   :  { %4616 = vtanh.f32 %v3447_v31  ;;  %v3448_v42 = vmul.f32 0.7978846, %v3446_v40 }
0x276a   :  { %4618 = vtanh.f32 %v3448_v42 }
0x2772   :  { %v4617_v43 = vpop.eup %4616 }
0x2773   :  { %v3451_v44 = vadd.f32 1.0, %v4617_v43 }
0x2774   :  { %v4619_v48 = vpop.eup %4618 }
0x2775   :  { %v3452_v52 = vadd.f32 1.0, %v4619_v48  ;;  %v3453_v53 = vmul.f32 %v3451_v44, %v3437_v49 }
0x2777   :  { %v3454_v54 = vmul.f32 %v3452_v52, %v3438_v51 }
0x2779   :  { %v3455_v55 = vpack.c.bf16 %v3454_v54, %v3453_v53 }
0x277b   :  { %4461 = vmatmul.mubr.bf16.vlgmr.msra.gmra.mrb[104].mxu0 %v3455_v55 }
0x284e   :  { %v3490_v56 = vpop.f32.mrb[104].mxu0 }
0x284f   :  { %v3491_v39 = vadd.f32 %v4706_v58, %v3490_v56  ;;  %v4462_v60 = vpop.f32.mrb[105].mxu0 }
0x2850   :  { %v3493_v62 = vpop.f32.mrb[106].mxu0 }
0x2851   :  { %v3494_v61 = vadd.f32 %v4706_v58, %v3493_v62  ;;  %v4463_v50 = vpop.f32.mrb[107].mxu0  ;;  %v3497_v15 = vadd.f32 %v3491_v39, %v3390_v17 }
0x2853   :  { %v3499_v0 = vsel %vm230_vm2, %v3497_v15, 0.0  ;;  %v3498_v1 = vadd.f32 %v3494_v61, %v3391_v23 }
0x2854   :  { %3500 = vadd.xlane.f32.xlu0 %v3499_v0 }
0x2855   :  { %v3502_v57 = vsel %vm230_vm2, %v3498_v1, 0.0 }
0x2856   :  { %3503 = vadd.xlane.f32.xlu1 %v3502_v57 }
0x28e1   :  { %v3501_v2 = vpop.xlane.xlu0 %3500 }
0x28e2   :  { %v3505_v63 = vmul.f32 0.015625, %v3501_v2 }
0x28e3   :  { %v3504_v3 = vpop.xlane.xlu1 %3503 }
0x28e4   :  { %v3507_v22 = vsub.f32 %v3497_v15, %v3505_v63  ;;  %v3506_v25 = vmul.f32 0.015625, %v3504_v3 }
0x28e6   :  { %v3508_v46 = vsub.f32 %v3498_v1, %v3506_v25  ;;  %v3509_v47 = vmul.f32 %v3507_v22, %v3507_v22 }
0x28e8   :  { %v3511_v59 = vsel %vm230_vm2, %v3509_v47, 0.0  ;;  %v3510_v4 = vmul.f32 %v3508_v46, %v3508_v46 }
0x28e9   :  { %3512 = vadd.xlane.f32.xlu0 %v3511_v59 }
0x28ea   :  { %v3514_v36 = vsel %vm230_vm2, %v3510_v4, 0.0 }
0x28eb   :  { %3515 = vadd.xlane.f32.xlu1 %v3514_v36 }
0x2976   :  { %v3513_v5 = vpop.xlane.xlu0 %3512 }
0x2977   :  { %v3517_v37 = vmul.f32 0.015625, %v3513_v5 }
0x2978   :  { %v3516_v6 = vpop.xlane.xlu1 %3515 }
0x2979   :  { %v3519_v7 = vadd.f32 1e-12, %v3517_v37  ;;  %v3518_v8 = vmul.f32 0.015625, %v3516_v6 }
0x297b   :  { %4620 = vrsqrt.f32 %v3519_v7  ;;  %v3520_v32 = vadd.f32 1e-12, %v3518_v8 }
0x297d   :  { %4622 = vrsqrt.f32 %v3520_v32 }
0x2985   :  { %v4621_v35 = vpop.eup %4620 }
0x2986   :  { %v3523_v9 = vmul.f32 %v4621_v35, %v3507_v22 }
0x2987   :  { %v4623_v10 = vpop.eup %4622 }
0x2988   :  { %v3525_v12 = vmul.f32 %v4707_v11, %v3523_v9  ;;  %v3524_v13 = vmul.f32 %v4623_v10, %v3508_v46 }
0x298a   :  { %v3527_v16 = vadd.f32 %v4708_v14, %v3525_v12  ;;  %v3526_v17 = vmul.f32 %v4707_v11, %v3524_v13 }
0x298c   :  { %3529 = vst.msk [vmem:[%s5883_s22] sm:$0xff] %vm230_vm2, %v3527_v16  ;;  %v3528_v23 = vadd.f32 %v4708_v14, %v3526_v17 }
0x298e   :  { %3530 = vst.msk [vmem:[%s5883_s22 + $0x8] sm:$0xff] %vm230_vm2, %v3528_v23 }

</bundles_post_ra>
